<compile_context>
chip_gen: v7x
topology: tpu7x:2x2x1
jax: 0.10.0
libtpu: 0.0.40
codegen_flags: <defaults>
</compile_context>

<pallas_src>
import functools

import jax
import jax.numpy as jnp
from jax.experimental import pallas as pl
from jax.experimental.pallas import tpu as pltpu

BN_EPS = 1e-5


def _vmem_limit_bytes():
    # Per-generation VMEM budget: ~65% of physical (v7x: 64 MiB -> ~41 MiB,
    # v5e/v6e: 128 MiB -> ~83 MiB), capped well below any physical ceiling.
    try:
        cap = int(pltpu.get_tpu_info().vmem_capacity_bytes)
    except Exception:
        cap = 64 * 1024 * 1024
    return min(int(cap * 0.65), 100 * 1024 * 1024)


# --------------- Pass A: shifted-matmul conv + per-image BN partial stats ----

def conv_stats_kernel(x_ref, w_ref, mask_ref, y_ref, stats_ref, *, kh, kw, wp, ho):
    # x_ref:     [1, Lp, Cin]        flattened padded image (+ kw-1 slack rows)
    # w_ref:     [kh*kw, Cin, Cout]  per-tap weight matrices
    # mask_ref:  [L, 1]              1.0 on valid output columns, 0.0 on garbage
    # y_ref:     [1, L, Cout]        conv output rows (incl. garbage cols), staged
    # stats_ref: [1, 2, Cout]        per-image partial (sum, sum of squares)
    L = ho * wp
    cout = w_ref.shape[-1]
    x = x_ref[0]                                    # (Lp, Cin), full-block load
    acc = jnp.zeros((L, cout), jnp.float32)
    for ki in range(kh):
        for kj in range(kw):
            z = jnp.dot(x, w_ref[ki * kw + kj],
                        preferred_element_type=jnp.float32)      # (Lp, Cout) f32
            off = ki * wp + kj
            acc = acc + z[off:off + L, :]           # shifted f32 window-add
    y_ref[0] = acc.astype(y_ref.dtype)
    # Stats from the f32 accumulator, with wrap-around garbage columns masked.
    yv = acc * mask_ref[...]
    stats_ref[0] = jnp.concatenate(
        [jnp.sum(yv, axis=0, keepdims=True),
         jnp.sum(yv * acc, axis=0, keepdims=True)], axis=0)


# --------------- Pass B: fused per-channel scale/shift + ReLU ----------------

def bn_relu_kernel(y_ref, scale_ref, shift_ref, o_ref):
    # y_ref: [1, L, Cout]; scale_ref/shift_ref: [1, Cout]; o_ref: [1, L, Cout]
    y = y_ref[0].astype(jnp.float32)
    o_ref[0] = jnp.maximum(y * scale_ref[...] + shift_ref[...], 0.0
                           ).astype(o_ref.dtype)


# --------------- wrapper ------------------------------------------------------

def block_forward(x, conv_w, conv_b, bn_gamma, bn_beta, *,
                  stride=1, padding=1, io_dtype=jnp.bfloat16):
    # x: [N, Cin, H, W] (NCHW); conv_w: [Cout, Cin, kh, kw]; conv_b unused
    # (train-mode BatchNorm cancels the conv bias exactly, so it is dropped).
    del conv_b
    assert stride == 1  # TODO(synk): general stride (row subsample / halo tiles)
    N, Cin, H, W = x.shape
    Cout, _, kh, kw = conv_w.shape
    ph = pw = int(padding)

    Hp, Wp = H + 2 * ph, W + 2 * pw
    Ho, Wo = Hp - kh + 1, Wp - kw + 1
    L = Ho * Wp                       # per-image conv rows (valid + garbage cols)
    Lp = Hp * Wp + (kw - 1)           # flattened input rows (+ slack for last tap)

    # Layout glue (plain XLA, read x once): NCHW -> padded NHWC -> (N, Lp, Cin).
    x_nhwc = jnp.transpose(x, (0, 2, 3, 1))
    x_pad = jnp.pad(x_nhwc, ((0, 0), (ph, ph), (pw, pw), (0, 0)))
    x_flat = x_pad.reshape(N, Hp * Wp, Cin)
    x_flat = jnp.pad(x_flat, ((0, 0), (0, Lp - Hp * Wp), (0, 0))).astype(io_dtype)

    # OIHW -> (kh*kw, Cin, Cout); no K/Cout padding in HBM.
    w_k = jnp.transpose(conv_w, (2, 3, 1, 0)).reshape(kh * kw, Cin, Cout).astype(io_dtype)

    # 1.0 on the Wo valid columns of each flattened row, 0.0 on the Wp-Wo garbage.
    col = jnp.arange(L, dtype=jnp.int32) % Wp
    mask = (col < Wo).astype(jnp.float32).reshape(L, 1)

    vmem_limit = _vmem_limit_bytes()

    # ---- Pass A: in-kernel conv + per-image partial stats (fully parallel) ---
    kern_a = functools.partial(conv_stats_kernel, kh=kh, kw=kw, wp=Wp, ho=Ho)
    y_flat, stats = pl.pallas_call(
        kern_a,
        out_shape=(jax.ShapeDtypeStruct((N, L, Cout), io_dtype),
                   jax.ShapeDtypeStruct((N, 2, Cout), jnp.float32)),
        grid_spec=pltpu.PrefetchScalarGridSpec(
            num_scalar_prefetch=0,
            grid=(N,),
            in_specs=[
                pl.BlockSpec((1, Lp, Cin), lambda n: (n, 0, 0)),
                pl.BlockSpec((kh * kw, Cin, Cout), lambda n: (0, 0, 0)),
                pl.BlockSpec((L, 1), lambda n: (0, 0)),
            ],
            out_specs=(
                pl.BlockSpec((1, L, Cout), lambda n: (n, 0, 0)),
                pl.BlockSpec((1, 2, Cout), lambda n: (n, 0, 0)),
            ),
        ),
        compiler_params=pltpu.CompilerParams(
            dimension_semantics=("parallel",),   # no resident accumulator
            vmem_limit_bytes=vmem_limit),
    )(x_flat, w_k, mask)

    # ---- Fold BN batch stats into one per-channel scale/shift (tiny XLA) -----
    m_valid = float(N * Ho * Wo)
    s = jnp.sum(stats[:, 0, :], axis=0)
    ss = jnp.sum(stats[:, 1, :], axis=0)
    mean = s / m_valid
    var = jnp.maximum(ss / m_valid - mean * mean, 0.0)   # clamp before rsqrt
    inv = jax.lax.rsqrt(var + BN_EPS)
    gamma = bn_gamma.astype(jnp.float32)
    scale = (gamma * inv).reshape(1, Cout)
    shift = (bn_beta.astype(jnp.float32) - mean * gamma * inv).reshape(1, Cout)

    # ---- Pass B: fused scale/shift + ReLU, parallel over images --------------
    out_flat = pl.pallas_call(
        bn_relu_kernel,
        out_shape=jax.ShapeDtypeStruct((N, L, Cout), jnp.float32),
        grid_spec=pltpu.PrefetchScalarGridSpec(
            num_scalar_prefetch=0,
            grid=(N,),
            in_specs=[
                pl.BlockSpec((1, L, Cout), lambda n: (n, 0, 0)),
                pl.BlockSpec((1, Cout), lambda n: (0, 0)),
                pl.BlockSpec((1, Cout), lambda n: (0, 0)),
            ],
            out_specs=pl.BlockSpec((1, L, Cout), lambda n: (n, 0, 0)),
        ),
        compiler_params=pltpu.CompilerParams(
            dimension_semantics=("parallel",),
            vmem_limit_bytes=vmem_limit),
    )(y_flat, scale, shift)

    # Drop garbage columns; back to NCHW (module contract).
    out = out_flat.reshape(N, Ho, Wp, Cout)[:, :, :Wo, :]
    return jnp.transpose(out, (0, 3, 1, 2))


# --------------- pure-JAX reference -------------------------------------------

def reference_forward(x, conv_w, conv_b, bn_gamma, bn_beta, *, stride=1, padding=1):
    y = jax.lax.conv_general_dilated(
        x, conv_w, window_strides=(stride, stride),
        padding=[(padding, padding), (padding, padding)],
        dimension_numbers=("NCHW", "OIHW", "NCHW"))
    y = y + conv_b.reshape(1, -1, 1, 1)
    mean = jnp.mean(y, axis=(0, 2, 3), keepdims=True)
    var = jnp.mean((y - mean) ** 2, axis=(0, 2, 3), keepdims=True)
    y = (y - mean) * jax.lax.rsqrt(var + BN_EPS)
    y = y * bn_gamma.reshape(1, -1, 1, 1) + bn_beta.reshape(1, -1, 1, 1)
    return jnp.maximum(y, 0.0)


if __name__ == "__main__":
    # block(filter_size=3, padding=1, stride=1, nd=2, batchnorm=True,
    #       in_size=4, out_size=8, bias=True)
    N, Cin, H, W = 2, 4, 16, 16
    Cout, kh, kw = 8, 3, 3

    key = jax.random.PRNGKey(0)
    xk, wk, bk = jax.random.split(key, 3)
    x = jax.random.normal(xk, (N, Cin, H, W), dtype=jnp.float32)

    fan_in = Cin * kh * kw
    conv_w = jax.random.normal(wk, (Cout, Cin, kh, kw), dtype=jnp.float32) * (2.0 / fan_in) ** 0.5
    conv_b = jax.random.normal(bk, (Cout,), dtype=jnp.float32) * 0.01
    bn_gamma = jnp.ones((Cout,), dtype=jnp.float32)   # BatchNorm default init
    bn_beta = jnp.zeros((Cout,), dtype=jnp.float32)

    ref = reference_forward(x, conv_w, conv_b, bn_gamma, bn_beta, stride=1, padding=1)

    # f32 staging path: tight check of the conv / BN / ReLU math.
    out32 = jax.block_until_ready(
        block_forward(x, conv_w, conv_b, bn_gamma, bn_beta,
                      stride=1, padding=1, io_dtype=jnp.float32))
    assert out32.shape == (N, Cout, H, W), out32.shape
    assert jnp.allclose(out32, ref, atol=2e-3, rtol=2e-3), \
        float(jnp.max(jnp.abs(out32 - ref)))

    # bf16 staging path (default / fast): tolerance consistent with bf16 rounding
    # of the conv inputs and of the staged intermediate y.
    out16 = jax.block_until_ready(
        block_forward(x, conv_w, conv_b, bn_gamma, bn_beta, stride=1, padding=1))
    assert out16.shape == (N, Cout, H, W), out16.shape
    assert jnp.allclose(out16, ref, atol=5e-2, rtol=5e-2), \
        float(jnp.max(jnp.abs(out16 - ref)))

    print("KERNEL_OK")
</pallas_src>

<mosaic_0001>
module attributes {stable_mosaic.version = 11 : i64} {
  func.func @conv_stats_kernel(%arg0: i32, %arg1: memref<1x326x4xf32, #tpu.memory_space<vmem>>, %arg2: memref<9x4x8xf32, #tpu.memory_space<vmem>>, %arg3: memref<288x1xf32, #tpu.memory_space<vmem>>, %arg4: memref<1x288x8xf32, #tpu.memory_space<vmem>>, %arg5: memref<1x2x8xf32, #tpu.memory_space<vmem>>) attributes {dimension_semantics = [#tpu.dimension_semantics<parallel>], iteration_bounds = array<i64: 2>, scalar_prefetch = 0 : i64, scratch_operands = 0 : i64, tpu.core_type = #tpu.core_type<tc>, window_params = [{transform_indices = @transform_0, window_bounds = array<i64: 1, 326, 4>}, {pipeline_mode = #tpu.pipeline_mode<synchronous>, transform_indices = @transform_1, window_bounds = array<i64: 9, 4, 8>}, {pipeline_mode = #tpu.pipeline_mode<synchronous>, transform_indices = @transform_2, window_bounds = array<i64: 288, 1>}, {transform_indices = @transform_3, window_bounds = array<i64: 1, 288, 8>}, {transform_indices = @transform_4, window_bounds = array<i64: 1, 2, 8>}]} {
    %c0 = arith.constant 0 : index
    %c0_0 = arith.constant 0 : index
    %c0_1 = arith.constant 0 : index
    %0 = vector.load %arg1[%c0, %c0_0, %c0_1] : memref<1x326x4xf32, #tpu.memory_space<vmem>>, vector<1x326x4xf32>
    %1 = vector.shape_cast %0 : vector<1x326x4xf32> to vector<326x4xf32>
    %cst = arith.constant 0.000000e+00 : f32
    %2 = vector.broadcast %cst : f32 to vector<288x8xf32>
    %c0_2 = arith.constant 0 : index
    %c0_3 = arith.constant 0 : index
    %c0_4 = arith.constant 0 : index
    %3 = vector.load %arg2[%c0_2, %c0_3, %c0_4] : memref<9x4x8xf32, #tpu.memory_space<vmem>>, vector<1x4x8xf32>
    %4 = vector.shape_cast %3 : vector<1x4x8xf32> to vector<4x8xf32>
    %cst_5 = arith.constant dense<0.000000e+00> : vector<326x8xf32>
    %5 = tpu.matmul %1, %4, %cst_5 {dimension_numbers = #tpu.dot_dimension_numbers<[1], [0], [0], [1], [0, 0, 1, 1], [], []>} : vector<326x4xf32>, vector<4x8xf32>, vector<326x8xf32> -> vector<326x8xf32>
    %6 = vector.extract_strided_slice %5 {offsets = [0, 0], sizes = [288, 8], strides = [1, 1]} : vector<326x8xf32> to vector<288x8xf32>
    %7 = arith.addf %2, %6 : vector<288x8xf32>
    %c1 = arith.constant 1 : index
    %c0_6 = arith.constant 0 : index
    %c0_7 = arith.constant 0 : index
    %8 = vector.load %arg2[%c1, %c0_6, %c0_7] : memref<9x4x8xf32, #tpu.memory_space<vmem>>, vector<1x4x8xf32>
    %9 = vector.shape_cast %8 : vector<1x4x8xf32> to vector<4x8xf32>
    %cst_8 = arith.constant dense<0.000000e+00> : vector<326x8xf32>
    %10 = tpu.matmul %1, %9, %cst_8 {dimension_numbers = #tpu.dot_dimension_numbers<[1], [0], [0], [1], [0, 0, 1, 1], [], []>} : vector<326x4xf32>, vector<4x8xf32>, vector<326x8xf32> -> vector<326x8xf32>
    %11 = vector.extract_strided_slice %10 {offsets = [1, 0], sizes = [288, 8], strides = [1, 1]} : vector<326x8xf32> to vector<288x8xf32>
    %12 = arith.addf %7, %11 : vector<288x8xf32>
    %c2 = arith.constant 2 : index
    %c0_9 = arith.constant 0 : index
    %c0_10 = arith.constant 0 : index
    %13 = vector.load %arg2[%c2, %c0_9, %c0_10] : memref<9x4x8xf32, #tpu.memory_space<vmem>>, vector<1x4x8xf32>
    %14 = vector.shape_cast %13 : vector<1x4x8xf32> to vector<4x8xf32>
    %cst_11 = arith.constant dense<0.000000e+00> : vector<326x8xf32>
    %15 = tpu.matmul %1, %14, %cst_11 {dimension_numbers = #tpu.dot_dimension_numbers<[1], [0], [0], [1], [0, 0, 1, 1], [], []>} : vector<326x4xf32>, vector<4x8xf32>, vector<326x8xf32> -> vector<326x8xf32>
    %16 = vector.extract_strided_slice %15 {offsets = [2, 0], sizes = [288, 8], strides = [1, 1]} : vector<326x8xf32> to vector<288x8xf32>
    %17 = arith.addf %12, %16 : vector<288x8xf32>
    %c3 = arith.constant 3 : index
    %c0_12 = arith.constant 0 : index
    %c0_13 = arith.constant 0 : index
    %18 = vector.load %arg2[%c3, %c0_12, %c0_13] : memref<9x4x8xf32, #tpu.memory_space<vmem>>, vector<1x4x8xf32>
    %19 = vector.shape_cast %18 : vector<1x4x8xf32> to vector<4x8xf32>
    %cst_14 = arith.constant dense<0.000000e+00> : vector<326x8xf32>
    %20 = tpu.matmul %1, %19, %cst_14 {dimension_numbers = #tpu.dot_dimension_numbers<[1], [0], [0], [1], [0, 0, 1, 1], [], []>} : vector<326x4xf32>, vector<4x8xf32>, vector<326x8xf32> -> vector<326x8xf32>
    %21 = vector.extract_strided_slice %20 {offsets = [18, 0], sizes = [288, 8], strides = [1, 1]} : vector<326x8xf32> to vector<288x8xf32>
    %22 = arith.addf %17, %21 : vector<288x8xf32>
    %c4 = arith.constant 4 : index
    %c0_15 = arith.constant 0 : index
    %c0_16 = arith.constant 0 : index
    %23 = vector.load %arg2[%c4, %c0_15, %c0_16] : memref<9x4x8xf32, #tpu.memory_space<vmem>>, vector<1x4x8xf32>
    %24 = vector.shape_cast %23 : vector<1x4x8xf32> to vector<4x8xf32>
    %cst_17 = arith.constant dense<0.000000e+00> : vector<326x8xf32>
    %25 = tpu.matmul %1, %24, %cst_17 {dimension_numbers = #tpu.dot_dimension_numbers<[1], [0], [0], [1], [0, 0, 1, 1], [], []>} : vector<326x4xf32>, vector<4x8xf32>, vector<326x8xf32> -> vector<326x8xf32>
    %26 = vector.extract_strided_slice %25 {offsets = [19, 0], sizes = [288, 8], strides = [1, 1]} : vector<326x8xf32> to vector<288x8xf32>
    %27 = arith.addf %22, %26 : vector<288x8xf32>
    %c5 = arith.constant 5 : index
    %c0_18 = arith.constant 0 : index
    %c0_19 = arith.constant 0 : index
    %28 = vector.load %arg2[%c5, %c0_18, %c0_19] : memref<9x4x8xf32, #tpu.memory_space<vmem>>, vector<1x4x8xf32>
    %29 = vector.shape_cast %28 : vector<1x4x8xf32> to vector<4x8xf32>
    %cst_20 = arith.constant dense<0.000000e+00> : vector<326x8xf32>
    %30 = tpu.matmul %1, %29, %cst_20 {dimension_numbers = #tpu.dot_dimension_numbers<[1], [0], [0], [1], [0, 0, 1, 1], [], []>} : vector<326x4xf32>, vector<4x8xf32>, vector<326x8xf32> -> vector<326x8xf32>
    %31 = vector.extract_strided_slice %30 {offsets = [20, 0], sizes = [288, 8], strides = [1, 1]} : vector<326x8xf32> to vector<288x8xf32>
    %32 = arith.addf %27, %31 : vector<288x8xf32>
    %c6 = arith.constant 6 : index
    %c0_21 = arith.constant 0 : index
    %c0_22 = arith.constant 0 : index
    %33 = vector.load %arg2[%c6, %c0_21, %c0_22] : memref<9x4x8xf32, #tpu.memory_space<vmem>>, vector<1x4x8xf32>
    %34 = vector.shape_cast %33 : vector<1x4x8xf32> to vector<4x8xf32>
    %cst_23 = arith.constant dense<0.000000e+00> : vector<326x8xf32>
    %35 = tpu.matmul %1, %34, %cst_23 {dimension_numbers = #tpu.dot_dimension_numbers<[1], [0], [0], [1], [0, 0, 1, 1], [], []>} : vector<326x4xf32>, vector<4x8xf32>, vector<326x8xf32> -> vector<326x8xf32>
    %36 = vector.extract_strided_slice %35 {offsets = [36, 0], sizes = [288, 8], strides = [1, 1]} : vector<326x8xf32> to vector<288x8xf32>
    %37 = arith.addf %32, %36 : vector<288x8xf32>
    %c7 = arith.constant 7 : index
    %c0_24 = arith.constant 0 : index
    %c0_25 = arith.constant 0 : index
    %38 = vector.load %arg2[%c7, %c0_24, %c0_25] : memref<9x4x8xf32, #tpu.memory_space<vmem>>, vector<1x4x8xf32>
    %39 = vector.shape_cast %38 : vector<1x4x8xf32> to vector<4x8xf32>
    %cst_26 = arith.constant dense<0.000000e+00> : vector<326x8xf32>
    %40 = tpu.matmul %1, %39, %cst_26 {dimension_numbers = #tpu.dot_dimension_numbers<[1], [0], [0], [1], [0, 0, 1, 1], [], []>} : vector<326x4xf32>, vector<4x8xf32>, vector<326x8xf32> -> vector<326x8xf32>
    %41 = vector.extract_strided_slice %40 {offsets = [37, 0], sizes = [288, 8], strides = [1, 1]} : vector<326x8xf32> to vector<288x8xf32>
    %42 = arith.addf %37, %41 : vector<288x8xf32>
    %c8 = arith.constant 8 : index
    %c0_27 = arith.constant 0 : index
    %c0_28 = arith.constant 0 : index
    %43 = vector.load %arg2[%c8, %c0_27, %c0_28] : memref<9x4x8xf32, #tpu.memory_space<vmem>>, vector<1x4x8xf32>
    %44 = vector.shape_cast %43 : vector<1x4x8xf32> to vector<4x8xf32>
    %cst_29 = arith.constant dense<0.000000e+00> : vector<326x8xf32>
    %45 = tpu.matmul %1, %44, %cst_29 {dimension_numbers = #tpu.dot_dimension_numbers<[1], [0], [0], [1], [0, 0, 1, 1], [], []>} : vector<326x4xf32>, vector<4x8xf32>, vector<326x8xf32> -> vector<326x8xf32>
    %46 = vector.extract_strided_slice %45 {offsets = [38, 0], sizes = [288, 8], strides = [1, 1]} : vector<326x8xf32> to vector<288x8xf32>
    %47 = arith.addf %42, %46 : vector<288x8xf32>
    %c0_30 = arith.constant 0 : index
    %c0_31 = arith.constant 0 : index
    %c0_32 = arith.constant 0 : index
    %48 = vector.load %arg4[%c0_30, %c0_31, %c0_32] : memref<1x288x8xf32, #tpu.memory_space<vmem>>, vector<1x288x8xf32>
    %49 = vector.shape_cast %48 : vector<1x288x8xf32> to vector<288x8xf32>
    %50 = vector.shape_cast %47 : vector<288x8xf32> to vector<1x288x8xf32>
    tpu.vector_store %arg4[%c0_30, %c0_31, %c0_32], %50 {strides = array<i32>} : memref<1x288x8xf32, #tpu.memory_space<vmem>>, vector<1x288x8xf32>,
    %c0_33 = arith.constant 0 : index
    %c0_34 = arith.constant 0 : index
    %51 = vector.load %arg3[%c0_33, %c0_34] : memref<288x1xf32, #tpu.memory_space<vmem>>, vector<288x1xf32>
    %52 = vector.broadcast %51 : vector<288x1xf32> to vector<288x8xf32>
    %53 = arith.mulf %47, %52 : vector<288x8xf32>
    %cst_35 = arith.constant dense<0.000000e+00> : vector<8xf32>
    %54 = vector.multi_reduction <add>, %53, %cst_35 [0] : vector<288x8xf32> to vector<8xf32>
    %55 = vector.shape_cast %54 : vector<8xf32> to vector<1x8xf32>
    %56 = arith.mulf %53, %47 : vector<288x8xf32>
    %cst_36 = arith.constant dense<0.000000e+00> : vector<8xf32>
    %57 = vector.multi_reduction <add>, %56, %cst_36 [0] : vector<288x8xf32> to vector<8xf32>
    %58 = vector.shape_cast %57 : vector<8xf32> to vector<1x8xf32>
    %59 = tpu.concatenate %55, %58 in 0 : vector<1x8xf32>, vector<1x8xf32> -> vector<2x8xf32>
    %c0_37 = arith.constant 0 : index
    %c0_38 = arith.constant 0 : index
    %c0_39 = arith.constant 0 : index
    %60 = vector.load %arg5[%c0_37, %c0_38, %c0_39] : memref<1x2x8xf32, #tpu.memory_space<vmem>>, vector<1x2x8xf32>
    %61 = vector.shape_cast %60 : vector<1x2x8xf32> to vector<2x8xf32>
    %62 = vector.shape_cast %59 : vector<2x8xf32> to vector<1x2x8xf32>
    tpu.vector_store %arg5[%c0_37, %c0_38, %c0_39], %62 {strides = array<i32>} : memref<1x2x8xf32, #tpu.memory_space<vmem>>, vector<1x2x8xf32>,
    return
  }
  func.func @transform_0(%arg0: i32) -> (i32, i32, i32) {
    %c0_i32 = arith.constant 0 : i32
    %c0_i32_0 = arith.constant 0 : i32
    %c0_i32_1 = arith.constant 0 : i32
    return %arg0, %c0_i32, %c0_i32_0 : i32, i32, i32
  }
  func.func @transform_1(%arg0: i32) -> (i32, i32, i32) {
    %c0_i32 = arith.constant 0 : i32
    %c0_i32_0 = arith.constant 0 : i32
    %c0_i32_1 = arith.constant 0 : i32
    %c0_i32_2 = arith.constant 0 : i32
    return %c0_i32, %c0_i32_0, %c0_i32_1 : i32, i32, i32
  }
  func.func @transform_2(%arg0: i32) -> (i32, i32) {
    %c0_i32 = arith.constant 0 : i32
    %c0_i32_0 = arith.constant 0 : i32
    %c0_i32_1 = arith.constant 0 : i32
    return %c0_i32, %c0_i32_0 : i32, i32
  }
  func.func @transform_3(%arg0: i32) -> (i32, i32, i32) {
    %c0_i32 = arith.constant 0 : i32
    %c0_i32_0 = arith.constant 0 : i32
    %c0_i32_1 = arith.constant 0 : i32
    return %arg0, %c0_i32, %c0_i32_0 : i32, i32, i32
  }
  func.func @transform_4(%arg0: i32) -> (i32, i32, i32) {
    %c0_i32 = arith.constant 0 : i32
    %c0_i32_0 = arith.constant 0 : i32
    %c0_i32_1 = arith.constant 0 : i32
    return %arg0, %c0_i32, %c0_i32_0 : i32, i32, i32
  }
}

</mosaic_0001>

<bundles_post_ra>
// kernel: tpu_custom_call.1
= control target key start
LH: loop header
LB: loop body
LE: loop exit
PB: predicated region body
PF: predicated region fallthrough
CT: control target
= control target key end

     0   :  { %10 = vsyncpa [#allocation3], 0  ;;  %s9668_s0 = inlined_call_operand.vmem [shape: f32[2,326,4], index: 0, kind: input, shape index: {}]   ;;  %s9669_s1 = inlined_call_operand.vmem [shape: f32[9,4,8], index: 1, kind: input, shape index: {}]   ;;  %s9670_s2 = inlined_call_operand.vmem [shape: f32[288,1], index: 2, kind: input, shape index: {}]   ;;  %s9671_s3 = inlined_call_operand.vmem [shape: f32[2,288,8], index: 3, kind: output, shape index: {0}]   ;;  %s9672_s4 = inlined_call_operand.hbm [shape: f32[2,2,8], index: 4, kind: output, shape index: {1}]  }
   0x1   :  { %12 = vsyncpa [#allocation3 + $0x1], 0  ;;  %s7041_s15 = smov 0   ;;  %s7043_s16 = smov 0  }
   0x2   :  { %s7045_s17 = smov 0   ;;  %s7047_s18 = smov 0  }
   0x3 LB: > { %s7062_s19 = sadd.s32 4294967295, %s7010_s18   ;;  %s4898_s20 = sadd.s32 4294967294, %s7010_s18   ;;  %s7010_s18 = sphi %s7047_s18, %s9678_s18   ;;  %s7006_s17 = sphi %s7045_s17, %s9677_s17   ;;  %s7002_s16 = sphi %s7043_s16, %s9676_s16   ;;  %s6998_s15 = sphi %s7041_s15, %s9675_s15  }
   0x4   : > { %s7066_s21 = sadd.s32 1, %s7010_s18   ;;  %s119_s22 = sadd.s32 1, %s7006_s17 }
   0x5   : > { %s116_s23 = ssub.s32 %s7010_s18, %s7066_s21  ;;  %p129_p0 = scmp.ne.s32.totalorder %s7006_s17, %s7002_s16 }
   0x6   : > { %p117_p1 = scmp.eq.s32.totalorder %s116_s23, 0  ;;  %p130_p2 = scmp.eq.s32.totalorder %s7062_s19, 1 }
   0x7   : > { %p135_p3 = scmp.ne.s32.totalorder %s7002_s16, %s6998_s15  ;;  %p136_p4 = scmp.eq.s32.totalorder %s4898_s20, 1 }
   0x8   : > { %s7077_s24 = scalar_select %p117_p1, %s7006_s17, %s119_s22  }
   0x9   : > { %p7079_p5 = por %p130_p2, %p129_p0  ;;  %p7083_p6 = por %p136_p4, %p135_p3 }
   0xa   : > { %p4901_p7 = scmp.ge.s32.totalorder %s7010_s18, 1  ;;  %p168_p8 = scmp.lt.s32.totalorder %s7010_s18, 3 }
   0xc   : > { %p169_p9 = pnand %p4901_p7, %p168_p8 }
   0xd   : > { %v250_v0 = vld [vmem:[%s9669_s1] sm:$0xf] (!%p169_p9)  ;;  %vm375_vm0 = vcmask (!%p169_p9), 1043456   ;;  %p199_p10 = scmp.lt.s32.totalorder (!%p169_p9), %s7062_s19, 1  ;;  %v7012_v1 = vmov (!%p169_p9), 0.0   ;;  %vm7013_vm1 = vmmov (!%p169_p9), 0  }
   0xe   : > { %172 = sbr.rel (%p169_p9) target bundleno = 1014 (0x3f6), region = 32  ;;  %5673 = vmatprep.subr.mxu0 (!%p169_p9), %v7012_v1  ;;  %6798 = vmatprep.subr.mxu1 (!%p169_p9), %v7012_v1  ;;  %vm251_vm2 = vcmask (!%p169_p9), 31744   ;;  %v4990_v2 = vld [vmem:[%s9669_s1 + $0x8] sm:$0xf] (!%p169_p9)  ;;  %v4947_v3 = vld [vmem:[%s9669_s1 + $0x4] sm:$0xf] (!%p169_p9) }
   0xf   : > { %5674 = vmatpush3.msk.msra.mxu0 (!%p169_p9), %vm375_vm0, %v250_v0  ;;  %6799 = vmatpush3.msk.msra.mxu1 (!%p169_p9), %vm375_vm0, %v250_v0  ;;  %v5033_v45 = vld [vmem:[%s9669_s1 + $0xc] sm:$0xf] (!%p169_p9)  ;;  %v5076_v46 = vld [vmem:[%s9669_s1 + $0x10] sm:$0xf] (!%p169_p9)  ;;  %vm988_vm3 = vcmask (!%p169_p9), 1046528   ;;  %vm1442_vm4 = vcmask (!%p169_p9), 1045504  }
  0x10   : > { %5675 = vmatprep.mubr.msk.f32.mxu0 (!%p169_p9), %vm7013_vm1, %v7012_v1  ;;  %5738 = vmatprep.mubr.msk.f32.mxu1 (!%p169_p9), %vm7013_vm1, %v7012_v1  ;;  %vm2349_vm5 = vcmask (!%p169_p9), 1044480   ;;  %vm3709_vm6 = vcmask (!%p169_p9), 1042432   ;;  %vm4163_vm7 = vcmask (!%p169_p9), 1041408   ;;  %vm4309_vm8 = vcmask (!%p169_p9), 64512   ;;  %s5292_s10 = sshll.u32 (!%p169_p9), %s7062_s19, 5  ;;  %s7015_s23 = smov (!%p169_p9), [#allocation2]  }
  0x11   : > { %5923 = vmatprep.subr.mxu0 (!%p169_p9), %v7012_v1  ;;  %5798 = vmatprep.subr.mxu1 (!%p169_p9), %v7012_v1  ;;  %vm4788_vm9 = vcmask (!%p169_p9), 1040384   ;;  %vm4790_vm10 = vcmask (!%p169_p9), 58368   ;;  %s9626_s20 = scalar_lea.hbm (!%p169_p9), %s9672_s4, %s5292_s10  ;;  %s6952_s27 = sshll.u32 (!%p169_p9), %s7015_s23, 4  ;;  %s6953_s27 = int_to_ptr.vmem [resolvable:$false] %s6952_s27 }
  0x12   : > { %s6954_s28 = scalar_lea.vmem (!%p169_p9), %s6953_s27, 64 }
  0x15   : > { %s7098_s29 = scalar_select %p199_p10, %s7062_s19, 1 }
  0x17   : > { %s6800_s30 = smul.u32 328, %s7098_s29 }
  0x19   : > { %s7110_s7 = scalar_lea.vmem %s9668_s0, %s6800_s30 }
  0x1a   : > { %v7119_v4 = vld [vmem:[%s7110_s7] sm:$0xff]  ;;  %v7122_v5 = vld [vmem:[%s7110_s7 + $0xa8] sm:$0xff]  ;;  %v7134_v7 = vld [vmem:[%s7110_s7 + $0xb0] sm:$0xff] }
  0x1b   : > { %5676 = vmatmul.mubr.msk.f32.vlgmr.msra.gmra.mrb[0].mxu0 %vm251_vm2, %v7119_v4  ;;  %5739 = vmatmul.mubr.msk.f32.vlgmr.msra.gmra.mrb[0].mxu1 %vm251_vm2, %v7122_v5  ;;  %v7131_v6 = vld [vmem:[%s7110_s7 + $0x8] sm:$0xff]  ;;  %v7151_v8 = vld [vmem:[%s7110_s7 + $0x10] sm:$0xff]  ;;  %v7154_v9 = vld [vmem:[%s7110_s7 + $0xb8] sm:$0xff] }
  0x1c   : > { %5924 = vmatpush3.msk.msra.mxu0 %vm375_vm0, %v4990_v2  ;;  %5799 = vmatpush3.msk.msra.mxu1 %vm375_vm0, %v4947_v3  ;;  %v7165_v10 = vld [vmem:[%s7110_s7 + $0x18] sm:$0xff]  ;;  %v7168_v11 = vld [vmem:[%s7110_s7 + $0xc0] sm:$0xff]  ;;  %v7182_v13 = vld [vmem:[%s7110_s7 + $0xc8] sm:$0xff] }
  0x1d   : > { %5678 = vmatprep.mubr.msk.f32.mxu0 %vm7013_vm1, %v7012_v1  ;;  %5741 = vmatprep.mubr.msk.f32.mxu1 %vm7013_vm1, %v7012_v1  ;;  %v7179_v12 = vld [vmem:[%s7110_s7 + $0x20] sm:$0xff]  ;;  %v7193_v14 = vld [vmem:[%s7110_s7 + $0x28] sm:$0xff]  ;;  %v7196_v15 = vld [vmem:[%s7110_s7 + $0xd0] sm:$0xff] }
  0x1e   : > { %6048 = vmatprep.subr.mxu1 %v7012_v1  ;;  %6173 = vmatprep.subr.mxu0 %v7012_v1  ;;  %v7207_v16 = vld [vmem:[%s7110_s7 + $0x30] sm:$0xff]  ;;  %v7210_v17 = vld [vmem:[%s7110_s7 + $0xd8] sm:$0xff]  ;;  %v7224_v19 = vld [vmem:[%s7110_s7 + $0xe0] sm:$0xff] }
  0x1f   : > { %5679 = vmatmul.mubr.msk.f32.gmra.mrb[2].mxu0 %vm251_vm2, %v7131_v6  ;;  %5742 = vmatmul.mubr.msk.f32.gmra.mrb[2].mxu1 %vm251_vm2, %v7134_v7  ;;  %v7221_v18 = vld [vmem:[%s7110_s7 + $0x38] sm:$0xff]  ;;  %v7235_v20 = vld [vmem:[%s7110_s7 + $0x40] sm:$0xff]  ;;  %v7238_v21 = vld [vmem:[%s7110_s7 + $0xe8] sm:$0xff] }
  0x20   : > { %5681 = vmatprep.mubr.msk.f32.mxu0 %vm7013_vm1, %v7012_v1  ;;  %5744 = vmatprep.mubr.msk.f32.mxu1 %vm7013_vm1, %v7012_v1  ;;  %v7249_v22 = vld [vmem:[%s7110_s7 + $0x48] sm:$0xff]  ;;  %v7252_v23 = vld [vmem:[%s7110_s7 + $0xf0] sm:$0xff]  ;;  %v7266_v25 = vld [vmem:[%s7110_s7 + $0xf8] sm:$0xff] }
  0x21   : > { %v7263_v24 = vld [vmem:[%s7110_s7 + $0x50] sm:$0xff]  ;;  %v7277_v26 = vld [vmem:[%s7110_s7 + $0x58] sm:$0xff]  ;;  %v7280_v27 = vld [vmem:[%s7110_s7 + $0x100] sm:$0xff] }
  0x22   : > { %v7291_v28 = vld [vmem:[%s7110_s7 + $0x60] sm:$0xff]  ;;  %v7294_v29 = vld [vmem:[%s7110_s7 + $0x108] sm:$0xff]  ;;  %v7308_v31 = vld [vmem:[%s7110_s7 + $0x110] sm:$0xff] }
  0x23   : > { %5682 = vmatmul.mubr.msk.f32.gmra.mrb[4].mxu0 %vm251_vm2, %v7151_v8  ;;  %5745 = vmatmul.mubr.msk.f32.gmra.mrb[4].mxu1 %vm251_vm2, %v7154_v9  ;;  %v7305_v30 = vld [vmem:[%s7110_s7 + $0x68] sm:$0xff]  ;;  %v7319_v32 = vld [vmem:[%s7110_s7 + $0x70] sm:$0xff]  ;;  %v7322_v33 = vld [vmem:[%s7110_s7 + $0x118] sm:$0xff] }
  0x24   : > { %5684 = vmatprep.mubr.msk.f32.mxu0 %vm7013_vm1, %v7012_v1  ;;  %5747 = vmatprep.mubr.msk.f32.mxu1 %vm7013_vm1, %v7012_v1  ;;  %v7333_v34 = vld [vmem:[%s7110_s7 + $0x78] sm:$0xff]  ;;  %v7336_v35 = vld [vmem:[%s7110_s7 + $0x120] sm:$0xff]  ;;  %v7350_v37 = vld [vmem:[%s7110_s7 + $0x128] sm:$0xff] }
  0x25   : > { %v7347_v36 = vld [vmem:[%s7110_s7 + $0x80] sm:$0xff]  ;;  %v7361_v38 = vld [vmem:[%s7110_s7 + $0x88] sm:$0xff]  ;;  %v7364_v39 = vld [vmem:[%s7110_s7 + $0x130] sm:$0xff] }
  0x26   : > { %v7375_v40 = vld [vmem:[%s7110_s7 + $0x90] sm:$0xff]  ;;  %v7378_v41 = vld [vmem:[%s7110_s7 + $0x138] sm:$0xff]  ;;  %v7392_v43 = vld [vmem:[%s7110_s7 + $0x140] sm:$0x3f] }
  0x27   : > { %5685 = vmatmul.mubr.msk.f32.gmra.mrb[6].mxu0 %vm251_vm2, %v7165_v10  ;;  %5748 = vmatmul.mubr.msk.f32.gmra.mrb[6].mxu1 %vm251_vm2, %v7168_v11  ;;  %v7389_v42 = vld [vmem:[%s7110_s7 + $0x98] sm:$0xff]  ;;  %v7403_v44 = vld [vmem:[%s7110_s7 + $0xa0] sm:$0xff] }
  0x28   : > { %5687 = vmatprep.mubr.msk.f32.mxu0 %vm7013_vm1, %v7012_v1  ;;  %5750 = vmatprep.mubr.msk.f32.mxu1 %vm7013_vm1, %v7012_v1 }
  0x2b   : > { %5688 = vmatmul.mubr.msk.f32.gmra.mrb[8].mxu0 %vm251_vm2, %v7179_v12  ;;  %5751 = vmatmul.mubr.msk.f32.gmra.mrb[8].mxu1 %vm251_vm2, %v7182_v13 }
  0x2c   : > { %5690 = vmatprep.mubr.msk.f32.mxu0 %vm7013_vm1, %v7012_v1  ;;  %5753 = vmatprep.mubr.msk.f32.mxu1 %vm7013_vm1, %v7012_v1 }
  0x2f   : > { %5691 = vmatmul.mubr.msk.f32.gmra.mrb[10].mxu0 %vm251_vm2, %v7193_v14  ;;  %5754 = vmatmul.mubr.msk.f32.gmra.mrb[10].mxu1 %vm251_vm2, %v7196_v15 }
  0x30   : > { %5693 = vmatprep.mubr.msk.f32.mxu0 %vm7013_vm1, %v7012_v1  ;;  %5756 = vmatprep.mubr.msk.f32.mxu1 %vm7013_vm1, %v7012_v1 }
  0x33   : > { %5694 = vmatmul.mubr.msk.f32.gmra.mrb[12].mxu0 %vm251_vm2, %v7207_v16  ;;  %5757 = vmatmul.mubr.msk.f32.gmra.mrb[12].mxu1 %vm251_vm2, %v7210_v17 }
  0x34   : > { %5696 = vmatprep.mubr.msk.f32.mxu0 %vm7013_vm1, %v7012_v1  ;;  %5759 = vmatprep.mubr.msk.f32.mxu1 %vm7013_vm1, %v7012_v1 }
  0x37   : > { %5697 = vmatmul.mubr.msk.f32.gmra.mrb[14].mxu0 %vm251_vm2, %v7221_v18  ;;  %5760 = vmatmul.mubr.msk.f32.gmra.mrb[14].mxu1 %vm251_vm2, %v7224_v19 }
  0x38   : > { %5699 = vmatprep.mubr.msk.f32.mxu0 %vm7013_vm1, %v7012_v1  ;;  %5762 = vmatprep.mubr.msk.f32.mxu1 %vm7013_vm1, %v7012_v1 }
  0x3b   : > { %5700 = vmatmul.mubr.msk.f32.gmra.mrb[16].mxu0 %vm251_vm2, %v7235_v20  ;;  %5763 = vmatmul.mubr.msk.f32.gmra.mrb[16].mxu1 %vm251_vm2, %v7238_v21 }
  0x3c   : > { %5702 = vmatprep.mubr.msk.f32.mxu0 %vm7013_vm1, %v7012_v1  ;;  %5765 = vmatprep.mubr.msk.f32.mxu1 %vm7013_vm1, %v7012_v1 }
  0x3f   : > { %5703 = vmatmul.mubr.msk.f32.gmra.mrb[18].mxu0 %vm251_vm2, %v7249_v22  ;;  %5766 = vmatmul.mubr.msk.f32.gmra.mrb[18].mxu1 %vm251_vm2, %v7252_v23 }
  0x40   : > { %5705 = vmatprep.mubr.msk.f32.mxu0 %vm7013_vm1, %v7012_v1  ;;  %5768 = vmatprep.mubr.msk.f32.mxu1 %vm7013_vm1, %v7012_v1 }
  0x43   : > { %5706 = vmatmul.mubr.msk.f32.gmra.mrb[20].mxu0 %vm251_vm2, %v7263_v24  ;;  %5769 = vmatmul.mubr.msk.f32.gmra.mrb[20].mxu1 %vm251_vm2, %v7266_v25 }
  0x44   : > { %5708 = vmatprep.mubr.msk.f32.mxu0 %vm7013_vm1, %v7012_v1  ;;  %5771 = vmatprep.mubr.msk.f32.mxu1 %vm7013_vm1, %v7012_v1 }
  0x47   : > { %5709 = vmatmul.mubr.msk.f32.gmra.mrb[22].mxu0 %vm251_vm2, %v7277_v26  ;;  %5772 = vmatmul.mubr.msk.f32.gmra.mrb[22].mxu1 %vm251_vm2, %v7280_v27 }
  0x48   : > { %5711 = vmatprep.mubr.msk.f32.mxu0 %vm7013_vm1, %v7012_v1  ;;  %5774 = vmatprep.mubr.msk.f32.mxu1 %vm7013_vm1, %v7012_v1 }
  0x4b   : > { %5712 = vmatmul.mubr.msk.f32.gmra.mrb[24].mxu0 %vm251_vm2, %v7291_v28  ;;  %5775 = vmatmul.mubr.msk.f32.gmra.mrb[24].mxu1 %vm251_vm2, %v7294_v29 }
  0x4c   : > { %5714 = vmatprep.mubr.msk.f32.mxu0 %vm7013_vm1, %v7012_v1  ;;  %5777 = vmatprep.mubr.msk.f32.mxu1 %vm7013_vm1, %v7012_v1 }
  0x4f   : > { %5715 = vmatmul.mubr.msk.f32.gmra.mrb[26].mxu0 %vm251_vm2, %v7305_v30  ;;  %5778 = vmatmul.mubr.msk.f32.gmra.mrb[26].mxu1 %vm251_vm2, %v7308_v31 }
  0x50   : > { %5717 = vmatprep.mubr.msk.f32.mxu0 %vm7013_vm1, %v7012_v1  ;;  %5780 = vmatprep.mubr.msk.f32.mxu1 %vm7013_vm1, %v7012_v1 }
  0x53   : > { %5718 = vmatmul.mubr.msk.f32.gmra.mrb[28].mxu0 %vm251_vm2, %v7319_v32  ;;  %5781 = vmatmul.mubr.msk.f32.gmra.mrb[28].mxu1 %vm251_vm2, %v7322_v33 }
  0x54   : > { %5720 = vmatprep.mubr.msk.f32.mxu0 %vm7013_vm1, %v7012_v1  ;;  %5783 = vmatprep.mubr.msk.f32.mxu1 %vm7013_vm1, %v7012_v1 }
  0x57   : > { %5721 = vmatmul.mubr.msk.f32.gmra.mrb[30].mxu0 %vm251_vm2, %v7333_v34  ;;  %5784 = vmatmul.mubr.msk.f32.gmra.mrb[30].mxu1 %vm251_vm2, %v7336_v35 }
  0x58   : > { %5723 = vmatprep.mubr.msk.f32.mxu0 %vm7013_vm1, %v7012_v1  ;;  %5786 = vmatprep.mubr.msk.f32.mxu1 %vm7013_vm1, %v7012_v1 }
  0x5b   : > { %5724 = vmatmul.mubr.msk.f32.gmra.mrb[32].mxu0 %vm251_vm2, %v7347_v36  ;;  %5787 = vmatmul.mubr.msk.f32.gmra.mrb[32].mxu1 %vm251_vm2, %v7350_v37 }
  0x5c   : > { %5726 = vmatprep.mubr.msk.f32.mxu0 %vm7013_vm1, %v7012_v1  ;;  %5789 = vmatprep.mubr.msk.f32.mxu1 %vm7013_vm1, %v7012_v1 }
  0x5f   : > { %5727 = vmatmul.mubr.msk.f32.gmra.mrb[34].mxu0 %vm251_vm2, %v7361_v38  ;;  %5790 = vmatmul.mubr.msk.f32.gmra.mrb[34].mxu1 %vm251_vm2, %v7364_v39 }
  0x60   : > { %5729 = vmatprep.mubr.msk.f32.mxu0 %vm7013_vm1, %v7012_v1  ;;  %5792 = vmatprep.mubr.msk.f32.mxu1 %vm7013_vm1, %v7012_v1 }
  0x63   : > { %5730 = vmatmul.mubr.msk.f32.gmra.mrb[36].mxu0 %vm251_vm2, %v7375_v40  ;;  %5793 = vmatmul.mubr.msk.f32.gmra.mrb[36].mxu1 %vm251_vm2, %v7378_v41 }
  0x64   : > { %5732 = vmatprep.mubr.msk.f32.mxu0 %vm7013_vm1, %v7012_v1  ;;  %5795 = vmatprep.mubr.msk.f32.mxu1 %vm7013_vm1, %v7012_v1 }
  0x67   : > { %5733 = vmatmul.mubr.msk.f32.gmra.mrb[38].mxu0 %vm251_vm2, %v7389_v42  ;;  %5796 = vmatmul.mubr.msk.f32.gmra.mrb[38].mxu1 %vm251_vm2, %v7392_v43 }
  0x68   : > { %5735 = vmatprep.mubr.msk.f32.mxu0 %vm7013_vm1, %v7012_v1  ;;  %5800 = vmatprep.mubr.msk.f32.mxu1 %vm7013_vm1, %v7012_v1 }
  0x6b   : > { %5736 = vmatmul.mubr.msk.f32.gmra.mrb[40].mxu0 %vm251_vm2, %v7403_v44  ;;  %5801 = vmatmul.mubr.msk.f32.vlgmr.msra.gmra.mrb[40].mxu1 %vm251_vm2, %v7119_v4 }
  0x6c   : > { %6049 = vmatpush3.msk.msra.mxu1 %vm375_vm0, %v5033_v45  ;;  %5803 = vmatprep.mubr.msk.f32.mxu1 %vm7013_vm1, %v7012_v1 }
  0x6d   : > { %5925 = vmatprep.mubr.msk.f32.mxu0 %vm7013_vm1, %v7012_v1  ;;  %6298 = vmatprep.subr.mxu1 %v7012_v1 }
  0x6f   : > { %5804 = vmatmul.mubr.msk.f32.gmra.mrb[42].mxu1 %vm251_vm2, %v7131_v6  ;;  %5926 = vmatmul.mubr.msk.f32.vlgmr.msra.gmra.mrb[42].mxu0 %vm251_vm2, %v7119_v4 }
  0x70   : > { %6174 = vmatpush3.msk.msra.mxu0 %vm375_vm0, %v5076_v46  ;;  %5806 = vmatprep.mubr.msk.f32.mxu1 %vm7013_vm1, %v7012_v1 }
  0x71   : > { %5928 = vmatprep.mubr.msk.f32.mxu0 %vm7013_vm1, %v7012_v1  ;;  %6423 = vmatprep.subr.mxu0 %v7012_v1 }
  0x73   : > { %5807 = vmatmul.mubr.msk.f32.gmra.mrb[44].mxu1 %vm251_vm2, %v7151_v8  ;;  %5929 = vmatmul.mubr.msk.f32.gmra.mrb[44].mxu0 %vm251_vm2, %v7131_v6 }
  0x74   : > { %5809 = vmatprep.mubr.msk.f32.mxu1 %vm7013_vm1, %v7012_v1  ;;  %5931 = vmatprep.mubr.msk.f32.mxu0 %vm7013_vm1, %v7012_v1 }
  0x77   : > { %5810 = vmatmul.mubr.msk.f32.gmra.mrb[46].mxu1 %vm251_vm2, %v7165_v10  ;;  %5932 = vmatmul.mubr.msk.f32.gmra.mrb[46].mxu0 %vm251_vm2, %v7151_v8 }
  0x78   : > { %5812 = vmatprep.mubr.msk.f32.mxu1 %vm7013_vm1, %v7012_v1  ;;  %5934 = vmatprep.mubr.msk.f32.mxu0 %vm7013_vm1, %v7012_v1 }
  0x7b   : > { %5813 = vmatmul.mubr.msk.f32.gmra.mrb[48].mxu1 %vm251_vm2, %v7179_v12  ;;  %5935 = vmatmul.mubr.msk.f32.gmra.mrb[48].mxu0 %vm251_vm2, %v7165_v10 }
  0x7c   : > { %5815 = vmatprep.mubr.msk.f32.mxu1 %vm7013_vm1, %v7012_v1  ;;  %5937 = vmatprep.mubr.msk.f32.mxu0 %vm7013_vm1, %v7012_v1 }
  0x7f   : > { %5816 = vmatmul.mubr.msk.f32.gmra.mrb[50].mxu1 %vm251_vm2, %v7193_v14  ;;  %5938 = vmatmul.mubr.msk.f32.gmra.mrb[50].mxu0 %vm251_vm2, %v7179_v12 }
  0x80   : > { %5818 = vmatprep.mubr.msk.f32.mxu1 %vm7013_vm1, %v7012_v1  ;;  %5940 = vmatprep.mubr.msk.f32.mxu0 %vm7013_vm1, %v7012_v1 }
  0x83   : > { %5819 = vmatmul.mubr.msk.f32.gmra.mrb[52].mxu1 %vm251_vm2, %v7207_v16  ;;  %5941 = vmatmul.mubr.msk.f32.gmra.mrb[52].mxu0 %vm251_vm2, %v7193_v14 }
  0x84   : > { %5821 = vmatprep.mubr.msk.f32.mxu1 %vm7013_vm1, %v7012_v1  ;;  %5943 = vmatprep.mubr.msk.f32.mxu0 %vm7013_vm1, %v7012_v1 }
  0x87   : > { %5822 = vmatmul.mubr.msk.f32.gmra.mrb[54].mxu1 %vm251_vm2, %v7221_v18  ;;  %5944 = vmatmul.mubr.msk.f32.gmra.mrb[54].mxu0 %vm251_vm2, %v7207_v16 }
  0x88   : > { %5824 = vmatprep.mubr.msk.f32.mxu1 %vm7013_vm1, %v7012_v1  ;;  %5946 = vmatprep.mubr.msk.f32.mxu0 %vm7013_vm1, %v7012_v1 }
  0x8b   : > { %5825 = vmatmul.mubr.msk.f32.gmra.mrb[56].mxu1 %vm251_vm2, %v7235_v20  ;;  %5947 = vmatmul.mubr.msk.f32.gmra.mrb[56].mxu0 %vm251_vm2, %v7221_v18 }
  0x8c   : > { %5827 = vmatprep.mubr.msk.f32.mxu1 %vm7013_vm1, %v7012_v1  ;;  %5949 = vmatprep.mubr.msk.f32.mxu0 %vm7013_vm1, %v7012_v1 }
  0x8f   : > { %5828 = vmatmul.mubr.msk.f32.gmra.mrb[58].mxu1 %vm251_vm2, %v7249_v22  ;;  %5950 = vmatmul.mubr.msk.f32.gmra.mrb[58].mxu0 %vm251_vm2, %v7235_v20 }
  0x90   : > { %5830 = vmatprep.mubr.msk.f32.mxu1 %vm7013_vm1, %v7012_v1  ;;  %5952 = vmatprep.mubr.msk.f32.mxu0 %vm7013_vm1, %v7012_v1 }
  0x93   : > { %5831 = vmatmul.mubr.msk.f32.gmra.mrb[60].mxu1 %vm251_vm2, %v7263_v24  ;;  %5953 = vmatmul.mubr.msk.f32.gmra.mrb[60].mxu0 %vm251_vm2, %v7249_v22 }
  0x94   : > { %5833 = vmatprep.mubr.msk.f32.mxu1 %vm7013_vm1, %v7012_v1  ;;  %5955 = vmatprep.mubr.msk.f32.mxu0 %vm7013_vm1, %v7012_v1 }
  0x97   : > { %5834 = vmatmul.mubr.msk.f32.gmra.mrb[62].mxu1 %vm251_vm2, %v7277_v26  ;;  %5956 = vmatmul.mubr.msk.f32.gmra.mrb[62].mxu0 %vm251_vm2, %v7263_v24 }
  0x98   : > { %5836 = vmatprep.mubr.msk.f32.mxu1 %vm7013_vm1, %v7012_v1  ;;  %5958 = vmatprep.mubr.msk.f32.mxu0 %vm7013_vm1, %v7012_v1 }
  0x9b   : > { %5837 = vmatmul.mubr.msk.f32.gmra.mrb[64].mxu1 %vm251_vm2, %v7291_v28  ;;  %5959 = vmatmul.mubr.msk.f32.gmra.mrb[64].mxu0 %vm251_vm2, %v7277_v26 }
  0x9c   : > { %5839 = vmatprep.mubr.msk.f32.mxu1 %vm7013_vm1, %v7012_v1  ;;  %5961 = vmatprep.mubr.msk.f32.mxu0 %vm7013_vm1, %v7012_v1 }
  0x9f   : > { %5840 = vmatmul.mubr.msk.f32.gmra.mrb[66].mxu1 %vm251_vm2, %v7305_v30  ;;  %5962 = vmatmul.mubr.msk.f32.gmra.mrb[66].mxu0 %vm251_vm2, %v7291_v28 }
  0xa0   : > { %5842 = vmatprep.mubr.msk.f32.mxu1 %vm7013_vm1, %v7012_v1  ;;  %5964 = vmatprep.mubr.msk.f32.mxu0 %vm7013_vm1, %v7012_v1 }
  0xa3   : > { %5843 = vmatmul.mubr.msk.f32.gmra.mrb[68].mxu1 %vm251_vm2, %v7319_v32  ;;  %5965 = vmatmul.mubr.msk.f32.gmra.mrb[68].mxu0 %vm251_vm2, %v7305_v30 }
  0xa4   : > { %5845 = vmatprep.mubr.msk.f32.mxu1 %vm7013_vm1, %v7012_v1  ;;  %5967 = vmatprep.mubr.msk.f32.mxu0 %vm7013_vm1, %v7012_v1 }
  0xa7   : > { %5846 = vmatmul.mubr.msk.f32.gmra.mrb[70].mxu1 %vm251_vm2, %v7333_v34  ;;  %5968 = vmatmul.mubr.msk.f32.gmra.mrb[70].mxu0 %vm251_vm2, %v7319_v32 }
  0xa8   : > { %5848 = vmatprep.mubr.msk.f32.mxu1 %vm7013_vm1, %v7012_v1  ;;  %5970 = vmatprep.mubr.msk.f32.mxu0 %vm7013_vm1, %v7012_v1 }
  0xab   : > { %5849 = vmatmul.mubr.msk.f32.gmra.mrb[72].mxu1 %vm251_vm2, %v7347_v36  ;;  %5971 = vmatmul.mubr.msk.f32.gmra.mrb[72].mxu0 %vm251_vm2, %v7333_v34 }
  0xac   : > { %5851 = vmatprep.mubr.msk.f32.mxu1 %vm7013_vm1, %v7012_v1  ;;  %5973 = vmatprep.mubr.msk.f32.mxu0 %vm7013_vm1, %v7012_v1 }
  0xaf   : > { %5852 = vmatmul.mubr.msk.f32.gmra.mrb[74].mxu1 %vm251_vm2, %v7361_v38  ;;  %5974 = vmatmul.mubr.msk.f32.gmra.mrb[74].mxu0 %vm251_vm2, %v7347_v36 }
  0xb0   : > { %5854 = vmatprep.mubr.msk.f32.mxu1 %vm7013_vm1, %v7012_v1  ;;  %5976 = vmatprep.mubr.msk.f32.mxu0 %vm7013_vm1, %v7012_v1 }
  0xb3   : > { %5855 = vmatmul.mubr.msk.f32.gmra.mrb[76].mxu1 %vm251_vm2, %v7375_v40  ;;  %5977 = vmatmul.mubr.msk.f32.gmra.mrb[76].mxu0 %vm251_vm2, %v7361_v38 }
  0xb4   : > { %5857 = vmatprep.mubr.msk.f32.mxu1 %vm7013_vm1, %v7012_v1  ;;  %5979 = vmatprep.mubr.msk.f32.mxu0 %vm7013_vm1, %v7012_v1 }
  0xb7   : > { %5858 = vmatmul.mubr.msk.f32.gmra.mrb[78].mxu1 %vm251_vm2, %v7389_v42  ;;  %5980 = vmatmul.mubr.msk.f32.gmra.mrb[78].mxu0 %vm251_vm2, %v7375_v40 }
  0xb8   : > { %5860 = vmatprep.mubr.msk.f32.mxu1 %vm7013_vm1, %v7012_v1  ;;  %5982 = vmatprep.mubr.msk.f32.mxu0 %vm7013_vm1, %v7012_v1 }
  0xbb   : > { %5861 = vmatmul.mubr.msk.f32.gmra.mrb[80].mxu1 %vm251_vm2, %v7403_v44  ;;  %5983 = vmatmul.mubr.msk.f32.gmra.mrb[80].mxu0 %vm251_vm2, %v7389_v42 }
  0xbc   : > { %5863 = vmatprep.mubr.msk.f32.mxu1 %vm7013_vm1, %v7012_v1  ;;  %5985 = vmatprep.mubr.msk.f32.mxu0 %vm7013_vm1, %v7012_v1 }
  0xbf   : > { %5864 = vmatmul.mubr.msk.f32.gmra.mrb[82].mxu1 %vm251_vm2, %v7122_v5  ;;  %5986 = vmatmul.mubr.msk.f32.gmra.mrb[82].mxu0 %vm251_vm2, %v7403_v44 }
  0xc0   : > { %5866 = vmatprep.mubr.msk.f32.mxu1 %vm7013_vm1, %v7012_v1  ;;  %5988 = vmatprep.mubr.msk.f32.mxu0 %vm7013_vm1, %v7012_v1 }
  0xc3   : > { %5867 = vmatmul.mubr.msk.f32.gmra.mrb[84].mxu1 %vm251_vm2, %v7134_v7  ;;  %5989 = vmatmul.mubr.msk.f32.gmra.mrb[84].mxu0 %vm251_vm2, %v7122_v5 }
  0xc4   : > { %5869 = vmatprep.mubr.msk.f32.mxu1 %vm7013_vm1, %v7012_v1  ;;  %5991 = vmatprep.mubr.msk.f32.mxu0 %vm7013_vm1, %v7012_v1 }
  0xc7   : > { %5870 = vmatmul.mubr.msk.f32.gmra.mrb[86].mxu1 %vm251_vm2, %v7154_v9  ;;  %5992 = vmatmul.mubr.msk.f32.gmra.mrb[86].mxu0 %vm251_vm2, %v7134_v7 }
  0xc8   : > { %5872 = vmatprep.mubr.msk.f32.mxu1 %vm7013_vm1, %v7012_v1  ;;  %5994 = vmatprep.mubr.msk.f32.mxu0 %vm7013_vm1, %v7012_v1 }
  0xcb   : > { %5873 = vmatmul.mubr.msk.f32.gmra.mrb[88].mxu1 %vm251_vm2, %v7168_v11  ;;  %5995 = vmatmul.mubr.msk.f32.gmra.mrb[88].mxu0 %vm251_vm2, %v7154_v9 }
  0xcc   : > { %5875 = vmatprep.mubr.msk.f32.mxu1 %vm7013_vm1, %v7012_v1  ;;  %5997 = vmatprep.mubr.msk.f32.mxu0 %vm7013_vm1, %v7012_v1 }
  0xcf   : > { %5876 = vmatmul.mubr.msk.f32.gmra.mrb[90].mxu1 %vm251_vm2, %v7182_v13  ;;  %5998 = vmatmul.mubr.msk.f32.gmra.mrb[90].mxu0 %vm251_vm2, %v7168_v11 }
  0xd0   : > { %5878 = vmatprep.mubr.msk.f32.mxu1 %vm7013_vm1, %v7012_v1  ;;  %6000 = vmatprep.mubr.msk.f32.mxu0 %vm7013_vm1, %v7012_v1 }
  0xd3   : > { %5879 = vmatmul.mubr.msk.f32.gmra.mrb[92].mxu1 %vm251_vm2, %v7196_v15  ;;  %6001 = vmatmul.mubr.msk.f32.gmra.mrb[92].mxu0 %vm251_vm2, %v7182_v13 }
  0xd4   : > { %5881 = vmatprep.mubr.msk.f32.mxu1 %vm7013_vm1, %v7012_v1  ;;  %6003 = vmatprep.mubr.msk.f32.mxu0 %vm7013_vm1, %v7012_v1 }
  0xd7   : > { %5882 = vmatmul.mubr.msk.f32.gmra.mrb[94].mxu1 %vm251_vm2, %v7210_v17  ;;  %6004 = vmatmul.mubr.msk.f32.gmra.mrb[94].mxu0 %vm251_vm2, %v7196_v15 }
  0xd8   : > { %5884 = vmatprep.mubr.msk.f32.mxu1 %vm7013_vm1, %v7012_v1  ;;  %6006 = vmatprep.mubr.msk.f32.mxu0 %vm7013_vm1, %v7012_v1 }
  0xdb   : > { %5885 = vmatmul.mubr.msk.f32.gmra.mrb[96].mxu1 %vm251_vm2, %v7224_v19  ;;  %6007 = vmatmul.mubr.msk.f32.gmra.mrb[96].mxu0 %vm251_vm2, %v7210_v17 }
  0xdc   : > { %5887 = vmatprep.mubr.msk.f32.mxu1 %vm7013_vm1, %v7012_v1  ;;  %6009 = vmatprep.mubr.msk.f32.mxu0 %vm7013_vm1, %v7012_v1 }
  0xdf   : > { %5888 = vmatmul.mubr.msk.f32.gmra.mrb[98].mxu1 %vm251_vm2, %v7238_v21  ;;  %6010 = vmatmul.mubr.msk.f32.gmra.mrb[98].mxu0 %vm251_vm2, %v7224_v19 }
  0xe0   : > { %5890 = vmatprep.mubr.msk.f32.mxu1 %vm7013_vm1, %v7012_v1  ;;  %6012 = vmatprep.mubr.msk.f32.mxu0 %vm7013_vm1, %v7012_v1 }
  0xe3   : > { %5891 = vmatmul.mubr.msk.f32.gmra.mrb[100].mxu1 %vm251_vm2, %v7252_v23  ;;  %6013 = vmatmul.mubr.msk.f32.gmra.mrb[100].mxu0 %vm251_vm2, %v7238_v21 }
  0xe4   : > { %5893 = vmatprep.mubr.msk.f32.mxu1 %vm7013_vm1, %v7012_v1  ;;  %6015 = vmatprep.mubr.msk.f32.mxu0 %vm7013_vm1, %v7012_v1 }
  0xe7   : > { %5894 = vmatmul.mubr.msk.f32.gmra.mrb[102].mxu1 %vm251_vm2, %v7266_v25  ;;  %6016 = vmatmul.mubr.msk.f32.gmra.mrb[102].mxu0 %vm251_vm2, %v7252_v23 }
  0xe8   : > { %5896 = vmatprep.mubr.msk.f32.mxu1 %vm7013_vm1, %v7012_v1  ;;  %6018 = vmatprep.mubr.msk.f32.mxu0 %vm7013_vm1, %v7012_v1 }
  0xeb   : > { %5897 = vmatmul.mubr.msk.f32.gmra.mrb[104].mxu1 %vm251_vm2, %v7280_v27  ;;  %6019 = vmatmul.mubr.msk.f32.gmra.mrb[104].mxu0 %vm251_vm2, %v7266_v25 }
  0xec   : > { %5899 = vmatprep.mubr.msk.f32.mxu1 %vm7013_vm1, %v7012_v1  ;;  %6021 = vmatprep.mubr.msk.f32.mxu0 %vm7013_vm1, %v7012_v1 }
  0xee   : > { %v7679_v47 = vpop.f32.mrb[0].mxu0  ;;  %v7681_v48 = vpop.f32.mrb[0].mxu1 }
  0xef   : > { %v5677_v49 = vpop.f32.mrb[1].mxu0  ;;  %5900 = vmatmul.mubr.msk.f32.gmra.mrb[106].mxu1 %vm251_vm2, %v7294_v29  ;;  %6022 = vmatmul.mubr.msk.f32.gmra.mrb[106].mxu0 %vm251_vm2, %v7280_v27  ;;  %v5740_v50 = vpop.f32.mrb[1].mxu1 }
  0xf0   : > { %5902 = vmatprep.mubr.msk.f32.mxu1 %vm7013_vm1, %v7012_v1  ;;  %6024 = vmatprep.mubr.msk.f32.mxu0 %vm7013_vm1, %v7012_v1 }
  0xf2   : > { %v7691_v51 = vpop.f32.mrb[2].mxu0  ;;  %v7693_v52 = vpop.f32.mrb[2].mxu1 }
  0xf3   : > { %v5680_v53 = vpop.f32.mrb[3].mxu0  ;;  %5903 = vmatmul.mubr.msk.f32.gmra.mrb[108].mxu1 %vm251_vm2, %v7308_v31  ;;  %6025 = vmatmul.mubr.msk.f32.gmra.mrb[108].mxu0 %vm251_vm2, %v7294_v29  ;;  %v5743_v54 = vpop.f32.mrb[3].mxu1  ;;  %v5119_v29 = vld [vmem:[%s9669_s1 + $0x14] sm:$0xf] }
  0xf4   : > { %5905 = vmatprep.mubr.msk.f32.mxu1 %vm7013_vm1, %v7012_v1  ;;  %6027 = vmatprep.mubr.msk.f32.mxu0 %vm7013_vm1, %v7012_v1 }
  0xf6   : > { %v7703_v55 = vpop.f32.mrb[4].mxu0  ;;  %v7705_v56 = vpop.f32.mrb[4].mxu1 }
  0xf7   : > { %v5683_v57 = vpop.f32.mrb[5].mxu0  ;;  %5906 = vmatmul.mubr.msk.f32.gmra.mrb[110].mxu1 %vm251_vm2, %v7322_v33  ;;  %6028 = vmatmul.mubr.msk.f32.gmra.mrb[110].mxu0 %vm251_vm2, %v7308_v31  ;;  %v5746_v58 = vpop.f32.mrb[5].mxu1 }
  0xf8   : > { %5908 = vmatprep.mubr.msk.f32.mxu1 %vm7013_vm1, %v7012_v1  ;;  %6030 = vmatprep.mubr.msk.f32.mxu0 %vm7013_vm1, %v7012_v1 }
  0xfa   : > { %v7715_v59 = vpop.f32.mrb[6].mxu0  ;;  %v7717_v60 = vpop.f32.mrb[6].mxu1 }
  0xfb   : > { %v5686_v61 = vpop.f32.mrb[7].mxu0  ;;  %5909 = vmatmul.mubr.msk.f32.gmra.mrb[112].mxu1 %vm251_vm2, %v7336_v35  ;;  %6031 = vmatmul.mubr.msk.f32.gmra.mrb[112].mxu0 %vm251_vm2, %v7322_v33  ;;  %v5749_v62 = vpop.f32.mrb[7].mxu1 }
  0xfc   : > { %5911 = vmatprep.mubr.msk.f32.mxu1 %vm7013_vm1, %v7012_v1  ;;  %6033 = vmatprep.mubr.msk.f32.mxu0 %vm7013_vm1, %v7012_v1 }
  0xfe   : > { %v7727_v63 = vpop.f32.mrb[8].mxu0  ;;  %v7729_v0 = vpop.f32.mrb[8].mxu1 }
  0xff   : > { %v5689_v2 = vpop.f32.mrb[9].mxu0  ;;  %5912 = vmatmul.mubr.msk.f32.gmra.mrb[114].mxu1 %vm251_vm2, %v7350_v37  ;;  %6034 = vmatmul.mubr.msk.f32.gmra.mrb[114].mxu0 %vm251_vm2, %v7336_v35  ;;  %v5752_v3 = vpop.f32.mrb[9].mxu1 }
 0x100   : > { %5914 = vmatprep.mubr.msk.f32.mxu1 %vm7013_vm1, %v7012_v1  ;;  %6036 = vmatprep.mubr.msk.f32.mxu0 %vm7013_vm1, %v7012_v1 }
 0x102   : > { %v7739_v5 = vpop.f32.mrb[10].mxu0  ;;  %v7741_v7 = vpop.f32.mrb[10].mxu1 }
 0x103   : > { %v5692_v9 = vpop.f32.mrb[11].mxu0  ;;  %5915 = vmatmul.mubr.msk.f32.gmra.mrb[116].mxu1 %vm251_vm2, %v7364_v39  ;;  %6037 = vmatmul.mubr.msk.f32.gmra.mrb[116].mxu0 %vm251_vm2, %v7350_v37  ;;  %v5755_v11 = vpop.f32.mrb[11].mxu1 }
 0x104   : > { %5917 = vmatprep.mubr.msk.f32.mxu1 %vm7013_vm1, %v7012_v1  ;;  %6039 = vmatprep.mubr.msk.f32.mxu0 %vm7013_vm1, %v7012_v1 }
 0x106   : > { %v7751_v13 = vpop.f32.mrb[12].mxu0  ;;  %v7753_v15 = vpop.f32.mrb[12].mxu1 }
 0x107   : > { %v5695_v17 = vpop.f32.mrb[13].mxu0  ;;  %5918 = vmatmul.mubr.msk.f32.gmra.mrb[118].mxu1 %vm251_vm2, %v7378_v41  ;;  %6040 = vmatmul.mubr.msk.f32.gmra.mrb[118].mxu0 %vm251_vm2, %v7364_v39  ;;  %v5758_v19 = vpop.f32.mrb[13].mxu1  ;;  %v5162_v39 = vld [vmem:[%s9669_s1 + $0x18] sm:$0xf] }
 0x108   : > { %5920 = vmatprep.mubr.msk.f32.mxu1 %vm7013_vm1, %v7012_v1  ;;  %6042 = vmatprep.mubr.msk.f32.mxu0 %vm7013_vm1, %v7012_v1 }
 0x10a   : > { %v7763_v21 = vpop.f32.mrb[14].mxu0  ;;  %v7765_v23 = vpop.f32.mrb[14].mxu1 }
 0x10b   : > { %v5698_v25 = vpop.f32.mrb[15].mxu0  ;;  %5921 = vmatmul.mubr.msk.f32.gmra.mrb[120].mxu1 %vm251_vm2, %v7392_v43  ;;  %6043 = vmatmul.mubr.msk.f32.gmra.mrb[120].mxu0 %vm251_vm2, %v7378_v41  ;;  %v5761_v27 = vpop.f32.mrb[15].mxu1 }
 0x10c   : > { %6045 = vmatprep.mubr.msk.f32.mxu0 %vm7013_vm1, %v7012_v1  ;;  %6050 = vmatprep.mubr.msk.f32.mxu1 %vm7013_vm1, %v7012_v1 }
 0x10e   : > { %v7778_v31 = vpop.f32.mrb[16].mxu0  ;;  %v7780_v33 = vpop.f32.mrb[16].mxu1 }
 0x10f   : > { %v5701_v35 = vpop.f32.mrb[17].mxu0  ;;  %6046 = vmatmul.mubr.msk.f32.gmra.mrb[122].mxu0 %vm251_vm2, %v7392_v43  ;;  %6051 = vmatmul.mubr.msk.f32.vlgmr.msra.gmra.mrb[122].mxu1 %vm251_vm2, %v7119_v4  ;;  %v5764_v37 = vpop.f32.mrb[17].mxu1 }
 0x110   : > { %6299 = vmatpush3.msk.msra.mxu1 %vm375_vm0, %v5119_v29  ;;  %6053 = vmatprep.mubr.msk.f32.mxu1 %vm7013_vm1, %v7012_v1 }
 0x111   : > { %6175 = vmatprep.mubr.msk.f32.mxu0 %vm7013_vm1, %v7012_v1  ;;  %6548 = vmatprep.subr.mxu1 %v7012_v1 }
 0x112   : > { %v7795_v41 = vpop.f32.mrb[18].mxu0  ;;  %v7797_v43 = vpop.f32.mrb[18].mxu1 }
 0x113   : > { %v5704_v45 = vpop.f32.mrb[19].mxu0  ;;  %6054 = vmatmul.mubr.msk.f32.gmra.mrb[124].mxu1 %vm251_vm2, %v7131_v6  ;;  %6176 = vmatmul.mubr.msk.f32.vlgmr.msra.gmra.mrb[124].mxu0 %vm251_vm2, %v7119_v4  ;;  %v5767_v46 = vpop.f32.mrb[19].mxu1 }
 0x114   : > { %6424 = vmatpush3.msk.msra.mxu0 %vm375_vm0, %v5162_v39  ;;  %6056 = vmatprep.mubr.msk.f32.mxu1 %vm7013_vm1, %v7012_v1 }
 0x115   : > { %6178 = vmatprep.mubr.msk.f32.mxu0 %vm7013_vm1, %v7012_v1  ;;  %6673 = vmatprep.subr.mxu0 %v7012_v1 }
 0x116   : > { %v7809_v49 = vpop.f32.mrb[20].mxu0  ;;  %v7811_v50 = vpop.f32.mrb[20].mxu1 }
 0x117   : > { %v5707_v53 = vpop.f32.mrb[21].mxu0  ;;  %6057 = vmatmul.mubr.msk.f32.gmra.mrb[126].mxu1 %vm251_vm2, %v7151_v8  ;;  %6179 = vmatmul.mubr.msk.f32.gmra.mrb[126].mxu0 %vm251_vm2, %v7131_v6  ;;  %v5770_v4 = vpop.f32.mrb[21].mxu1 }
 0x118   : > { %6059 = vmatprep.mubr.msk.f32.mxu1 %vm7013_vm1, %v7012_v1  ;;  %6181 = vmatprep.mubr.msk.f32.mxu0 %vm7013_vm1, %v7012_v1 }
 0x11a   : > { %v7821_v54 = vpop.f32.mrb[22].mxu0  ;;  %v7823_v57 = vpop.f32.mrb[22].mxu1 }
 0x11b   : > { %v5710_v58 = vpop.f32.mrb[23].mxu0  ;;  %6060 = vmatmul.mubr.msk.f32.gmra.mrb[128].mxu1 %vm251_vm2, %v7165_v10  ;;  %6182 = vmatmul.mubr.msk.f32.gmra.mrb[128].mxu0 %vm251_vm2, %v7151_v8  ;;  %v5773_v61 = vpop.f32.mrb[23].mxu1 }
 0x11c   : > { %6062 = vmatprep.mubr.msk.f32.mxu1 %vm7013_vm1, %v7012_v1  ;;  %6184 = vmatprep.mubr.msk.f32.mxu0 %vm7013_vm1, %v7012_v1 }
 0x11e   : > { %v7833_v6 = vpop.f32.mrb[24].mxu0  ;;  %v7835_v62 = vpop.f32.mrb[24].mxu1 }
 0x11f   : > { %v5713_v2 = vpop.f32.mrb[25].mxu0  ;;  %6063 = vmatmul.mubr.msk.f32.gmra.mrb[130].mxu1 %vm251_vm2, %v7179_v12  ;;  %6185 = vmatmul.mubr.msk.f32.gmra.mrb[130].mxu0 %vm251_vm2, %v7165_v10  ;;  %v5776_v3 = vpop.f32.mrb[25].mxu1 }
 0x120   : > { %6065 = vmatprep.mubr.msk.f32.mxu1 %vm7013_vm1, %v7012_v1  ;;  %6187 = vmatprep.mubr.msk.f32.mxu0 %vm7013_vm1, %v7012_v1 }
 0x122   : > { %v7845_v8 = vpop.f32.mrb[26].mxu0  ;;  %v7847_v9 = vpop.f32.mrb[26].mxu1 }
 0x123   : > { %v5716_v11 = vpop.f32.mrb[27].mxu0  ;;  %6066 = vmatmul.mubr.msk.f32.gmra.mrb[132].mxu1 %vm251_vm2, %v7193_v14  ;;  %6188 = vmatmul.mubr.msk.f32.gmra.mrb[132].mxu0 %vm251_vm2, %v7179_v12  ;;  %v5779_v17 = vpop.f32.mrb[27].mxu1 }
 0x124   : > { %6068 = vmatprep.mubr.msk.f32.mxu1 %vm7013_vm1, %v7012_v1  ;;  %6190 = vmatprep.mubr.msk.f32.mxu0 %vm7013_vm1, %v7012_v1 }
 0x126   : > { %v7857_v10 = vpop.f32.mrb[28].mxu0  ;;  %v7859_v19 = vpop.f32.mrb[28].mxu1 }
 0x127   : > { %v5719_v25 = vpop.f32.mrb[29].mxu0  ;;  %6069 = vmatmul.mubr.msk.f32.gmra.mrb[134].mxu1 %vm251_vm2, %v7207_v16  ;;  %6191 = vmatmul.mubr.msk.f32.gmra.mrb[134].mxu0 %vm251_vm2, %v7193_v14  ;;  %v5782_v27 = vpop.f32.mrb[29].mxu1 }
 0x128   : > { %6071 = vmatprep.mubr.msk.f32.mxu1 %vm7013_vm1, %v7012_v1  ;;  %6193 = vmatprep.mubr.msk.f32.mxu0 %vm7013_vm1, %v7012_v1 }
 0x12a   : > { %v7869_v12 = vpop.f32.mrb[30].mxu0  ;;  %v625_v29 = vpop.f32.mrb[30].mxu1 }
 0x12b   : > { %v5722_v35 = vpop.f32.mrb[31].mxu0  ;;  %6072 = vmatmul.mubr.msk.f32.gmra.mrb[136].mxu1 %vm251_vm2, %v7221_v18  ;;  %6194 = vmatmul.mubr.msk.f32.gmra.mrb[136].mxu0 %vm251_vm2, %v7207_v16  ;;  %v5785_v37 = vpop.f32.mrb[31].mxu1 }
 0x12c   : > { %6074 = vmatprep.mubr.msk.f32.mxu1 %vm7013_vm1, %v7012_v1  ;;  %6196 = vmatprep.mubr.msk.f32.mxu0 %vm7013_vm1, %v7012_v1 }
 0x12e   : > { %v7879_v14 = vpop.f32.mrb[32].mxu0  ;;  %v629_v39 = vpop.f32.mrb[32].mxu1 }
 0x12f   : > { %v5725_v45 = vpop.f32.mrb[33].mxu0  ;;  %6075 = vmatmul.mubr.msk.f32.gmra.mrb[138].mxu1 %vm251_vm2, %v7235_v20  ;;  %6197 = vmatmul.mubr.msk.f32.gmra.mrb[138].mxu0 %vm251_vm2, %v7221_v18  ;;  %v5788_v46 = vpop.f32.mrb[33].mxu1 }
 0x130   : > { %6077 = vmatprep.mubr.msk.f32.mxu1 %vm7013_vm1, %v7012_v1  ;;  %6199 = vmatprep.mubr.msk.f32.mxu0 %vm7013_vm1, %v7012_v1 }
 0x132   : > { %v7889_v16 = vpop.f32.mrb[34].mxu0  ;;  %v633_v53 = vpop.f32.mrb[34].mxu1 }
 0x133   : > { %v5728_v4 = vpop.f32.mrb[35].mxu0  ;;  %6078 = vmatmul.mubr.msk.f32.gmra.mrb[140].mxu1 %vm251_vm2, %v7249_v22  ;;  %6200 = vmatmul.mubr.msk.f32.gmra.mrb[140].mxu0 %vm251_vm2, %v7235_v20  ;;  %v5791_v58 = vpop.f32.mrb[35].mxu1 }
 0x134   : > { %6080 = vmatprep.mubr.msk.f32.mxu1 %vm7013_vm1, %v7012_v1  ;;  %6202 = vmatprep.mubr.msk.f32.mxu0 %vm7013_vm1, %v7012_v1 }
 0x136   : > { %v7899_v18 = vpop.f32.mrb[36].mxu0  ;;  %v637_v61 = vpop.f32.mrb[36].mxu1 }
 0x137   : > { %v5731_v2 = vpop.f32.mrb[37].mxu0  ;;  %6081 = vmatmul.mubr.msk.f32.gmra.mrb[142].mxu1 %vm251_vm2, %v7263_v24  ;;  %6203 = vmatmul.mubr.msk.f32.gmra.mrb[142].mxu0 %vm251_vm2, %v7249_v22  ;;  %v5794_v3 = vpop.f32.mrb[37].mxu1 }
 0x138   : > { %6083 = vmatprep.mubr.msk.f32.mxu1 %vm7013_vm1, %v7012_v1  ;;  %6205 = vmatprep.mubr.msk.f32.mxu0 %vm7013_vm1, %v7012_v1 }
 0x13a   : > { %v7909_v20 = vpop.f32.mrb[38].mxu0  ;;  %v641_v11 = vpop.f32.mrb[38].mxu1 }
 0x13b   : > { %v5734_v17 = vpop.f32.mrb[39].mxu0  ;;  %6084 = vmatmul.mubr.msk.f32.gmra.mrb[144].mxu1 %vm251_vm2, %v7277_v26  ;;  %6206 = vmatmul.mubr.msk.f32.gmra.mrb[144].mxu0 %vm251_vm2, %v7263_v24  ;;  %v5797_v25 = vpop.f32.mrb[39].mxu1 }
 0x13c   : > { %6086 = vmatprep.mubr.msk.f32.mxu1 %vm7013_vm1, %v7012_v1  ;;  %6208 = vmatprep.mubr.msk.f32.mxu0 %vm7013_vm1, %v7012_v1 }
 0x13e   : > { %v7919_v22 = vpop.f32.mrb[40].mxu0  ;;  %v751_v27 = vpop.f32.mrb[40].mxu1 }
 0x13f   : > { %v5737_v29 = vpop.f32.mrb[41].mxu0  ;;  %6087 = vmatmul.mubr.msk.f32.gmra.mrb[146].mxu1 %vm251_vm2, %v7291_v28  ;;  %6209 = vmatmul.mubr.msk.f32.gmra.mrb[146].mxu0 %vm251_vm2, %v7277_v26  ;;  %v5802_v35 = vpop.f32.mrb[41].mxu1  ;;  %v989_v39 = vrot.slane %v751_v27, 1 }
 0x140   : > { %6089 = vmatprep.mubr.msk.f32.mxu1 %vm7013_vm1, %v7012_v1  ;;  %6211 = vmatprep.mubr.msk.f32.mxu0 %vm7013_vm1, %v7012_v1 }
 0x142   : > { %v756_v24 = vpop.f32.mrb[42].mxu1  ;;  %v1205_v37 = vpop.f32.mrb[42].mxu0 }
 0x143   : > { %v990_v45 = vrot.slane %v756_v24, 1  ;;  %v5927_v46 = vpop.f32.mrb[43].mxu0  ;;  %6090 = vmatmul.mubr.msk.f32.gmra.mrb[148].mxu1 %vm251_vm2, %v7305_v30  ;;  %6212 = vmatmul.mubr.msk.f32.gmra.mrb[148].mxu0 %vm251_vm2, %v7291_v28  ;;  %v5805_v26 = vpop.f32.mrb[43].mxu1  ;;  %v1443_v2 = vrot.slane %v1205_v37, 2 }
 0x144   : > { %6092 = vmatprep.mubr.msk.f32.mxu1 %vm7013_vm1, %v7012_v1  ;;  %6214 = vmatprep.mubr.msk.f32.mxu0 %vm7013_vm1, %v7012_v1 }
 0x145   : > { %v991_v53 = vsel %vm988_vm3, %v989_v39, %v990_v45 }
 0x146   : > { %v1098_v4 = vadd.f32 %v991_v53, %v7679_v47  ;;  %v761_v58 = vpop.f32.mrb[44].mxu1  ;;  %v1210_v61 = vpop.f32.mrb[44].mxu0 }
 0x147   : > { %v992_v3 = vrot.slane %v761_v58, 1  ;;  %v1444_v11 = vrot.slane %v1210_v61, 2  ;;  %v5930_v17 = vpop.f32.mrb[45].mxu0  ;;  %6093 = vmatmul.mubr.msk.f32.gmra.mrb[150].mxu1 %vm251_vm2, %v7319_v32  ;;  %6215 = vmatmul.mubr.msk.f32.gmra.mrb[150].mxu0 %vm251_vm2, %v7305_v30  ;;  %v5808_v28 = vpop.f32.mrb[45].mxu1 }
 0x148   : > { %6095 = vmatprep.mubr.msk.f32.mxu1 %vm7013_vm1, %v7012_v1  ;;  %6217 = vmatprep.mubr.msk.f32.mxu0 %vm7013_vm1, %v7012_v1 }
 0x149   : > { %v993_v47 = vsel %vm988_vm3, %v990_v45, %v992_v3  ;;  %v1445_v25 = vsel %vm1442_vm4, %v1443_v2, %v1444_v11 }
 0x14a   : > { %v1099_v27 = vadd.f32 %v993_v47, %v7691_v51  ;;  %v766_v29 = vpop.f32.mrb[46].mxu1  ;;  %v1215_v35 = vpop.f32.mrb[46].mxu0  ;;  %v7950_v24 = vadd.f32 %v1445_v25, %v1098_v4 }
 0x14b   : > { %v994_v37 = vrot.slane %v766_v29, 1  ;;  %v1446_v39 = vrot.slane %v1215_v35, 2  ;;  %v5933_v30 = vpop.f32.mrb[47].mxu0  ;;  %6096 = vmatmul.mubr.msk.f32.gmra.mrb[152].mxu1 %vm251_vm2, %v7333_v34  ;;  %6218 = vmatmul.mubr.msk.f32.gmra.mrb[152].mxu0 %vm251_vm2, %v7319_v32  ;;  %v5811_v46 = vpop.f32.mrb[47].mxu1 }
 0x14c   : > { %6098 = vmatprep.mubr.msk.f32.mxu1 %vm7013_vm1, %v7012_v1  ;;  %6220 = vmatprep.mubr.msk.f32.mxu0 %vm7013_vm1, %v7012_v1 }
 0x14d   : > { %v995_v51 = vsel %vm988_vm3, %v992_v3, %v994_v37  ;;  %v1447_v45 = vsel %vm1442_vm4, %v1444_v11, %v1446_v39 }
 0x14e   : > { %v1100_v26 = vadd.f32 %v995_v51, %v7703_v55  ;;  %v771_v53 = vpop.f32.mrb[48].mxu1  ;;  %v1220_v4 = vpop.f32.mrb[48].mxu0  ;;  %v7963_v58 = vadd.f32 %v1447_v45, %v1099_v27 }
 0x14f   : > { %v996_v61 = vrot.slane %v771_v53, 1  ;;  %v1448_v2 = vrot.slane %v1220_v4, 2  ;;  %v5936_v32 = vpop.f32.mrb[49].mxu0  ;;  %6099 = vmatmul.mubr.msk.f32.gmra.mrb[154].mxu1 %vm251_vm2, %v7347_v36  ;;  %6221 = vmatmul.mubr.msk.f32.gmra.mrb[154].mxu0 %vm251_vm2, %v7333_v34  ;;  %v5814_v17 = vpop.f32.mrb[49].mxu1 }
 0x150   : > { %6101 = vmatprep.mubr.msk.f32.mxu1 %vm7013_vm1, %v7012_v1  ;;  %6223 = vmatprep.mubr.msk.f32.mxu0 %vm7013_vm1, %v7012_v1 }
 0x151   : > { %v997_v55 = vsel %vm988_vm3, %v994_v37, %v996_v61  ;;  %v1449_v3 = vsel %vm1442_vm4, %v1446_v39, %v1448_v2 }
 0x152   : > { %v1101_v11 = vadd.f32 %v997_v55, %v7715_v59  ;;  %v776_v28 = vpop.f32.mrb[50].mxu1  ;;  %v1225_v47 = vpop.f32.mrb[50].mxu0  ;;  %v7976_v25 = vadd.f32 %v1449_v3, %v1100_v26 }
 0x153   : > { %v998_v27 = vrot.slane %v776_v28, 1  ;;  %v1450_v29 = vrot.slane %v1225_v47, 2  ;;  %v5939_v34 = vpop.f32.mrb[51].mxu0  ;;  %6102 = vmatmul.mubr.msk.f32.gmra.mrb[156].mxu1 %vm251_vm2, %v7361_v38  ;;  %6224 = vmatmul.mubr.msk.f32.gmra.mrb[156].mxu0 %vm251_vm2, %v7347_v36  ;;  %v5817_v35 = vpop.f32.mrb[51].mxu1 }
 0x154   : > { %6104 = vmatprep.mubr.msk.f32.mxu1 %vm7013_vm1, %v7012_v1  ;;  %6226 = vmatprep.mubr.msk.f32.mxu0 %vm7013_vm1, %v7012_v1 }
 0x155   : > { %v999_v59 = vsel %vm988_vm3, %v996_v61, %v998_v27  ;;  %v1451_v37 = vsel %vm1442_vm4, %v1448_v2, %v1450_v29 }
 0x156   : > { %v1102_v39 = vadd.f32 %v999_v59, %v7727_v63  ;;  %v781_v30 = vpop.f32.mrb[52].mxu1  ;;  %v1230_v46 = vpop.f32.mrb[52].mxu0  ;;  %v7989_v51 = vadd.f32 %v1451_v37, %v1101_v11 }
 0x157   : > { %v1000_v45 = vrot.slane %v781_v30, 1  ;;  %v1452_v26 = vrot.slane %v1230_v46, 2  ;;  %v5942_v36 = vpop.f32.mrb[53].mxu0  ;;  %6105 = vmatmul.mubr.msk.f32.gmra.mrb[158].mxu1 %vm251_vm2, %v7375_v40  ;;  %6227 = vmatmul.mubr.msk.f32.gmra.mrb[158].mxu0 %vm251_vm2, %v7361_v38  ;;  %v5820_v53 = vpop.f32.mrb[53].mxu1 }
 0x158   : > { %6107 = vmatprep.mubr.msk.f32.mxu1 %vm7013_vm1, %v7012_v1  ;;  %6229 = vmatprep.mubr.msk.f32.mxu0 %vm7013_vm1, %v7012_v1 }
 0x159   : > { %v1001_v63 = vsel %vm988_vm3, %v998_v27, %v1000_v45  ;;  %v1453_v4 = vsel %vm1442_vm4, %v1450_v29, %v1452_v26 }
 0x15a   : > { %v1103_v61 = vadd.f32 %v1001_v63, %v7739_v5  ;;  %v786_v2 = vpop.f32.mrb[54].mxu1  ;;  %v1235_v32 = vpop.f32.mrb[54].mxu0  ;;  %v8002_v17 = vadd.f32 %v1453_v4, %v1102_v39  ;;  %v6846_v63 = vld [vmem:[%s7110_s7 + $0xa8] sm:$0xff] }
 0x15b   : > { %v1002_v55 = vrot.slane %v786_v2, 1  ;;  %v1454_v3 = vrot.slane %v1235_v32, 2  ;;  %v5945_v38 = vpop.f32.mrb[55].mxu0  ;;  %6108 = vmatmul.mubr.msk.f32.gmra.mrb[160].mxu1 %vm251_vm2, %v7389_v42  ;;  %6230 = vmatmul.mubr.msk.f32.gmra.mrb[160].mxu0 %vm251_vm2, %v7375_v40  ;;  %v5823_v11 = vpop.f32.mrb[55].mxu1 }
 0x15c   : > { %6110 = vmatprep.mubr.msk.f32.mxu1 %vm7013_vm1, %v7012_v1  ;;  %6232 = vmatprep.mubr.msk.f32.mxu0 %vm7013_vm1, %v7012_v1 }
 0x15d   : > { %v1003_v5 = vsel %vm988_vm3, %v1000_v45, %v1002_v55  ;;  %v1455_v28 = vsel %vm1442_vm4, %v1452_v26, %v1454_v3 }
 0x15e   : > { %v1104_v47 = vadd.f32 %v1003_v5, %v7751_v13  ;;  %v791_v27 = vpop.f32.mrb[56].mxu1  ;;  %v1240_v29 = vpop.f32.mrb[56].mxu0  ;;  %v8015_v34 = vadd.f32 %v1455_v28, %v1103_v61  ;;  %v6847_v5 = vld [vmem:[%s7110_s7 + $0xb0] sm:$0xff] }
 0x15f   : > { %v1004_v35 = vrot.slane %v791_v27, 1  ;;  %v1456_v59 = vrot.slane %v1240_v29, 2  ;;  %v5948_v40 = vpop.f32.mrb[57].mxu0  ;;  %6111 = vmatmul.mubr.msk.f32.gmra.mrb[162].mxu1 %vm251_vm2, %v7403_v44  ;;  %6233 = vmatmul.mubr.msk.f32.gmra.mrb[162].mxu0 %vm251_vm2, %v7389_v42  ;;  %v5826_v37 = vpop.f32.mrb[57].mxu1 }
 0x160   : > { %6113 = vmatprep.mubr.msk.f32.mxu1 %vm7013_vm1, %v7012_v1  ;;  %6235 = vmatprep.mubr.msk.f32.mxu0 %vm7013_vm1, %v7012_v1 }
 0x161   : > { %v1005_v13 = vsel %vm988_vm3, %v1002_v55, %v1004_v35  ;;  %v1457_v39 = vsel %vm1442_vm4, %v1454_v3, %v1456_v59 }
 0x162   : > { %v1105_v30 = vadd.f32 %v1005_v13, %v7763_v21  ;;  %v796_v46 = vpop.f32.mrb[58].mxu1  ;;  %v1245_v45 = vpop.f32.mrb[58].mxu0  ;;  %v8028_v26 = vadd.f32 %v1457_v39, %v1104_v47  ;;  %v6848_v39 = vld [vmem:[%s7110_s7 + $0xb8] sm:$0xff] }
 0x163   : > { %v1006_v36 = vrot.slane %v796_v46, 1  ;;  %v1458_v53 = vrot.slane %v1245_v45, 2  ;;  %v5951_v42 = vpop.f32.mrb[59].mxu0  ;;  %6114 = vmatmul.mubr.msk.f32.gmra.mrb[164].mxu1 %vm251_vm2, %v6846_v63  ;;  %6236 = vmatmul.mubr.msk.f32.gmra.mrb[164].mxu0 %vm251_vm2, %v7403_v44  ;;  %v5829_v4 = vpop.f32.mrb[59].mxu1 }
 0x164   : > { %6116 = vmatprep.mubr.msk.f32.mxu1 %vm7013_vm1, %v7012_v1  ;;  %6238 = vmatprep.mubr.msk.f32.mxu0 %vm7013_vm1, %v7012_v1 }
 0x165   : > { %v1007_v21 = vsel %vm988_vm3, %v1004_v35, %v1006_v36  ;;  %v1459_v61 = vsel %vm1442_vm4, %v1456_v59, %v1458_v53 }
 0x166   : > { %v1106_v2 = vadd.f32 %v1007_v21, %v7778_v31  ;;  %v801_v32 = vpop.f32.mrb[60].mxu1  ;;  %v1250_v55 = vpop.f32.mrb[60].mxu0  ;;  %v8041_v3 = vadd.f32 %v1459_v61, %v1105_v30  ;;  %v6849_v61 = vld [vmem:[%s7110_s7 + $0xc0] sm:$0xff] }
 0x167   : > { %v1008_v38 = vrot.slane %v801_v32, 1  ;;  %v1460_v11 = vrot.slane %v1250_v55, 2  ;;  %v5954_v44 = vpop.f32.mrb[61].mxu0  ;;  %6117 = vmatmul.mubr.msk.f32.gmra.mrb[166].mxu1 %vm251_vm2, %v6847_v5  ;;  %6239 = vmatmul.mubr.msk.f32.gmra.mrb[166].mxu0 %vm251_vm2, %v6846_v63  ;;  %v5832_v28 = vpop.f32.mrb[61].mxu1 }
 0x168   : > { %6119 = vmatprep.mubr.msk.f32.mxu1 %vm7013_vm1, %v7012_v1  ;;  %6241 = vmatprep.mubr.msk.f32.mxu0 %vm7013_vm1, %v7012_v1 }
 0x169   : > { %v1009_v31 = vsel %vm988_vm3, %v1006_v36, %v1008_v38  ;;  %v1461_v47 = vsel %vm1442_vm4, %v1458_v53, %v1460_v11 }
 0x16a   : > { %v1107_v27 = vadd.f32 %v1009_v31, %v7795_v41  ;;  %v806_v29 = vpop.f32.mrb[62].mxu1  ;;  %v1255_v35 = vpop.f32.mrb[62].mxu0  ;;  %v8053_v59 = vadd.f32 %v1461_v47, %v1106_v2  ;;  %v6850_v47 = vld [vmem:[%s7110_s7 + $0xc8] sm:$0xff] }
 0x16b   : > { %v1010_v40 = vrot.slane %v806_v29, 1  ;;  %v1462_v37 = vrot.slane %v1255_v35, 2  ;;  %v5957_v13 = vpop.f32.mrb[63].mxu0  ;;  %6120 = vmatmul.mubr.msk.f32.gmra.mrb[168].mxu1 %vm251_vm2, %v6848_v39  ;;  %6242 = vmatmul.mubr.msk.f32.gmra.mrb[168].mxu0 %vm251_vm2, %v6847_v5  ;;  %v5835_v30 = vpop.f32.mrb[63].mxu1 }
 0x16c   : > { %6122 = vmatprep.mubr.msk.f32.mxu1 %vm7013_vm1, %v7012_v1  ;;  %6244 = vmatprep.mubr.msk.f32.mxu0 %vm7013_vm1, %v7012_v1 }
 0x16d   : > { %v1011_v41 = vsel %vm988_vm3, %v1008_v38, %v1010_v40  ;;  %v1463_v46 = vsel %vm1442_vm4, %v1460_v11, %v1462_v37 }
 0x16e   : > { %v1108_v45 = vadd.f32 %v1011_v41, %v7809_v49  ;;  %v811_v36 = vpop.f32.mrb[64].mxu1  ;;  %v1260_v53 = vpop.f32.mrb[64].mxu0  ;;  %v8065_v42 = vadd.f32 %v1463_v46, %v1107_v27  ;;  %v6851_v46 = vld [vmem:[%s7110_s7 + $0xd0] sm:$0xff] }
 0x16f   : > { %v1012_v63 = vrot.slane %v811_v36, 1  ;;  %v1464_v4 = vrot.slane %v1260_v53, 2  ;;  %v5960_v21 = vpop.f32.mrb[65].mxu0  ;;  %6123 = vmatmul.mubr.msk.f32.gmra.mrb[170].mxu1 %vm251_vm2, %v6849_v61  ;;  %6245 = vmatmul.mubr.msk.f32.gmra.mrb[170].mxu0 %vm251_vm2, %v6848_v39  ;;  %v5838_v2 = vpop.f32.mrb[65].mxu1 }
 0x170   : > { %6125 = vmatprep.mubr.msk.f32.mxu1 %vm7013_vm1, %v7012_v1  ;;  %6247 = vmatprep.mubr.msk.f32.mxu0 %vm7013_vm1, %v7012_v1 }
 0x171   : > { %v1013_v49 = vsel %vm988_vm3, %v1010_v40, %v1012_v63  ;;  %v1465_v32 = vsel %vm1442_vm4, %v1462_v37, %v1464_v4 }
 0x172   : > { %v1109_v55 = vadd.f32 %v1013_v49, %v7821_v54  ;;  %v816_v38 = vpop.f32.mrb[66].mxu1  ;;  %v1265_v11 = vpop.f32.mrb[66].mxu0  ;;  %v8077_v44 = vadd.f32 %v1465_v32, %v1108_v45  ;;  %v6852_v32 = vld [vmem:[%s7110_s7 + $0xd8] sm:$0xff] }
 0x173   : > { %v1014_v5 = vrot.slane %v816_v38, 1  ;;  %v1466_v28 = vrot.slane %v1265_v11, 2  ;;  %v5963_v31 = vpop.f32.mrb[67].mxu0  ;;  %6126 = vmatmul.mubr.msk.f32.gmra.mrb[172].mxu1 %vm251_vm2, %v6850_v47  ;;  %6248 = vmatmul.mubr.msk.f32.gmra.mrb[172].mxu0 %vm251_vm2, %v6849_v61  ;;  %v5841_v27 = vpop.f32.mrb[67].mxu1 }
 0x174   : > { %6128 = vmatprep.mubr.msk.f32.mxu1 %vm7013_vm1, %v7012_v1  ;;  %6250 = vmatprep.mubr.msk.f32.mxu0 %vm7013_vm1, %v7012_v1 }
 0x175   : > { %v1015_v54 = vsel %vm988_vm3, %v1012_v63, %v1014_v5  ;;  %v1467_v29 = vsel %vm1442_vm4, %v1464_v4, %v1466_v28 }
 0x176   : > { %v1110_v35 = vadd.f32 %v1015_v54, %v7833_v6  ;;  %v821_v40 = vpop.f32.mrb[68].mxu1  ;;  %v1270_v37 = vpop.f32.mrb[68].mxu0  ;;  %v8089_v13 = vadd.f32 %v1467_v29, %v1109_v55  ;;  %v6853_v29 = vld [vmem:[%s7110_s7 + $0xe0] sm:$0xff] }
 0x177   : > { %v1016_v39 = vrot.slane %v821_v40, 1  ;;  %v1468_v30 = vrot.slane %v1270_v37, 2  ;;  %v5966_v41 = vpop.f32.mrb[69].mxu0  ;;  %6129 = vmatmul.mubr.msk.f32.gmra.mrb[174].mxu1 %vm251_vm2, %v6851_v46  ;;  %6251 = vmatmul.mubr.msk.f32.gmra.mrb[174].mxu0 %vm251_vm2, %v6850_v47  ;;  %v5844_v45 = vpop.f32.mrb[69].mxu1 }
 0x178   : > { %6131 = vmatprep.mubr.msk.f32.mxu1 %vm7013_vm1, %v7012_v1  ;;  %6253 = vmatprep.mubr.msk.f32.mxu0 %vm7013_vm1, %v7012_v1 }
 0x179   : > { %v1017_v6 = vsel %vm988_vm3, %v1014_v5, %v1016_v39  ;;  %v1469_v36 = vsel %vm1442_vm4, %v1466_v28, %v1468_v30 }
 0x17a   : > { %v1111_v53 = vadd.f32 %v1017_v6, %v7845_v8  ;;  %v826_v63 = vpop.f32.mrb[70].mxu1  ;;  %v1275_v4 = vpop.f32.mrb[70].mxu0  ;;  %v8101_v21 = vadd.f32 %v1469_v36, %v1110_v35  ;;  %v6854_v36 = vld [vmem:[%s7110_s7 + $0xe8] sm:$0xff] }
 0x17b   : > { %v1018_v61 = vrot.slane %v826_v63, 1  ;;  %v1470_v2 = vrot.slane %v1275_v4, 2  ;;  %v5969_v49 = vpop.f32.mrb[71].mxu0  ;;  %6132 = vmatmul.mubr.msk.f32.gmra.mrb[176].mxu1 %vm251_vm2, %v6852_v32  ;;  %6254 = vmatmul.mubr.msk.f32.gmra.mrb[176].mxu0 %vm251_vm2, %v6851_v46  ;;  %v5847_v55 = vpop.f32.mrb[71].mxu1 }
 0x17c   : > { %6134 = vmatprep.mubr.msk.f32.mxu1 %vm7013_vm1, %v7012_v1  ;;  %6256 = vmatprep.mubr.msk.f32.mxu0 %vm7013_vm1, %v7012_v1 }
 0x17d   : > { %v1019_v8 = vsel %vm988_vm3, %v1016_v39, %v1018_v61  ;;  %v1471_v38 = vsel %vm1442_vm4, %v1468_v30, %v1470_v2 }
 0x17e   : > { %v1112_v11 = vadd.f32 %v1019_v8, %v7857_v10  ;;  %v831_v5 = vpop.f32.mrb[72].mxu1  ;;  %v1280_v28 = vpop.f32.mrb[72].mxu0  ;;  %v8113_v31 = vadd.f32 %v1471_v38, %v1111_v53  ;;  %v6855_v38 = vld [vmem:[%s7110_s7 + $0xf0] sm:$0xff] }
 0x17f   : > { %v1020_v47 = vrot.slane %v831_v5, 1  ;;  %v1472_v27 = vrot.slane %v1280_v28, 2  ;;  %v5972_v54 = vpop.f32.mrb[73].mxu0  ;;  %6135 = vmatmul.mubr.msk.f32.gmra.mrb[178].mxu1 %vm251_vm2, %v6853_v29  ;;  %6257 = vmatmul.mubr.msk.f32.gmra.mrb[178].mxu0 %vm251_vm2, %v6852_v32  ;;  %v5850_v35 = vpop.f32.mrb[73].mxu1 }
 0x180   : > { %6137 = vmatprep.mubr.msk.f32.mxu1 %vm7013_vm1, %v7012_v1  ;;  %6259 = vmatprep.mubr.msk.f32.mxu0 %vm7013_vm1, %v7012_v1 }
 0x181   : > { %v1021_v10 = vsel %vm988_vm3, %v1018_v61, %v1020_v47  ;;  %v1473_v40 = vsel %vm1442_vm4, %v1470_v2, %v1472_v27 }
 0x182   : > { %v1113_v37 = vadd.f32 %v1021_v10, %v7869_v12  ;;  %v836_v39 = vpop.f32.mrb[74].mxu1  ;;  %v1285_v30 = vpop.f32.mrb[74].mxu0  ;;  %v8125_v41 = vadd.f32 %v1473_v40, %v1112_v11  ;;  %v6856_v40 = vld [vmem:[%s7110_s7 + $0xf8] sm:$0xff] }
 0x183   : > { %v1022_v46 = vrot.slane %v836_v39, 1  ;;  %v1474_v45 = vrot.slane %v1285_v30, 2  ;;  %v5975_v6 = vpop.f32.mrb[75].mxu0  ;;  %6138 = vmatmul.mubr.msk.f32.gmra.mrb[180].mxu1 %vm251_vm2, %v6854_v36  ;;  %6260 = vmatmul.mubr.msk.f32.gmra.mrb[180].mxu0 %vm251_vm2, %v6853_v29  ;;  %v5853_v53 = vpop.f32.mrb[75].mxu1 }
 0x184   : > { %6140 = vmatprep.mubr.msk.f32.mxu1 %vm7013_vm1, %v7012_v1  ;;  %6262 = vmatprep.mubr.msk.f32.mxu0 %vm7013_vm1, %v7012_v1 }
 0x185   : > { %v1023_v12 = vsel %vm988_vm3, %v1020_v47, %v1022_v46  ;;  %v1475_v63 = vsel %vm1442_vm4, %v1472_v27, %v1474_v45 }
 0x186   : > { %v1114_v4 = vadd.f32 %v1023_v12, %v7879_v14  ;;  %v841_v61 = vpop.f32.mrb[76].mxu1  ;;  %v1290_v2 = vpop.f32.mrb[76].mxu0  ;;  %v8137_v49 = vadd.f32 %v1475_v63, %v1113_v37  ;;  %v6857_v63 = vld [vmem:[%s7110_s7 + $0x100] sm:$0xff] }
 0x187   : > { %v1024_v32 = vrot.slane %v841_v61, 1  ;;  %v1476_v55 = vrot.slane %v1290_v2, 2  ;;  %v5978_v8 = vpop.f32.mrb[77].mxu0  ;;  %6141 = vmatmul.mubr.msk.f32.gmra.mrb[182].mxu1 %vm251_vm2, %v6855_v38  ;;  %6263 = vmatmul.mubr.msk.f32.gmra.mrb[182].mxu0 %vm251_vm2, %v6854_v36  ;;  %v5856_v11 = vpop.f32.mrb[77].mxu1 }
 0x188   : > { %6143 = vmatprep.mubr.msk.f32.mxu1 %vm7013_vm1, %v7012_v1  ;;  %6265 = vmatprep.mubr.msk.f32.mxu0 %vm7013_vm1, %v7012_v1 }
 0x189   : > { %v1025_v14 = vsel %vm988_vm3, %v1022_v46, %v1024_v32  ;;  %v1477_v5 = vsel %vm1442_vm4, %v1474_v45, %v1476_v55 }
 0x18a   : > { %v1115_v28 = vadd.f32 %v1025_v14, %v7889_v16  ;;  %v846_v47 = vpop.f32.mrb[78].mxu1  ;;  %v1295_v27 = vpop.f32.mrb[78].mxu0  ;;  %v8149_v54 = vadd.f32 %v1477_v5, %v1114_v4  ;;  %v6858_v5 = vld [vmem:[%s7110_s7 + $0x108] sm:$0xff] }
 0x18b   : > { %v1026_v29 = vrot.slane %v846_v47, 1  ;;  %v1478_v35 = vrot.slane %v1295_v27, 2  ;;  %v5981_v10 = vpop.f32.mrb[79].mxu0  ;;  %6144 = vmatmul.mubr.msk.f32.gmra.mrb[184].mxu1 %vm251_vm2, %v6856_v40  ;;  %6266 = vmatmul.mubr.msk.f32.gmra.mrb[184].mxu0 %vm251_vm2, %v6855_v38  ;;  %v5859_v37 = vpop.f32.mrb[79].mxu1 }
 0x18c   : > { %6146 = vmatprep.mubr.msk.f32.mxu1 %vm7013_vm1, %v7012_v1  ;;  %6268 = vmatprep.mubr.msk.f32.mxu0 %vm7013_vm1, %v7012_v1 }
 0x18d   : > { %v1027_v16 = vsel %vm988_vm3, %v1024_v32, %v1026_v29  ;;  %v1479_v39 = vsel %vm1442_vm4, %v1476_v55, %v1478_v35 }
 0x18e   : > { %v1116_v30 = vadd.f32 %v1027_v16, %v7899_v18  ;;  %v851_v46 = vpop.f32.mrb[80].mxu1  ;;  %v1300_v45 = vpop.f32.mrb[80].mxu0  ;;  %v8161_v6 = vadd.f32 %v1479_v39, %v1115_v28  ;;  %v6859_v39 = vld [vmem:[%s7110_s7 + $0x110] sm:$0xff] }
 0x18f   : > { %v1028_v36 = vrot.slane %v851_v46, 1  ;;  %v1480_v53 = vrot.slane %v1300_v45, 2  ;;  %v5984_v12 = vpop.f32.mrb[81].mxu0  ;;  %6147 = vmatmul.mubr.msk.f32.gmra.mrb[186].mxu1 %vm251_vm2, %v6857_v63  ;;  %6269 = vmatmul.mubr.msk.f32.gmra.mrb[186].mxu0 %vm251_vm2, %v6856_v40  ;;  %v5862_v4 = vpop.f32.mrb[81].mxu1 }
 0x190   : > { %6149 = vmatprep.mubr.msk.f32.mxu1 %vm7013_vm1, %v7012_v1  ;;  %6271 = vmatprep.mubr.msk.f32.mxu0 %vm7013_vm1, %v7012_v1 }
 0x191   : > { %v1029_v18 = vsel %vm988_vm3, %v1026_v29, %v1028_v36  ;;  %v1481_v61 = vsel %vm1442_vm4, %v1478_v35, %v1480_v53 }
 0x192   : > { %v1117_v2 = vadd.f32 %v1029_v18, %v7909_v20  ;;  %v856_v32 = vpop.f32.mrb[82].mxu1  ;;  %v1305_v55 = vpop.f32.mrb[82].mxu0  ;;  %v8173_v8 = vadd.f32 %v1481_v61, %v1116_v30  ;;  %v6860_v61 = vld [vmem:[%s7110_s7 + $0x118] sm:$0xff] }
 0x193   : > { %v1030_v38 = vrot.slane %v856_v32, 1  ;;  %v1482_v11 = vrot.slane %v1305_v55, 2  ;;  %v5987_v14 = vpop.f32.mrb[83].mxu0  ;;  %6150 = vmatmul.mubr.msk.f32.gmra.mrb[188].mxu1 %vm251_vm2, %v6858_v5  ;;  %6272 = vmatmul.mubr.msk.f32.gmra.mrb[188].mxu0 %vm251_vm2, %v6857_v63  ;;  %v5865_v28 = vpop.f32.mrb[83].mxu1 }
 0x194   : > { %6152 = vmatprep.mubr.msk.f32.mxu1 %vm7013_vm1, %v7012_v1  ;;  %6274 = vmatprep.mubr.msk.f32.mxu0 %vm7013_vm1, %v7012_v1 }
 0x195   : > { %v1031_v20 = vsel %vm988_vm3, %v1028_v36, %v1030_v38  ;;  %v1483_v47 = vsel %vm1442_vm4, %v1480_v53, %v1482_v11 }
 0x196   : > { %v1118_v27 = vadd.f32 %v1031_v20, %v7919_v22  ;;  %v861_v29 = vpop.f32.mrb[84].mxu1  ;;  %v1310_v35 = vpop.f32.mrb[84].mxu0  ;;  %v8185_v10 = vadd.f32 %v1483_v47, %v1117_v2  ;;  %v6861_v47 = vld [vmem:[%s7110_s7 + $0x120] sm:$0xff] }
 0x197   : > { %v1032_v40 = vrot.slane %v861_v29, 1  ;;  %v1484_v37 = vrot.slane %v1310_v35, 2  ;;  %v5990_v16 = vpop.f32.mrb[85].mxu0  ;;  %6153 = vmatmul.mubr.msk.f32.gmra.mrb[190].mxu1 %vm251_vm2, %v6859_v39  ;;  %6275 = vmatmul.mubr.msk.f32.gmra.mrb[190].mxu0 %vm251_vm2, %v6858_v5  ;;  %v5868_v30 = vpop.f32.mrb[85].mxu1 }
 0x198   : > { %6155 = vmatprep.mubr.msk.f32.mxu1 %vm7013_vm1, %v7012_v1  ;;  %6277 = vmatprep.mubr.msk.f32.mxu0 %vm7013_vm1, %v7012_v1 }
 0x199   : > { %v1033_v22 = vsel %vm988_vm3, %v1030_v38, %v1032_v40  ;;  %v1485_v46 = vsel %vm1442_vm4, %v1482_v11, %v1484_v37 }
 0x19a   : > { %v1119_v45 = vadd.f32 %v1033_v22, %v7681_v48  ;;  %v866_v36 = vpop.f32.mrb[86].mxu1  ;;  %v1315_v53 = vpop.f32.mrb[86].mxu0  ;;  %v8197_v12 = vadd.f32 %v1485_v46, %v1118_v27  ;;  %v6862_v46 = vld [vmem:[%s7110_s7 + $0x128] sm:$0xff] }
 0x19b   : > { %v1034_v63 = vrot.slane %v866_v36, 1  ;;  %v1486_v4 = vrot.slane %v1315_v53, 2  ;;  %v5993_v18 = vpop.f32.mrb[87].mxu0  ;;  %6156 = vmatmul.mubr.msk.f32.gmra.mrb[192].mxu1 %vm251_vm2, %v6860_v61  ;;  %6278 = vmatmul.mubr.msk.f32.gmra.mrb[192].mxu0 %vm251_vm2, %v6859_v39  ;;  %v5871_v2 = vpop.f32.mrb[87].mxu1 }
 0x19c   : > { %6158 = vmatprep.mubr.msk.f32.mxu1 %vm7013_vm1, %v7012_v1  ;;  %6280 = vmatprep.mubr.msk.f32.mxu0 %vm7013_vm1, %v7012_v1 }
 0x19d   : > { %v1035_v48 = vsel %vm988_vm3, %v1032_v40, %v1034_v63  ;;  %v1487_v32 = vsel %vm1442_vm4, %v1484_v37, %v1486_v4 }
 0x19e   : > { %v1120_v55 = vadd.f32 %v1035_v48, %v7693_v52  ;;  %v871_v38 = vpop.f32.mrb[88].mxu1  ;;  %v1320_v11 = vpop.f32.mrb[88].mxu0  ;;  %v8209_v14 = vadd.f32 %v1487_v32, %v1119_v45  ;;  %v6863_v32 = vld [vmem:[%s7110_s7 + $0x130] sm:$0xff] }
 0x19f   : > { %v1036_v5 = vrot.slane %v871_v38, 1  ;;  %v1488_v28 = vrot.slane %v1320_v11, 2  ;;  %v5996_v20 = vpop.f32.mrb[89].mxu0  ;;  %6159 = vmatmul.mubr.msk.f32.gmra.mrb[194].mxu1 %vm251_vm2, %v6861_v47  ;;  %6281 = vmatmul.mubr.msk.f32.gmra.mrb[194].mxu0 %vm251_vm2, %v6860_v61  ;;  %v5874_v27 = vpop.f32.mrb[89].mxu1 }
 0x1a0   : > { %6161 = vmatprep.mubr.msk.f32.mxu1 %vm7013_vm1, %v7012_v1  ;;  %6283 = vmatprep.mubr.msk.f32.mxu0 %vm7013_vm1, %v7012_v1 }
 0x1a1   : > { %v1037_v52 = vsel %vm988_vm3, %v1034_v63, %v1036_v5  ;;  %v1489_v29 = vsel %vm1442_vm4, %v1486_v4, %v1488_v28 }
 0x1a2   : > { %v1121_v35 = vadd.f32 %v1037_v52, %v7705_v56  ;;  %v876_v40 = vpop.f32.mrb[90].mxu1  ;;  %v1325_v37 = vpop.f32.mrb[90].mxu0  ;;  %v8221_v16 = vadd.f32 %v1489_v29, %v1120_v55  ;;  %v6864_v29 = vld [vmem:[%s7110_s7 + $0x138] sm:$0xff] }
 0x1a3   : > { %v1038_v39 = vrot.slane %v876_v40, 1  ;;  %v1490_v30 = vrot.slane %v1325_v37, 2  ;;  %v5999_v22 = vpop.f32.mrb[91].mxu0  ;;  %6162 = vmatmul.mubr.msk.f32.gmra.mrb[196].mxu1 %vm251_vm2, %v6862_v46  ;;  %6284 = vmatmul.mubr.msk.f32.gmra.mrb[196].mxu0 %vm251_vm2, %v6861_v47  ;;  %v5877_v45 = vpop.f32.mrb[91].mxu1 }
 0x1a4   : > { %6164 = vmatprep.mubr.msk.f32.mxu1 %vm7013_vm1, %v7012_v1  ;;  %6286 = vmatprep.mubr.msk.f32.mxu0 %vm7013_vm1, %v7012_v1 }
 0x1a5   : > { %v1039_v56 = vsel %vm988_vm3, %v1036_v5, %v1038_v39  ;;  %v1491_v36 = vsel %vm1442_vm4, %v1488_v28, %v1490_v30 }
 0x1a6   : > { %v1122_v53 = vadd.f32 %v1039_v56, %v7717_v60  ;;  %v881_v63 = vpop.f32.mrb[92].mxu1  ;;  %v1330_v4 = vpop.f32.mrb[92].mxu0  ;;  %v8233_v18 = vadd.f32 %v1491_v36, %v1121_v35  ;;  %v6865_v36 = vld [vmem:[%s7110_s7 + $0x140] sm:$0x3f] }
 0x1a7   : > { %v1040_v61 = vrot.slane %v881_v63, 1  ;;  %v1492_v2 = vrot.slane %v1330_v4, 2  ;;  %v6002_v48 = vpop.f32.mrb[93].mxu0  ;;  %6165 = vmatmul.mubr.msk.f32.gmra.mrb[198].mxu1 %vm251_vm2, %v6863_v32  ;;  %6287 = vmatmul.mubr.msk.f32.gmra.mrb[198].mxu0 %vm251_vm2, %v6862_v46  ;;  %v5880_v55 = vpop.f32.mrb[93].mxu1  ;;  %v5205_v4 = vld [vmem:[%s9669_s1 + $0x1c] sm:$0xf] }
 0x1a8   : > { %6167 = vmatprep.mubr.msk.f32.mxu1 %vm7013_vm1, %v7012_v1  ;;  %6289 = vmatprep.mubr.msk.f32.mxu0 %vm7013_vm1, %v7012_v1 }
 0x1a9   : > { %v1041_v60 = vsel %vm988_vm3, %v1038_v39, %v1040_v61  ;;  %v1493_v38 = vsel %vm1442_vm4, %v1490_v30, %v1492_v2 }
 0x1aa   : > { %v1123_v11 = vadd.f32 %v1041_v60, %v7729_v0  ;;  %v886_v5 = vpop.f32.mrb[94].mxu1  ;;  %v1335_v28 = vpop.f32.mrb[94].mxu0  ;;  %v8245_v20 = vadd.f32 %v1493_v38, %v1122_v53 }
 0x1ab   : > { %v1042_v47 = vrot.slane %v886_v5, 1  ;;  %v1494_v27 = vrot.slane %v1335_v28, 2  ;;  %v6005_v52 = vpop.f32.mrb[95].mxu0  ;;  %6168 = vmatmul.mubr.msk.f32.gmra.mrb[200].mxu1 %vm251_vm2, %v6864_v29  ;;  %6290 = vmatmul.mubr.msk.f32.gmra.mrb[200].mxu0 %vm251_vm2, %v6863_v32  ;;  %v5883_v35 = vpop.f32.mrb[95].mxu1 }
 0x1ac   : > { %6170 = vmatprep.mubr.msk.f32.mxu1 %vm7013_vm1, %v7012_v1  ;;  %6292 = vmatprep.mubr.msk.f32.mxu0 %vm7013_vm1, %v7012_v1 }
 0x1ad   : > { %v1043_v0 = vsel %vm988_vm3, %v1040_v61, %v1042_v47  ;;  %v1495_v40 = vsel %vm1442_vm4, %v1492_v2, %v1494_v27 }
 0x1ae   : > { %v1124_v37 = vadd.f32 %v1043_v0, %v7741_v7  ;;  %v891_v39 = vpop.f32.mrb[96].mxu1  ;;  %v1340_v30 = vpop.f32.mrb[96].mxu0  ;;  %v8257_v22 = vadd.f32 %v1495_v40, %v1123_v11  ;;  %v6866_v11 = vld [vmem:[%s7110_s7] sm:$0xff] }
 0x1af   : > { %v1044_v46 = vrot.slane %v891_v39, 1  ;;  %v1496_v45 = vrot.slane %v1340_v30, 2  ;;  %v6008_v56 = vpop.f32.mrb[97].mxu0  ;;  %6171 = vmatmul.mubr.msk.f32.gmra.mrb[202].mxu1 %vm251_vm2, %v6865_v36  ;;  %6293 = vmatmul.mubr.msk.f32.gmra.mrb[202].mxu0 %vm251_vm2, %v6864_v29  ;;  %v5886_v53 = vpop.f32.mrb[97].mxu1  ;;  %v6867_v39 = vld [vmem:[%s7110_s7 + $0x8] sm:$0xff] }
 0x1b0   : > { %6295 = vmatprep.mubr.msk.f32.mxu0 %vm7013_vm1, %v7012_v1  ;;  %6300 = vmatprep.mubr.msk.f32.mxu1 %vm7013_vm1, %v7012_v1 }
 0x1b1   : > { %v1045_v7 = vsel %vm988_vm3, %v1042_v47, %v1044_v46  ;;  %v1497_v63 = vsel %vm1442_vm4, %v1494_v27, %v1496_v45  ;;  %v5248_v47 = vld [vmem:[%s9669_s1 + $0x20] sm:$0xf] }
 0x1b2   : > { %v1125_v61 = vadd.f32 %v1045_v7, %v7753_v15  ;;  %v896_v2 = vpop.f32.mrb[98].mxu1  ;;  %v1345_v48 = vpop.f32.mrb[98].mxu0  ;;  %v8272_v32 = vadd.f32 %v1497_v63, %v1124_v37 }
 0x1b3   : > { %v1046_v55 = vrot.slane %v896_v2, 1  ;;  %v1498_v60 = vrot.slane %v1345_v48, 2  ;;  %v6011_v38 = vpop.f32.mrb[99].mxu0  ;;  %6296 = vmatmul.mubr.msk.f32.gmra.mrb[204].mxu0 %vm251_vm2, %v6865_v36  ;;  %6301 = vmatmul.mubr.msk.f32.vlgmr.msra.gmra.mrb[204].mxu1 %vm251_vm2, %v6866_v11  ;;  %v5889_v5 = vpop.f32.mrb[99].mxu1 }
 0x1b4   : > { %6549 = vmatpush3.msk.msra.mxu1 %vm375_vm0, %v5205_v4  ;;  %6303 = vmatprep.mubr.msk.f32.mxu1 %vm7013_vm1, %v7012_v1 }
 0x1b5   : > { %v1047_v15 = vsel %vm988_vm3, %v1044_v46, %v1046_v55  ;;  %v1499_v28 = vsel %vm1442_vm4, %v1496_v45, %v1498_v60  ;;  %6425 = vmatprep.mubr.msk.f32.mxu0 %vm7013_vm1, %v7012_v1 }
 0x1b6   : > { %v1126_v27 = vadd.f32 %v1047_v15, %v7765_v23  ;;  %v901_v52 = vpop.f32.mrb[100].mxu1  ;;  %v1350_v29 = vpop.f32.mrb[100].mxu0  ;;  %v8288_v35 = vadd.f32 %v1499_v28, %v1125_v61  ;;  %v6868_v61 = vld [vmem:[%s7110_s7 + $0x10] sm:$0xff] }
 0x1b7   : > { %v1048_v0 = vrot.slane %v901_v52, 1  ;;  %v1500_v40 = vrot.slane %v1350_v29, 2  ;;  %v6014_v37 = vpop.f32.mrb[101].mxu0  ;;  %6304 = vmatmul.mubr.msk.f32.gmra.mrb[206].mxu1 %vm251_vm2, %v6867_v39  ;;  %6426 = vmatmul.mubr.msk.f32.vlgmr.msra.gmra.mrb[206].mxu0 %vm251_vm2, %v6866_v11  ;;  %v5892_v30 = vpop.f32.mrb[101].mxu1 }
 0x1b8   : > { %6674 = vmatpush3.msk.msra.mxu0 %vm375_vm0, %v5248_v47  ;;  %6306 = vmatprep.mubr.msk.f32.mxu1 %vm7013_vm1, %v7012_v1  ;;  %v6869_v47 = vld [vmem:[%s7110_s7 + $0x18] sm:$0xff] }
 0x1b9   : > { %v1049_v23 = vsel %vm988_vm3, %v1046_v55, %v1048_v0  ;;  %v1501_v46 = vsel %vm1442_vm4, %v1498_v60, %v1500_v40  ;;  %6428 = vmatprep.mubr.msk.f32.mxu0 %vm7013_vm1, %v7012_v1 }
 0x1ba   : > { %v1127_v45 = vadd.f32 %v1049_v23, %v7780_v33  ;;  %v906_v56 = vpop.f32.mrb[102].mxu1  ;;  %v1355_v36 = vpop.f32.mrb[102].mxu0  ;;  %v8301_v53 = vadd.f32 %v1501_v46, %v1126_v27  ;;  %v6870_v46 = vld [vmem:[%s7110_s7 + $0x20] sm:$0xff] }
 0x1bb   : > { %v1050_v7 = vrot.slane %v906_v56, 1  ;;  %v1502_v63 = vrot.slane %v1355_v36, 2  ;;  %v6017_v4 = vpop.f32.mrb[103].mxu0  ;;  %6307 = vmatmul.mubr.msk.f32.gmra.mrb[208].mxu1 %vm251_vm2, %v6868_v61  ;;  %6429 = vmatmul.mubr.msk.f32.gmra.mrb[208].mxu0 %vm251_vm2, %v6867_v39  ;;  %v5895_v2 = vpop.f32.mrb[103].mxu1 }
 0x1bc   : > { %6309 = vmatprep.mubr.msk.f32.mxu1 %vm7013_vm1, %v7012_v1  ;;  %6431 = vmatprep.mubr.msk.f32.mxu0 %vm7013_vm1, %v7012_v1 }
 0x1bd   : > { %v1051_v33 = vsel %vm988_vm3, %v1048_v0, %v1050_v7  ;;  %v1503_v48 = vsel %vm1442_vm4, %v1500_v40, %v1502_v63 }
 0x1be   : > { %v1128_v55 = vadd.f32 %v1051_v33, %v7797_v43  ;;  %v911_v60 = vpop.f32.mrb[104].mxu1  ;;  %v1360_v38 = vpop.f32.mrb[104].mxu0  ;;  %v8313_v11 = vadd.f32 %v1503_v48, %v1127_v45  ;;  %v6871_v48 = vld [vmem:[%s7110_s7 + $0x28] sm:$0xff] }
 0x1bf   : > { %v1052_v5 = vrot.slane %v911_v60, 1  ;;  %v1504_v15 = vrot.slane %v1360_v38, 2  ;;  %v6020_v28 = vpop.f32.mrb[105].mxu0  ;;  %6310 = vmatmul.mubr.msk.f32.gmra.mrb[210].mxu1 %vm251_vm2, %v6869_v47  ;;  %6432 = vmatmul.mubr.msk.f32.gmra.mrb[210].mxu0 %vm251_vm2, %v6868_v61  ;;  %v5898_v27 = vpop.f32.mrb[105].mxu1 }
 0x1c0   : > { %6312 = vmatprep.mubr.msk.f32.mxu1 %vm7013_vm1, %v7012_v1  ;;  %6434 = vmatprep.mubr.msk.f32.mxu0 %vm7013_vm1, %v7012_v1 }
 0x1c1   : > { %v1053_v43 = vsel %vm988_vm3, %v1050_v7, %v1052_v5  ;;  %v1505_v52 = vsel %vm1442_vm4, %v1502_v63, %v1504_v15 }
 0x1c2   : > { %v1129_v29 = vadd.f32 %v1053_v43, %v7811_v50  ;;  %v916_v0 = vpop.f32.mrb[106].mxu1  ;;  %v1365_v40 = vpop.f32.mrb[106].mxu0  ;;  %v8325_v37 = vadd.f32 %v1505_v52, %v1128_v55  ;;  %v6872_v52 = vld [vmem:[%s7110_s7 + $0x30] sm:$0xff] }
 0x1c3   : > { %v1054_v39 = vrot.slane %v916_v0, 1  ;;  %v1506_v30 = vrot.slane %v1365_v40, 2  ;;  %v6023_v23 = vpop.f32.mrb[107].mxu0  ;;  %6313 = vmatmul.mubr.msk.f32.gmra.mrb[212].mxu1 %vm251_vm2, %v6870_v46  ;;  %6435 = vmatmul.mubr.msk.f32.gmra.mrb[212].mxu0 %vm251_vm2, %v6869_v47  ;;  %v5901_v45 = vpop.f32.mrb[107].mxu1 }
 0x1c4   : > { %6315 = vmatprep.mubr.msk.f32.mxu1 %vm7013_vm1, %v7012_v1  ;;  %6437 = vmatprep.mubr.msk.f32.mxu0 %vm7013_vm1, %v7012_v1 }
 0x1c5   : > { %v1055_v50 = vsel %vm988_vm3, %v1052_v5, %v1054_v39  ;;  %v1507_v56 = vsel %vm1442_vm4, %v1504_v15, %v1506_v30 }
 0x1c6   : > { %v1130_v36 = vadd.f32 %v1055_v50, %v7823_v57  ;;  %v921_v7 = vpop.f32.mrb[108].mxu1  ;;  %v1370_v63 = vpop.f32.mrb[108].mxu0  ;;  %v8337_v4 = vadd.f32 %v1507_v56, %v1129_v29  ;;  %v6873_v56 = vld [vmem:[%s7110_s7 + $0x38] sm:$0xff] }
 0x1c7   : > { %v1056_v61 = vrot.slane %v921_v7, 1  ;;  %v1508_v2 = vrot.slane %v1370_v63, 2  ;;  %v6026_v33 = vpop.f32.mrb[109].mxu0  ;;  %6316 = vmatmul.mubr.msk.f32.gmra.mrb[214].mxu1 %vm251_vm2, %v6871_v48  ;;  %6438 = vmatmul.mubr.msk.f32.gmra.mrb[214].mxu0 %vm251_vm2, %v6870_v46  ;;  %v5904_v55 = vpop.f32.mrb[109].mxu1 }
 0x1c8   : > { %6318 = vmatprep.mubr.msk.f32.mxu1 %vm7013_vm1, %v7012_v1  ;;  %6440 = vmatprep.mubr.msk.f32.mxu0 %vm7013_vm1, %v7012_v1 }
 0x1c9   : > { %v1057_v57 = vsel %vm988_vm3, %v1054_v39, %v1056_v61  ;;  %v1509_v60 = vsel %vm1442_vm4, %v1506_v30, %v1508_v2 }
 0x1ca   : > { %v1131_v38 = vadd.f32 %v1057_v57, %v7835_v62  ;;  %v926_v5 = vpop.f32.mrb[110].mxu1  ;;  %v1375_v15 = vpop.f32.mrb[110].mxu0  ;;  %v8349_v28 = vadd.f32 %v1509_v60, %v1130_v36  ;;  %v6874_v57 = vld [vmem:[%s7110_s7 + $0x40] sm:$0xff] }
 0x1cb   : > { %v1058_v47 = vrot.slane %v926_v5, 1  ;;  %v1510_v27 = vrot.slane %v1375_v15, 2  ;;  %v6029_v43 = vpop.f32.mrb[111].mxu0  ;;  %6319 = vmatmul.mubr.msk.f32.gmra.mrb[216].mxu1 %vm251_vm2, %v6872_v52  ;;  %6441 = vmatmul.mubr.msk.f32.gmra.mrb[216].mxu0 %vm251_vm2, %v6871_v48  ;;  %v5907_v29 = vpop.f32.mrb[111].mxu1 }
 0x1cc   : > { %6321 = vmatprep.mubr.msk.f32.mxu1 %vm7013_vm1, %v7012_v1  ;;  %6443 = vmatprep.mubr.msk.f32.mxu0 %vm7013_vm1, %v7012_v1 }
 0x1cd   : > { %v1059_v62 = vsel %vm988_vm3, %v1056_v61, %v1058_v47  ;;  %v1511_v0 = vsel %vm1442_vm4, %v1508_v2, %v1510_v27 }
 0x1ce   : > { %v1132_v40 = vadd.f32 %v1059_v62, %v7847_v9  ;;  %v931_v39 = vpop.f32.mrb[112].mxu1  ;;  %v1380_v30 = vpop.f32.mrb[112].mxu0  ;;  %v8361_v23 = vadd.f32 %v1511_v0, %v1131_v38  ;;  %v6876_v0 = vld [vmem:[%s7110_s7 + $0x50] sm:$0xff] }
 0x1cf   : > { %v1060_v46 = vrot.slane %v931_v39, 1  ;;  %v1512_v45 = vrot.slane %v1380_v30, 2  ;;  %v6032_v50 = vpop.f32.mrb[113].mxu0  ;;  %6322 = vmatmul.mubr.msk.f32.gmra.mrb[218].mxu1 %vm251_vm2, %v6873_v56  ;;  %6444 = vmatmul.mubr.msk.f32.gmra.mrb[218].mxu0 %vm251_vm2, %v6872_v52  ;;  %v5910_v36 = vpop.f32.mrb[113].mxu1 }
 0x1d0   : > { %6324 = vmatprep.mubr.msk.f32.mxu1 %vm7013_vm1, %v7012_v1  ;;  %6446 = vmatprep.mubr.msk.f32.mxu0 %vm7013_vm1, %v7012_v1 }
 0x1d1   : > { %v1061_v9 = vsel %vm988_vm3, %v1058_v47, %v1060_v46  ;;  %v1513_v7 = vsel %vm1442_vm4, %v1510_v27, %v1512_v45  ;;  %v6875_v27 = vld [vmem:[%s7110_s7 + $0x48] sm:$0xff] }
 0x1d2   : > { %v1133_v63 = vadd.f32 %v1061_v9, %v7859_v19  ;;  %v1385_v61 = vpop.f32.mrb[114].mxu0  ;;  %v936_v2 = vpop.f32.mrb[114].mxu1  ;;  %v8373_v33 = vadd.f32 %v1513_v7, %v1132_v40  ;;  %v6878_v7 = vld [vmem:[%s7110_s7 + $0x60] sm:$0xff] }
 0x1d3   : > { %v1514_v48 = vrot.slane %v1385_v61, 2  ;;  %v6035_v55 = vpop.f32.mrb[115].mxu0  ;;  %6325 = vmatmul.mubr.msk.f32.gmra.mrb[220].mxu1 %vm251_vm2, %v6874_v57  ;;  %6447 = vmatmul.mubr.msk.f32.gmra.mrb[220].mxu0 %vm251_vm2, %v6873_v56  ;;  %v5913_v60 = vpop.f32.mrb[115].mxu1 }
 0x1d4   : > { %6327 = vmatprep.mubr.msk.f32.mxu1 %vm7013_vm1, %v7012_v1  ;;  %6449 = vmatprep.mubr.msk.f32.mxu0 %vm7013_vm1, %v7012_v1  ;;  %v6879_v55 = vld [vmem:[%s7110_s7 + $0x68] sm:$0xff] }
 0x1d5   : > { %v1515_v19 = vsel %vm1442_vm4, %v1512_v45, %v1514_v48  ;;  %v6877_v45 = vld [vmem:[%s7110_s7 + $0x58] sm:$0xff] }
 0x1d6   : > { %v8383_v38 = vadd.f32 %v1515_v19, %v1133_v63  ;;  %v1390_v5 = vpop.f32.mrb[116].mxu0  ;;  %v940_v15 = vpop.f32.mrb[116].mxu1 }
 0x1d7   : > { %v6038_v47 = vpop.f32.mrb[117].mxu0  ;;  %6328 = vmatmul.mubr.msk.f32.gmra.mrb[222].mxu1 %vm251_vm2, %v6875_v27  ;;  %6450 = vmatmul.mubr.msk.f32.gmra.mrb[222].mxu0 %vm251_vm2, %v6874_v57  ;;  %v5916_v43 = vpop.f32.mrb[117].mxu1  ;;  %v6880_v15 = vld [vmem:[%s7110_s7 + $0x70] sm:$0xff] }
 0x1d8   : > { %6330 = vmatprep.mubr.msk.f32.mxu1 %vm7013_vm1, %v7012_v1  ;;  %6452 = vmatprep.mubr.msk.f32.mxu0 %vm7013_vm1, %v7012_v1 }
 0x1da   : > { %v1394_v52 = vpop.f32.mrb[118].mxu0  ;;  %v944_v29 = vpop.f32.mrb[118].mxu1 }
 0x1db   : > { %v6041_v62 = vpop.f32.mrb[119].mxu0  ;;  %6331 = vmatmul.mubr.msk.f32.gmra.mrb[224].mxu1 %vm251_vm2, %v6876_v0  ;;  %6453 = vmatmul.mubr.msk.f32.gmra.mrb[224].mxu0 %vm251_vm2, %v6875_v27  ;;  %v5919_v40 = vpop.f32.mrb[119].mxu1 }
 0x1dc   : > { %6333 = vmatprep.mubr.msk.f32.mxu1 %vm7013_vm1, %v7012_v1  ;;  %6455 = vmatprep.mubr.msk.f32.mxu0 %vm7013_vm1, %v7012_v1 }
 0x1de   : > { %v1398_v39 = vpop.f32.mrb[120].mxu0  ;;  %v948_v30 = vpop.f32.mrb[120].mxu1 }
 0x1df   : > { %v6044_v46 = vpop.f32.mrb[121].mxu0  ;;  %6334 = vmatmul.mubr.msk.f32.gmra.mrb[226].mxu1 %vm251_vm2, %v6877_v45  ;;  %6456 = vmatmul.mubr.msk.f32.gmra.mrb[226].mxu0 %vm251_vm2, %v6876_v0  ;;  %v5922_v50 = vpop.f32.mrb[121].mxu1  ;;  %v6881_v0 = vld [vmem:[%s7110_s7 + $0x78] sm:$0xff] }
 0x1e0   : > { %6336 = vmatprep.mubr.msk.f32.mxu1 %vm7013_vm1, %v7012_v1  ;;  %6458 = vmatprep.mubr.msk.f32.mxu0 %vm7013_vm1, %v7012_v1 }
 0x1e2   : > { %v1402_v56 = vpop.f32.mrb[122].mxu0  ;;  %v1659_v36 = vpop.f32.mrb[122].mxu1 }
 0x1e3   : > { %v6047_v9 = vpop.f32.mrb[123].mxu0  ;;  %6337 = vmatmul.mubr.msk.f32.gmra.mrb[228].mxu1 %vm251_vm2, %v6878_v7  ;;  %6459 = vmatmul.mubr.msk.f32.gmra.mrb[228].mxu0 %vm251_vm2, %v6877_v45  ;;  %v6052_v63 = vpop.f32.mrb[123].mxu1 }
 0x1e4   : > { %6339 = vmatprep.mubr.msk.f32.mxu1 %vm7013_vm1, %v7012_v1  ;;  %6461 = vmatprep.mubr.msk.f32.mxu0 %vm7013_vm1, %v7012_v1 }
 0x1e6   : > { %v2112_v61 = vpop.f32.mrb[124].mxu0  ;;  %v1663_v2 = vpop.f32.mrb[124].mxu1 }
 0x1e7   : > { %v6177_v48 = vpop.f32.mrb[125].mxu0  ;;  %6340 = vmatmul.mubr.msk.f32.gmra.mrb[230].mxu1 %vm251_vm2, %v6879_v55  ;;  %6462 = vmatmul.mubr.msk.f32.gmra.mrb[230].mxu0 %vm251_vm2, %v6878_v7  ;;  %v6055_v57 = vpop.f32.mrb[125].mxu1  ;;  %v6882_v7 = vld [vmem:[%s7110_s7 + $0x80] sm:$0xff] }
 0x1e8   : > { %6342 = vmatprep.mubr.msk.f32.mxu1 %vm7013_vm1, %v7012_v1  ;;  %6464 = vmatprep.mubr.msk.f32.mxu0 %vm7013_vm1, %v7012_v1 }
 0x1ea   : > { %v2116_v60 = vpop.f32.mrb[126].mxu0  ;;  %v1667_v19 = vpop.f32.mrb[126].mxu1 }
 0x1eb   : > { %v6180_v5 = vpop.f32.mrb[127].mxu0  ;;  %6343 = vmatmul.mubr.msk.f32.gmra.mrb[232].mxu1 %vm251_vm2, %v6880_v15  ;;  %6465 = vmatmul.mubr.msk.f32.gmra.mrb[232].mxu0 %vm251_vm2, %v6879_v55  ;;  %v6058_v47 = vpop.f32.mrb[127].mxu1  ;;  %v1896_v52 = vrot.slane %v1667_v19, 2 }
 0x1ec   : > { %6345 = vmatprep.mubr.msk.f32.mxu1 %vm7013_vm1, %v7012_v1  ;;  %6467 = vmatprep.mubr.msk.f32.mxu0 %vm7013_vm1, %v7012_v1 }
 0x1ee   : > { %v1672_v27 = vpop.f32.mrb[128].mxu1  ;;  %v2120_v43 = vpop.f32.mrb[128].mxu0 }
 0x1ef   : > { %v1897_v29 = vrot.slane %v1672_v27, 2  ;;  %v6183_v62 = vpop.f32.mrb[129].mxu0  ;;  %6346 = vmatmul.mubr.msk.f32.gmra.mrb[234].mxu1 %vm251_vm2, %v6881_v0  ;;  %6468 = vmatmul.mubr.msk.f32.gmra.mrb[234].mxu0 %vm251_vm2, %v6880_v15  ;;  %v6061_v40 = vpop.f32.mrb[129].mxu1  ;;  %v2350_v50 = vrot.slane %v2120_v43, 3  ;;  %v6883_v15 = vld [vmem:[%s7110_s7 + $0x88] sm:$0xff] }
 0x1f0   : > { %6348 = vmatprep.mubr.msk.f32.mxu1 %vm7013_vm1, %v7012_v1  ;;  %6470 = vmatprep.mubr.msk.f32.mxu0 %vm7013_vm1, %v7012_v1 }
 0x1f1   : > { %v1898_v39 = vsel %vm1442_vm4, %v1896_v52, %v1897_v29 }
 0x1f2   : > { %v2005_v30 = vadd.f32 %v1898_v39, %v7950_v24  ;;  %v1677_v46 = vpop.f32.mrb[130].mxu1  ;;  %v2125_v45 = vpop.f32.mrb[130].mxu0 }
 0x1f3   : > { %v1899_v56 = vrot.slane %v1677_v46, 2  ;;  %v2351_v36 = vrot.slane %v2125_v45, 3  ;;  %v6186_v9 = vpop.f32.mrb[131].mxu0  ;;  %6349 = vmatmul.mubr.msk.f32.gmra.mrb[236].mxu1 %vm251_vm2, %v6882_v7  ;;  %6471 = vmatmul.mubr.msk.f32.gmra.mrb[236].mxu0 %vm251_vm2, %v6881_v0  ;;  %v6064_v63 = vpop.f32.mrb[131].mxu1 }
 0x1f4   : > { %6351 = vmatprep.mubr.msk.f32.mxu1 %vm7013_vm1, %v7012_v1  ;;  %6473 = vmatprep.mubr.msk.f32.mxu0 %vm7013_vm1, %v7012_v1 }
 0x1f5   : > { %v1900_v24 = vsel %vm1442_vm4, %v1897_v29, %v1899_v56  ;;  %v2352_v61 = vsel %vm2349_vm5, %v2350_v50, %v2351_v36 }
 0x1f6   : > { %v2006_v2 = vadd.f32 %v1900_v24, %v7963_v58  ;;  %v8446_v48 = vadd.f32 %v2352_v61, %v2005_v30  ;;  %v1682_v55 = vpop.f32.mrb[132].mxu1  ;;  %v2130_v57 = vpop.f32.mrb[132].mxu0  ;;  %v6884_v30 = vld [vmem:[%s7110_s7 + $0x90] sm:$0xff]  ;;  %v6885_v61 = vld [vmem:[%s7110_s7 + $0x98] sm:$0xff] }
 0x1f7   : > { %v1901_v60 = vrot.slane %v1682_v55, 2  ;;  %v2353_v19 = vrot.slane %v2130_v57, 3  ;;  %v6189_v5 = vpop.f32.mrb[133].mxu0  ;;  %6352 = vmatmul.mubr.msk.f32.gmra.mrb[238].mxu1 %vm251_vm2, %v6883_v15  ;;  %6474 = vmatmul.mubr.msk.f32.gmra.mrb[238].mxu0 %vm251_vm2, %v6882_v7  ;;  %v6067_v47 = vpop.f32.mrb[133].mxu1 }
 0x1f8   : > { %6354 = vmatprep.mubr.msk.f32.mxu1 %vm7013_vm1, %v7012_v1  ;;  %6476 = vmatprep.mubr.msk.f32.mxu0 %vm7013_vm1, %v7012_v1 }
 0x1f9   : > { %v1902_v58 = vsel %vm1442_vm4, %v1899_v56, %v1901_v60  ;;  %v2354_v27 = vsel %vm2349_vm5, %v2351_v36, %v2353_v19 }
 0x1fa   : > { %v2007_v43 = vadd.f32 %v1902_v58, %v7976_v25  ;;  %v8458_v52 = vadd.f32 %v2354_v27, %v2006_v2  ;;  %v1687_v29 = vpop.f32.mrb[134].mxu1  ;;  %v2135_v62 = vpop.f32.mrb[134].mxu0  ;;  %v6886_v27 = vld [vmem:[%s7110_s7 + $0xa0] sm:$0xff] }
 0x1fb   : > { %v1903_v0 = vrot.slane %v1687_v29, 2  ;;  %v2355_v40 = vrot.slane %v2135_v62, 3  ;;  %v6192_v39 = vpop.f32.mrb[135].mxu0  ;;  %6355 = vmatmul.mubr.msk.f32.gmra.mrb[240].mxu1 %vm251_vm2, %v6884_v30  ;;  %6477 = vmatmul.mubr.msk.f32.gmra.mrb[240].mxu0 %vm251_vm2, %v6883_v15  ;;  %v6070_v46 = vpop.f32.mrb[135].mxu1 }
 0x1fc   : > { %6357 = vmatprep.mubr.msk.f32.mxu1 %vm7013_vm1, %v7012_v1  ;;  %6479 = vmatprep.mubr.msk.f32.mxu0 %vm7013_vm1, %v7012_v1 }
 0x1fd   : > { %v1904_v25 = vsel %vm1442_vm4, %v1901_v60, %v1903_v0  ;;  %v2356_v45 = vsel %vm2349_vm5, %v2353_v19, %v2355_v40 }
 0x1fe   : > { %v2008_v50 = vadd.f32 %v1904_v25, %v7989_v51  ;;  %v8470_v56 = vadd.f32 %v2356_v45, %v2007_v43  ;;  %v1692_v36 = vpop.f32.mrb[136].mxu1  ;;  %v2140_v9 = vpop.f32.mrb[136].mxu0  ;;  %v6887_v45 = vld [vmem:[%s7110_s7 + $0xa8] sm:$0xff] }
 0x1ff   : > { %v1905_v7 = vrot.slane %v1692_v36, 2  ;;  %v2357_v63 = vrot.slane %v2140_v9, 3  ;;  %v6195_v24 = vpop.f32.mrb[137].mxu0  ;;  %6358 = vmatmul.mubr.msk.f32.gmra.mrb[242].mxu1 %vm251_vm2, %v6885_v61  ;;  %6480 = vmatmul.mubr.msk.f32.gmra.mrb[242].mxu0 %vm251_vm2, %v6884_v30  ;;  %v6073_v2 = vpop.f32.mrb[137].mxu1 }
 0x200   : > { %6360 = vmatprep.mubr.msk.f32.mxu1 %vm7013_vm1, %v7012_v1  ;;  %6482 = vmatprep.mubr.msk.f32.mxu0 %vm7013_vm1, %v7012_v1 }
 0x201   : > { %v1906_v51 = vsel %vm1442_vm4, %v1903_v0, %v1905_v7  ;;  %v2358_v55 = vsel %vm2349_vm5, %v2355_v40, %v2357_v63 }
 0x202   : > { %v2009_v57 = vadd.f32 %v1906_v51, %v8002_v17  ;;  %v8482_v60 = vadd.f32 %v2358_v55, %v2008_v50  ;;  %v1697_v19 = vpop.f32.mrb[138].mxu1  ;;  %v2145_v5 = vpop.f32.mrb[138].mxu0  ;;  %v6888_v55 = vld [vmem:[%s7110_s7 + $0xb0] sm:$0xff] }
 0x203   : > { %v1907_v15 = vrot.slane %v1697_v19, 2  ;;  %v2359_v47 = vrot.slane %v2145_v5, 3  ;;  %v6198_v58 = vpop.f32.mrb[139].mxu0  ;;  %6361 = vmatmul.mubr.msk.f32.gmra.mrb[244].mxu1 %vm251_vm2, %v6886_v27  ;;  %6483 = vmatmul.mubr.msk.f32.gmra.mrb[244].mxu0 %vm251_vm2, %v6885_v61  ;;  %v6076_v43 = vpop.f32.mrb[139].mxu1 }
 0x204   : > { %6363 = vmatprep.mubr.msk.f32.mxu1 %vm7013_vm1, %v7012_v1  ;;  %6485 = vmatprep.mubr.msk.f32.mxu0 %vm7013_vm1, %v7012_v1 }
 0x205   : > { %v1908_v17 = vsel %vm1442_vm4, %v1905_v7, %v1907_v15  ;;  %v2360_v29 = vsel %vm2349_vm5, %v2357_v63, %v2359_v47 }
 0x206   : > { %v2010_v62 = vadd.f32 %v1908_v17, %v8015_v34  ;;  %v8494_v0 = vadd.f32 %v2360_v29, %v2009_v57  ;;  %v1702_v40 = vpop.f32.mrb[140].mxu1  ;;  %v2150_v39 = vpop.f32.mrb[140].mxu0  ;;  %v6889_v29 = vld [vmem:[%s7110_s7 + $0xb8] sm:$0xff] }
 0x207   : > { %v1909_v30 = vrot.slane %v1702_v40, 2  ;;  %v2361_v46 = vrot.slane %v2150_v39, 3  ;;  %v6201_v25 = vpop.f32.mrb[141].mxu0  ;;  %6364 = vmatmul.mubr.msk.f32.gmra.mrb[246].mxu1 %vm251_vm2, %v6887_v45  ;;  %6486 = vmatmul.mubr.msk.f32.gmra.mrb[246].mxu0 %vm251_vm2, %v6886_v27  ;;  %v6079_v50 = vpop.f32.mrb[141].mxu1 }
 0x208   : > { %6366 = vmatprep.mubr.msk.f32.mxu1 %vm7013_vm1, %v7012_v1  ;;  %6488 = vmatprep.mubr.msk.f32.mxu0 %vm7013_vm1, %v7012_v1 }
 0x209   : > { %v1910_v34 = vsel %vm1442_vm4, %v1907_v15, %v1909_v30  ;;  %v2362_v36 = vsel %vm2349_vm5, %v2359_v47, %v2361_v46 }
 0x20a   : > { %v2011_v9 = vadd.f32 %v1910_v34, %v8028_v26  ;;  %v8506_v7 = vadd.f32 %v2362_v36, %v2010_v62  ;;  %v1707_v63 = vpop.f32.mrb[142].mxu1  ;;  %v2155_v24 = vpop.f32.mrb[142].mxu0  ;;  %v6890_v36 = vld [vmem:[%s7110_s7 + $0xc0] sm:$0xff] }
 0x20b   : > { %v1911_v61 = vrot.slane %v1707_v63, 2  ;;  %v2363_v2 = vrot.slane %v2155_v24, 3  ;;  %v6204_v51 = vpop.f32.mrb[143].mxu0  ;;  %6367 = vmatmul.mubr.msk.f32.gmra.mrb[248].mxu1 %vm251_vm2, %v6888_v55  ;;  %6489 = vmatmul.mubr.msk.f32.gmra.mrb[248].mxu0 %vm251_vm2, %v6887_v45  ;;  %v6082_v57 = vpop.f32.mrb[143].mxu1 }
 0x20c   : > { %6369 = vmatprep.mubr.msk.f32.mxu1 %vm7013_vm1, %v7012_v1  ;;  %6491 = vmatprep.mubr.msk.f32.mxu0 %vm7013_vm1, %v7012_v1 }
 0x20d   : > { %v1912_v26 = vsel %vm1442_vm4, %v1909_v30, %v1911_v61  ;;  %v2364_v19 = vsel %vm2349_vm5, %v2361_v46, %v2363_v2 }
 0x20e   : > { %v2012_v5 = vadd.f32 %v1912_v26, %v8041_v3  ;;  %v8518_v15 = vadd.f32 %v2364_v19, %v2011_v9  ;;  %v1712_v47 = vpop.f32.mrb[144].mxu1  ;;  %v2160_v58 = vpop.f32.mrb[144].mxu0  ;;  %v6891_v19 = vld [vmem:[%s7110_s7 + $0xc8] sm:$0xff] }
 0x20f   : > { %v1913_v27 = vrot.slane %v1712_v47, 2  ;;  %v2365_v43 = vrot.slane %v2160_v58, 3  ;;  %v6207_v17 = vpop.f32.mrb[145].mxu0  ;;  %6370 = vmatmul.mubr.msk.f32.gmra.mrb[250].mxu1 %vm251_vm2, %v6889_v29  ;;  %6492 = vmatmul.mubr.msk.f32.gmra.mrb[250].mxu0 %vm251_vm2, %v6888_v55  ;;  %v6085_v62 = vpop.f32.mrb[145].mxu1 }
 0x210   : > { %6372 = vmatprep.mubr.msk.f32.mxu1 %vm7013_vm1, %v7012_v1  ;;  %6494 = vmatprep.mubr.msk.f32.mxu0 %vm7013_vm1, %v7012_v1 }
 0x211   : > { %v1914_v3 = vsel %vm1442_vm4, %v1911_v61, %v1913_v27  ;;  %v2366_v40 = vsel %vm2349_vm5, %v2363_v2, %v2365_v43 }
 0x212   : > { %v2013_v39 = vadd.f32 %v1914_v3, %v8053_v59  ;;  %v8530_v30 = vadd.f32 %v2366_v40, %v2012_v5  ;;  %v1717_v46 = vpop.f32.mrb[146].mxu1  ;;  %v2165_v25 = vpop.f32.mrb[146].mxu0  ;;  %v6892_v40 = vld [vmem:[%s7110_s7 + $0xd0] sm:$0xff] }
 0x213   : > { %v1915_v45 = vrot.slane %v1717_v46, 2  ;;  %v2367_v50 = vrot.slane %v2165_v25, 3  ;;  %v6210_v34 = vpop.f32.mrb[147].mxu0  ;;  %6373 = vmatmul.mubr.msk.f32.gmra.mrb[252].mxu1 %vm251_vm2, %v6890_v36  ;;  %6495 = vmatmul.mubr.msk.f32.gmra.mrb[252].mxu0 %vm251_vm2, %v6889_v29  ;;  %v6088_v9 = vpop.f32.mrb[147].mxu1 }
 0x214   : > { %6375 = vmatprep.mubr.msk.f32.mxu1 %vm7013_vm1, %v7012_v1  ;;  %6497 = vmatprep.mubr.msk.f32.mxu0 %vm7013_vm1, %v7012_v1 }
 0x215   : > { %v1916_v59 = vsel %vm1442_vm4, %v1913_v27, %v1915_v45  ;;  %v2368_v63 = vsel %vm2349_vm5, %v2365_v43, %v2367_v50 }
 0x216   : > { %v2014_v24 = vadd.f32 %v1916_v59, %v8065_v42  ;;  %v8542_v61 = vadd.f32 %v2368_v63, %v2013_v39  ;;  %v1722_v2 = vpop.f32.mrb[148].mxu1  ;;  %v2170_v51 = vpop.f32.mrb[148].mxu0  ;;  %v6893_v63 = vld [vmem:[%s7110_s7 + $0xd8] sm:$0xff] }
 0x217   : > { %v1917_v55 = vrot.slane %v1722_v2, 2  ;;  %v2369_v57 = vrot.slane %v2170_v51, 3  ;;  %v6213_v26 = vpop.f32.mrb[149].mxu0  ;;  %6376 = vmatmul.mubr.msk.f32.gmra.mrb[254].mxu1 %vm251_vm2, %v6891_v19  ;;  %6498 = vmatmul.mubr.msk.f32.gmra.mrb[254].mxu0 %vm251_vm2, %v6890_v36  ;;  %v6091_v5 = vpop.f32.mrb[149].mxu1 }
 0x218   : > { %6378 = vmatprep.mubr.msk.f32.mxu1 %vm7013_vm1, %v7012_v1  ;;  %6500 = vmatprep.mubr.msk.f32.mxu0 %vm7013_vm1, %v7012_v1 }
 0x219   : > { %v1918_v42 = vsel %vm1442_vm4, %v1915_v45, %v1917_v55  ;;  %v2370_v47 = vsel %vm2349_vm5, %v2367_v50, %v2369_v57 }
 0x21a   : > { %v2015_v58 = vadd.f32 %v1918_v42, %v8077_v44  ;;  %v8554_v27 = vadd.f32 %v2370_v47, %v2014_v24  ;;  %v1727_v43 = vpop.f32.mrb[150].mxu1  ;;  %v2175_v17 = vpop.f32.mrb[150].mxu0  ;;  %v6894_v47 = vld [vmem:[%s7110_s7 + $0xe0] sm:$0xff] }
 0x21b   : > { %v1919_v29 = vrot.slane %v1727_v43, 2  ;;  %v2371_v62 = vrot.slane %v2175_v17, 3  ;;  %v6216_v3 = vpop.f32.mrb[151].mxu0  ;;  %6379 = vmatmul.mubr.msk.f32.gmra.mrb[0].mxu1 %vm251_vm2, %v6892_v40  ;;  %6501 = vmatmul.mubr.msk.f32.gmra.mrb[0].mxu0 %vm251_vm2, %v6891_v19  ;;  %v6094_v39 = vpop.f32.mrb[151].mxu1 }
 0x21c   : > { %6381 = vmatprep.mubr.msk.f32.mxu1 %vm7013_vm1, %v7012_v1  ;;  %6503 = vmatprep.mubr.msk.f32.mxu0 %vm7013_vm1, %v7012_v1 }
 0x21d   : > { %v1920_v44 = vsel %vm1442_vm4, %v1917_v55, %v1919_v29  ;;  %v2372_v46 = vsel %vm2349_vm5, %v2369_v57, %v2371_v62 }
 0x21e   : > { %v2016_v25 = vadd.f32 %v1920_v44, %v8089_v13  ;;  %v8566_v45 = vadd.f32 %v2372_v46, %v2015_v58  ;;  %v1732_v50 = vpop.f32.mrb[152].mxu1  ;;  %v2180_v34 = vpop.f32.mrb[152].mxu0  ;;  %v6895_v46 = vld [vmem:[%s7110_s7 + $0xe8] sm:$0xff] }
 0x21f   : > { %v1921_v36 = vrot.slane %v1732_v50, 2  ;;  %v2373_v9 = vrot.slane %v2180_v34, 3  ;;  %v6219_v59 = vpop.f32.mrb[153].mxu0  ;;  %6382 = vmatmul.mubr.msk.f32.gmra.mrb[2].mxu1 %vm251_vm2, %v6893_v63  ;;  %6504 = vmatmul.mubr.msk.f32.gmra.mrb[2].mxu0 %vm251_vm2, %v6892_v40  ;;  %v6097_v24 = vpop.f32.mrb[153].mxu1 }
 0x220   : > { %6384 = vmatprep.mubr.msk.f32.mxu1 %vm7013_vm1, %v7012_v1  ;;  %6506 = vmatprep.mubr.msk.f32.mxu0 %vm7013_vm1, %v7012_v1 }
 0x221   : > { %v1922_v13 = vsel %vm1442_vm4, %v1919_v29, %v1921_v36  ;;  %v2374_v2 = vsel %vm2349_vm5, %v2371_v62, %v2373_v9 }
 0x222   : > { %v2017_v51 = vadd.f32 %v1922_v13, %v8101_v21  ;;  %v8578_v55 = vadd.f32 %v2374_v2, %v2016_v25  ;;  %v1737_v57 = vpop.f32.mrb[154].mxu1  ;;  %v2185_v26 = vpop.f32.mrb[154].mxu0  ;;  %v6896_v2 = vld [vmem:[%s7110_s7 + $0xf0] sm:$0xff] }
 0x223   : > { %v1923_v19 = vrot.slane %v1737_v57, 2  ;;  %v2375_v5 = vrot.slane %v2185_v26, 3  ;;  %v6222_v42 = vpop.f32.mrb[155].mxu0  ;;  %6385 = vmatmul.mubr.msk.f32.gmra.mrb[4].mxu1 %vm251_vm2, %v6894_v47  ;;  %6507 = vmatmul.mubr.msk.f32.gmra.mrb[4].mxu0 %vm251_vm2, %v6893_v63  ;;  %v6100_v58 = vpop.f32.mrb[155].mxu1 }
 0x224   : > { %6387 = vmatprep.mubr.msk.f32.mxu1 %vm7013_vm1, %v7012_v1  ;;  %6509 = vmatprep.mubr.msk.f32.mxu0 %vm7013_vm1, %v7012_v1 }
 0x225   : > { %v1924_v21 = vsel %vm1442_vm4, %v1921_v36, %v1923_v19  ;;  %v2376_v43 = vsel %vm2349_vm5, %v2373_v9, %v2375_v5 }
 0x226   : > { %v2018_v17 = vadd.f32 %v1924_v21, %v8113_v31  ;;  %v8590_v29 = vadd.f32 %v2376_v43, %v2017_v51  ;;  %v1742_v62 = vpop.f32.mrb[156].mxu1  ;;  %v2190_v3 = vpop.f32.mrb[156].mxu0  ;;  %v6897_v43 = vld [vmem:[%s7110_s7 + $0xf8] sm:$0xff] }
 0x227   : > { %v1925_v40 = vrot.slane %v1742_v62, 2  ;;  %v2377_v39 = vrot.slane %v2190_v3, 3  ;;  %v6225_v44 = vpop.f32.mrb[157].mxu0  ;;  %6388 = vmatmul.mubr.msk.f32.gmra.mrb[6].mxu1 %vm251_vm2, %v6895_v46  ;;  %6510 = vmatmul.mubr.msk.f32.gmra.mrb[6].mxu0 %vm251_vm2, %v6894_v47  ;;  %v6103_v25 = vpop.f32.mrb[157].mxu1 }
 0x228   : > { %6390 = vmatprep.mubr.msk.f32.mxu1 %vm7013_vm1, %v7012_v1  ;;  %6512 = vmatprep.mubr.msk.f32.mxu0 %vm7013_vm1, %v7012_v1 }
 0x229   : > { %v1926_v31 = vsel %vm1442_vm4, %v1923_v19, %v1925_v40  ;;  %v2378_v50 = vsel %vm2349_vm5, %v2375_v5, %v2377_v39 }
 0x22a   : > { %v2019_v34 = vadd.f32 %v1926_v31, %v8125_v41  ;;  %v8602_v36 = vadd.f32 %v2378_v50, %v2018_v17  ;;  %v1747_v9 = vpop.f32.mrb[158].mxu1  ;;  %v2195_v59 = vpop.f32.mrb[158].mxu0  ;;  %v6898_v50 = vld [vmem:[%s7110_s7 + $0x100] sm:$0xff] }
 0x22b   : > { %v1927_v63 = vrot.slane %v1747_v9, 2  ;;  %v2379_v24 = vrot.slane %v2195_v59, 3  ;;  %v6228_v13 = vpop.f32.mrb[159].mxu0  ;;  %6391 = vmatmul.mubr.msk.f32.gmra.mrb[8].mxu1 %vm251_vm2, %v6896_v2  ;;  %6513 = vmatmul.mubr.msk.f32.gmra.mrb[8].mxu0 %vm251_vm2, %v6895_v46  ;;  %v6106_v51 = vpop.f32.mrb[159].mxu1 }
 0x22c   : > { %6393 = vmatprep.mubr.msk.f32.mxu1 %vm7013_vm1, %v7012_v1  ;;  %6515 = vmatprep.mubr.msk.f32.mxu0 %vm7013_vm1, %v7012_v1 }
 0x22d   : > { %v1928_v41 = vsel %vm1442_vm4, %v1925_v40, %v1927_v63  ;;  %v2380_v57 = vsel %vm2349_vm5, %v2377_v39, %v2379_v24 }
 0x22e   : > { %v2020_v26 = vadd.f32 %v1928_v41, %v8137_v49  ;;  %v8614_v19 = vadd.f32 %v2380_v57, %v2019_v34  ;;  %v1752_v5 = vpop.f32.mrb[160].mxu1  ;;  %v2200_v42 = vpop.f32.mrb[160].mxu0  ;;  %v6899_v57 = vld [vmem:[%s7110_s7 + $0x108] sm:$0xff] }
 0x22f   : > { %v1929_v47 = vrot.slane %v1752_v5, 2  ;;  %v2381_v58 = vrot.slane %v2200_v42, 3  ;;  %v6231_v21 = vpop.f32.mrb[161].mxu0  ;;  %6394 = vmatmul.mubr.msk.f32.gmra.mrb[10].mxu1 %vm251_vm2, %v6897_v43  ;;  %6516 = vmatmul.mubr.msk.f32.gmra.mrb[10].mxu0 %vm251_vm2, %v6896_v2  ;;  %v6109_v17 = vpop.f32.mrb[161].mxu1 }
 0x230   : > { %6396 = vmatprep.mubr.msk.f32.mxu1 %vm7013_vm1, %v7012_v1  ;;  %6518 = vmatprep.mubr.msk.f32.mxu0 %vm7013_vm1, %v7012_v1 }
 0x231   : > { %v1930_v49 = vsel %vm1442_vm4, %v1927_v63, %v1929_v47  ;;  %v2382_v62 = vsel %vm2349_vm5, %v2379_v24, %v2381_v58 }
 0x232   : > { %v2021_v3 = vadd.f32 %v1930_v49, %v8149_v54  ;;  %v8626_v40 = vadd.f32 %v2382_v62, %v2020_v26  ;;  %v1757_v39 = vpop.f32.mrb[162].mxu1  ;;  %v2205_v44 = vpop.f32.mrb[162].mxu0  ;;  %v6900_v62 = vld [vmem:[%s7110_s7 + $0x110] sm:$0xff] }
 0x233   : > { %v1931_v46 = vrot.slane %v1757_v39, 2  ;;  %v2383_v25 = vrot.slane %v2205_v44, 3  ;;  %v6234_v31 = vpop.f32.mrb[163].mxu0  ;;  %6397 = vmatmul.mubr.msk.f32.gmra.mrb[12].mxu1 %vm251_vm2, %v6898_v50  ;;  %6519 = vmatmul.mubr.msk.f32.gmra.mrb[12].mxu0 %vm251_vm2, %v6897_v43  ;;  %v6112_v34 = vpop.f32.mrb[163].mxu1 }
 0x234   : > { %6399 = vmatprep.mubr.msk.f32.mxu1 %vm7013_vm1, %v7012_v1  ;;  %6521 = vmatprep.mubr.msk.f32.mxu0 %vm7013_vm1, %v7012_v1 }
 0x235   : > { %v1932_v54 = vsel %vm1442_vm4, %v1929_v47, %v1931_v46  ;;  %v2384_v9 = vsel %vm2349_vm5, %v2381_v58, %v2383_v25 }
 0x236   : > { %v2022_v59 = vadd.f32 %v1932_v54, %v8161_v6  ;;  %v8638_v63 = vadd.f32 %v2384_v9, %v2021_v3  ;;  %v1762_v24 = vpop.f32.mrb[164].mxu1  ;;  %v2210_v13 = vpop.f32.mrb[164].mxu0  ;;  %v6901_v9 = vld [vmem:[%s7110_s7 + $0x118] sm:$0xff] }
 0x237   : > { %v1933_v2 = vrot.slane %v1762_v24, 2  ;;  %v2385_v51 = vrot.slane %v2210_v13, 3  ;;  %v6237_v41 = vpop.f32.mrb[165].mxu0  ;;  %6400 = vmatmul.mubr.msk.f32.gmra.mrb[14].mxu1 %vm251_vm2, %v6899_v57  ;;  %6522 = vmatmul.mubr.msk.f32.gmra.mrb[14].mxu0 %vm251_vm2, %v6898_v50  ;;  %v6115_v26 = vpop.f32.mrb[165].mxu1 }
 0x238   : > { %6402 = vmatprep.mubr.msk.f32.mxu1 %vm7013_vm1, %v7012_v1  ;;  %6524 = vmatprep.mubr.msk.f32.mxu0 %vm7013_vm1, %v7012_v1 }
 0x239   : > { %v1934_v6 = vsel %vm1442_vm4, %v1931_v46, %v1933_v2  ;;  %v2386_v5 = vsel %vm2349_vm5, %v2383_v25, %v2385_v51 }
 0x23a   : > { %v2023_v42 = vadd.f32 %v1934_v6, %v8173_v8  ;;  %v8650_v47 = vadd.f32 %v2386_v5, %v2022_v59  ;;  %v1767_v58 = vpop.f32.mrb[166].mxu1  ;;  %v2215_v21 = vpop.f32.mrb[166].mxu0  ;;  %v6902_v5 = vld [vmem:[%s7110_s7 + $0x120] sm:$0xff] }
 0x23b   : > { %v1935_v43 = vrot.slane %v1767_v58, 2  ;;  %v2387_v17 = vrot.slane %v2215_v21, 3  ;;  %v6240_v49 = vpop.f32.mrb[167].mxu0  ;;  %6403 = vmatmul.mubr.msk.f32.gmra.mrb[16].mxu1 %vm251_vm2, %v6900_v62  ;;  %6525 = vmatmul.mubr.msk.f32.gmra.mrb[16].mxu0 %vm251_vm2, %v6899_v57  ;;  %v6118_v3 = vpop.f32.mrb[167].mxu1 }
 0x23c   : > { %6405 = vmatprep.mubr.msk.f32.mxu1 %vm7013_vm1, %v7012_v1  ;;  %6527 = vmatprep.mubr.msk.f32.mxu0 %vm7013_vm1, %v7012_v1 }
 0x23d   : > { %v1936_v8 = vsel %vm1442_vm4, %v1933_v2, %v1935_v43  ;;  %v2388_v39 = vsel %vm2349_vm5, %v2385_v51, %v2387_v17 }
 0x23e   : > { %v2024_v44 = vadd.f32 %v1936_v8, %v8185_v10  ;;  %v8662_v46 = vadd.f32 %v2388_v39, %v2023_v42  ;;  %v1772_v25 = vpop.f32.mrb[168].mxu1  ;;  %v2220_v31 = vpop.f32.mrb[168].mxu0  ;;  %v6903_v39 = vld [vmem:[%s7110_s7 + $0x128] sm:$0xff] }
 0x23f   : > { %v1937_v50 = vrot.slane %v1772_v25, 2  ;;  %v2389_v34 = vrot.slane %v2220_v31, 3  ;;  %v6243_v54 = vpop.f32.mrb[169].mxu0  ;;  %6406 = vmatmul.mubr.msk.f32.gmra.mrb[18].mxu1 %vm251_vm2, %v6901_v9  ;;  %6528 = vmatmul.mubr.msk.f32.gmra.mrb[18].mxu0 %vm251_vm2, %v6900_v62  ;;  %v6121_v59 = vpop.f32.mrb[169].mxu1  ;;  %v4346_v25 = vld [vmem:[%s9670_s2] sm:$0xff] }
 0x240   : > { %6408 = vmatprep.mubr.msk.f32.mxu1 %vm7013_vm1, %v7012_v1  ;;  %6530 = vmatprep.mubr.msk.f32.mxu0 %vm7013_vm1, %v7012_v1 }
 0x241   : > { %v1938_v10 = vsel %vm1442_vm4, %v1935_v43, %v1937_v50  ;;  %v2390_v24 = vsel %vm2349_vm5, %v2387_v17, %v2389_v34 }
 0x242   : > { %v2025_v13 = vadd.f32 %v1938_v10, %v8197_v12  ;;  %v8674_v2 = vadd.f32 %v2390_v24, %v2024_v44  ;;  %v1777_v51 = vpop.f32.mrb[170].mxu1  ;;  %v2225_v41 = vpop.f32.mrb[170].mxu0 }
 0x243   : > { %v1939_v57 = vrot.slane %v1777_v51, 2  ;;  %v2391_v26 = vrot.slane %v2225_v41, 3  ;;  %v6246_v6 = vpop.f32.mrb[171].mxu0  ;;  %6409 = vmatmul.mubr.msk.f32.gmra.mrb[20].mxu1 %vm251_vm2, %v6902_v5  ;;  %6531 = vmatmul.mubr.msk.f32.gmra.mrb[20].mxu0 %vm251_vm2, %v6901_v9  ;;  %v6124_v42 = vpop.f32.mrb[171].mxu1  ;;  %v6904_v51 = vld [vmem:[%s7110_s7 + $0x130] sm:$0xff] }
 0x244   : > { %6411 = vmatprep.mubr.msk.f32.mxu1 %vm7013_vm1, %v7012_v1  ;;  %6533 = vmatprep.mubr.msk.f32.mxu0 %vm7013_vm1, %v7012_v1 }
 0x245   : > { %v1940_v12 = vsel %vm1442_vm4, %v1937_v50, %v1939_v57  ;;  %v2392_v58 = vsel %vm2349_vm5, %v2389_v34, %v2391_v26  ;;  %v7014_v50 = vmov 0  }
 0x246   : > { %v2026_v21 = vadd.f32 %v1940_v12, %v8209_v14  ;;  %v8686_v43 = vadd.f32 %v2392_v58, %v2025_v13  ;;  %v1782_v17 = vpop.f32.mrb[172].mxu1  ;;  %v2230_v49 = vpop.f32.mrb[172].mxu0  ;;  %6844 = vset.pattern.permute.xlu0 %v7014_v50  ;;  %6845 = vset.pattern.permute.xlu1 %v7014_v50 }
 0x247   : > { %v1941_v62 = vrot.slane %v1782_v17, 2  ;;  %v2393_v3 = vrot.slane %v2230_v49, 3  ;;  %v6249_v8 = vpop.f32.mrb[173].mxu0  ;;  %6412 = vmatmul.mubr.msk.f32.gmra.mrb[22].mxu1 %vm251_vm2, %v6903_v39  ;;  %6534 = vmatmul.mubr.msk.f32.gmra.mrb[22].mxu0 %vm251_vm2, %v6902_v5  ;;  %v6127_v44 = vpop.f32.mrb[173].mxu1 }
 0x248   : > { %6414 = vmatprep.mubr.msk.f32.mxu1 %vm7013_vm1, %v7012_v1  ;;  %6536 = vmatprep.mubr.msk.f32.mxu0 %vm7013_vm1, %v7012_v1  ;;  %v6905_v8 = vld [vmem:[%s7110_s7 + $0x138] sm:$0xff] }
 0x249   : > { %v1942_v14 = vsel %vm1442_vm4, %v1939_v57, %v1941_v62  ;;  %v2394_v31 = vsel %vm2349_vm5, %v2391_v26, %v2393_v3  ;;  %4384 = vperm.xlu0 %6844, %v4346_v25   ;;  %v4348_v57 = vld [vmem:[%s9670_s2 + $0x10] sm:$0xff] }
 0x24a   : > { %v2027_v34 = vadd.f32 %v1942_v14, %v8221_v16  ;;  %v8701_v54 = vadd.f32 %v2394_v31, %v2026_v21  ;;  %v1787_v9 = vpop.f32.mrb[174].mxu1  ;;  %v2235_v59 = vpop.f32.mrb[174].mxu0  ;;  %v4347_v16 = vld [vmem:[%s9670_s2 + $0x8] sm:$0xff]  ;;  %4394 = vperm.xlu1 %6845, %v4348_v57  }
 0x24b   : > { %v1943_v10 = vrot.slane %v1787_v9, 2  ;;  %v2395_v24 = vrot.slane %v2235_v59, 3  ;;  %v6252_v13 = vpop.f32.mrb[175].mxu0  ;;  %6415 = vmatmul.mubr.msk.f32.gmra.mrb[24].mxu1 %vm251_vm2, %v6904_v51  ;;  %6537 = vmatmul.mubr.msk.f32.gmra.mrb[24].mxu0 %vm251_vm2, %v6903_v39  ;;  %v6130_v41 = vpop.f32.mrb[175].mxu1 }
 0x24c   : > { %6417 = vmatprep.mubr.msk.f32.mxu1 %vm7013_vm1, %v7012_v1  ;;  %6539 = vmatprep.mubr.msk.f32.mxu0 %vm7013_vm1, %v7012_v1  ;;  %v6906_v13 = vld [vmem:[%s7110_s7 + $0x140] sm:$0x3f] }
 0x24d   : > { %v1944_v26 = vsel %vm1442_vm4, %v1941_v62, %v1943_v10  ;;  %v2396_v6 = vsel %vm2349_vm5, %v2393_v3, %v2395_v24  ;;  %4389 = vperm.xlu0 %6844, %v4347_v16   ;;  %v4349_v62 = vld [vmem:[%s9670_s2 + $0x18] sm:$0xff] }
 0x24e   : > { %v2028_v5 = vadd.f32 %v1944_v26, %v8233_v18  ;;  %v8719_v42 = vadd.f32 %v2396_v6, %v2027_v34  ;;  %v1792_v12 = vpop.f32.mrb[176].mxu1  ;;  %v2240_v58 = vpop.f32.mrb[176].mxu0  ;;  %v4350_v18 = vld [vmem:[%s9670_s2 + $0x20] sm:$0xff]  ;;  %4399 = vperm.xlu1 %6845, %v4349_v62  }
 0x24f   : > { %v1945_v21 = vrot.slane %v1792_v12, 2  ;;  %v2397_v17 = vrot.slane %v2240_v58, 3  ;;  %v6255_v49 = vpop.f32.mrb[177].mxu0  ;;  %6418 = vmatmul.mubr.msk.f32.gmra.mrb[26].mxu1 %vm251_vm2, %v6905_v8  ;;  %6540 = vmatmul.mubr.msk.f32.gmra.mrb[26].mxu0 %vm251_vm2, %v6904_v51  ;;  %v6133_v39 = vpop.f32.mrb[177].mxu1 }
 0x250   : > { %6420 = vmatprep.mubr.msk.f32.mxu1 %vm7013_vm1, %v7012_v1  ;;  %6542 = vmatprep.mubr.msk.f32.mxu0 %vm7013_vm1, %v7012_v1  ;;  %v6907_v49 = vld [vmem:[%s7110_s7] sm:$0xff] }
 0x251   : > { %v1946_v3 = vsel %vm1442_vm4, %v1943_v10, %v1945_v21  ;;  %v2398_v44 = vsel %vm2349_vm5, %v2395_v24, %v2397_v17  ;;  %4404 = vperm.xlu0 %6844, %v4350_v18   ;;  %v4351_v10 = vld [vmem:[%s9670_s2 + $0x28] sm:$0xff] }
 0x252   : > { %v2029_v25 = vadd.f32 %v1946_v3, %v8245_v20  ;;  %v8737_v14 = vadd.f32 %v2398_v44, %v2028_v5  ;;  %v1797_v31 = vpop.f32.mrb[178].mxu1  ;;  %v2245_v50 = vpop.f32.mrb[178].mxu0  ;;  %v4352_v20 = vld [vmem:[%s9670_s2 + $0x30] sm:$0xff]  ;;  %4409 = vperm.xlu1 %6845, %v4351_v10  }
 0x253   : > { %v1947_v34 = vrot.slane %v1797_v31, 2  ;;  %v2399_v9 = vrot.slane %v2245_v50, 3  ;;  %v6258_v59 = vpop.f32.mrb[179].mxu0  ;;  %6421 = vmatmul.mubr.msk.f32.gmra.mrb[28].mxu1 %vm251_vm2, %v6906_v13  ;;  %6543 = vmatmul.mubr.msk.f32.gmra.mrb[28].mxu0 %vm251_vm2, %v6905_v8  ;;  %v6136_v51 = vpop.f32.mrb[179].mxu1 }
 0x254   : > { %6545 = vmatprep.mubr.msk.f32.mxu0 %vm7013_vm1, %v7012_v1  ;;  %6550 = vmatprep.mubr.msk.f32.mxu1 %vm7013_vm1, %v7012_v1  ;;  %v6908_v59 = vld [vmem:[%s7110_s7 + $0x8] sm:$0xff] }
 0x255   : > { %v1948_v24 = vsel %vm1442_vm4, %v1945_v21, %v1947_v34  ;;  %v2400_v41 = vsel %vm2349_vm5, %v2397_v17, %v2399_v9  ;;  %4414 = vperm.xlu0 %6844, %v4352_v20   ;;  %v4353_v21 = vld [vmem:[%s9670_s2 + $0x38] sm:$0xff] }
 0x256   : > { %v2030_v57 = vadd.f32 %v1948_v24, %v8257_v22  ;;  %v8755_v16 = vadd.f32 %v2400_v41, %v2029_v25  ;;  %v1802_v26 = vpop.f32.mrb[180].mxu1  ;;  %v2250_v6 = vpop.f32.mrb[180].mxu0  ;;  %v4354_v22 = vld [vmem:[%s9670_s2 + $0x40] sm:$0xff]  ;;  %4419 = vperm.xlu1 %6845, %v4353_v21  }
 0x257   : > { %v1949_v5 = vrot.slane %v1802_v26, 2  ;;  %v2401_v12 = vrot.slane %v2250_v6, 3  ;;  %v6261_v58 = vpop.f32.mrb[181].mxu0  ;;  %6546 = vmatmul.mubr.msk.f32.gmra.mrb[30].mxu0 %vm251_vm2, %v6906_v13  ;;  %6551 = vmatmul.mubr.msk.f32.vlgmr.msra.gmra.mrb[30].mxu1 %vm251_vm2, %v6907_v49  ;;  %v6139_v8 = vpop.f32.mrb[181].mxu1 }
 0x258   : > { %6553 = vmatprep.mubr.msk.f32.mxu1 %vm7013_vm1, %v7012_v1  ;;  %6675 = vmatprep.mubr.msk.f32.mxu0 %vm7013_vm1, %v7012_v1  ;;  %v6909_v58 = vld [vmem:[%s7110_s7 + $0x10] sm:$0xff] }
 0x259   : > { %v1950_v17 = vsel %vm1442_vm4, %v1947_v34, %v1949_v5  ;;  %v2402_v39 = vsel %vm2349_vm5, %v2399_v9, %v2401_v12  ;;  %4424 = vperm.xlu0 %6844, %v4354_v22   ;;  %v4355_v34 = vld [vmem:[%s9670_s2 + $0x48] sm:$0xff] }
 0x25a   : > { %v2031_v62 = vadd.f32 %v1950_v17, %v8272_v32  ;;  %v8773_v18 = vadd.f32 %v2402_v39, %v2030_v57  ;;  %v1807_v3 = vpop.f32.mrb[182].mxu1  ;;  %v2255_v44 = vpop.f32.mrb[182].mxu0  ;;  %v4356_v32 = vld [vmem:[%s9670_s2 + $0x50] sm:$0xff]  ;;  %4429 = vperm.xlu1 %6845, %v4355_v34  }
 0x25b   : > { %v1951_v25 = vrot.slane %v1807_v3, 2  ;;  %v2403_v31 = vrot.slane %v2255_v44, 3  ;;  %v6264_v50 = vpop.f32.mrb[183].mxu0  ;;  %6554 = vmatmul.mubr.msk.f32.gmra.mrb[32].mxu1 %vm251_vm2, %v6908_v59  ;;  %6676 = vmatmul.mubr.msk.f32.vlgmr.msra.gmra.mrb[32].mxu0 %vm251_vm2, %v6907_v49  ;;  %v6142_v13 = vpop.f32.mrb[183].mxu1 }
 0x25c   : > { %6556 = vmatprep.mubr.msk.f32.mxu1 %vm7013_vm1, %v7012_v1  ;;  %6678 = vmatprep.mubr.msk.f32.mxu0 %vm7013_vm1, %v7012_v1  ;;  %v6910_v50 = vld [vmem:[%s7110_s7 + $0x18] sm:$0xff] }
 0x25d   : > { %v1952_v9 = vsel %vm1442_vm4, %v1949_v5, %v1951_v25  ;;  %v2404_v51 = vsel %vm2349_vm5, %v2401_v12, %v2403_v31  ;;  %4434 = vperm.xlu0 %6844, %v4356_v32   ;;  %v4357_v5 = vld [vmem:[%s9670_s2 + $0x58] sm:$0xff] }
 0x25e   : > { %v2032_v10 = vadd.f32 %v1952_v9, %v8288_v35  ;;  %v8791_v20 = vadd.f32 %v2404_v51, %v2031_v62  ;;  %v1812_v24 = vpop.f32.mrb[184].mxu1  ;;  %v2260_v41 = vpop.f32.mrb[184].mxu0  ;;  %v4358_v35 = vld [vmem:[%s9670_s2 + $0x60] sm:$0xff]  ;;  %4439 = vperm.xlu1 %6845, %v4357_v5  }
 0x25f   : > { %v1953_v57 = vrot.slane %v1812_v24, 2  ;;  %v2405_v26 = vrot.slane %v2260_v41, 3  ;;  %v6267_v6 = vpop.f32.mrb[185].mxu0  ;;  %6557 = vmatmul.mubr.msk.f32.gmra.mrb[34].mxu1 %vm251_vm2, %v6909_v58  ;;  %6679 = vmatmul.mubr.msk.f32.gmra.mrb[34].mxu0 %vm251_vm2, %v6908_v59  ;;  %v6145_v49 = vpop.f32.mrb[185].mxu1 }
 0x260   : > { %6559 = vmatprep.mubr.msk.f32.mxu1 %vm7013_vm1, %v7012_v1  ;;  %6681 = vmatprep.mubr.msk.f32.mxu0 %vm7013_vm1, %v7012_v1  ;;  %v6911_v6 = vld [vmem:[%s7110_s7 + $0x20] sm:$0xff] }
 0x261   : > { %v1954_v12 = vsel %vm1442_vm4, %v1951_v25, %v1953_v57  ;;  %v2406_v8 = vsel %vm2349_vm5, %v2403_v31, %v2405_v26  ;;  %4444 = vperm.xlu0 %6844, %v4358_v35   ;;  %v4359_v25 = vld [vmem:[%s9670_s2 + $0x68] sm:$0xff] }
 0x262   : > { %v2033_v21 = vadd.f32 %v1954_v12, %v8301_v53  ;;  %v8809_v22 = vadd.f32 %v2406_v8, %v2032_v10  ;;  %v1817_v17 = vpop.f32.mrb[186].mxu1  ;;  %v2265_v39 = vpop.f32.mrb[186].mxu0  ;;  %v4360_v53 = vld [vmem:[%s9670_s2 + $0x70] sm:$0xff]  ;;  %4449 = vperm.xlu1 %6845, %v4359_v25  }
 0x263   : > { %v1955_v62 = vrot.slane %v1817_v17, 2  ;;  %v2407_v3 = vrot.slane %v2265_v39, 3  ;;  %v6270_v44 = vpop.f32.mrb[187].mxu0  ;;  %6560 = vmatmul.mubr.msk.f32.gmra.mrb[36].mxu1 %vm251_vm2, %v6910_v50  ;;  %6682 = vmatmul.mubr.msk.f32.gmra.mrb[36].mxu0 %vm251_vm2, %v6909_v58  ;;  %v6148_v59 = vpop.f32.mrb[187].mxu1 }
 0x264   : > { %6562 = vmatprep.mubr.msk.f32.mxu1 %vm7013_vm1, %v7012_v1  ;;  %6684 = vmatprep.mubr.msk.f32.mxu0 %vm7013_vm1, %v7012_v1  ;;  %v6912_v44 = vld [vmem:[%s7110_s7 + $0x28] sm:$0xff] }
 0x265   : > { %v1956_v31 = vsel %vm1442_vm4, %v1953_v57, %v1955_v62  ;;  %v2408_v13 = vsel %vm2349_vm5, %v2405_v26, %v2407_v3  ;;  %4454 = vperm.xlu0 %6844, %v4360_v53   ;;  %v4361_v57 = vld [vmem:[%s9670_s2 + $0x78] sm:$0xff] }
 0x266   : > { %v2034_v34 = vadd.f32 %v1956_v31, %v8313_v11  ;;  %v8827_v32 = vadd.f32 %v2408_v13, %v2033_v21  ;;  %v1822_v9 = vpop.f32.mrb[188].mxu1  ;;  %v2270_v51 = vpop.f32.mrb[188].mxu0  ;;  %v4362_v11 = vld [vmem:[%s9670_s2 + $0x80] sm:$0xff]  ;;  %4459 = vperm.xlu1 %6845, %v4361_v57  }
 0x267   : > { %v1957_v10 = vrot.slane %v1822_v9, 2  ;;  %v2409_v24 = vrot.slane %v2270_v51, 3  ;;  %v6273_v41 = vpop.f32.mrb[189].mxu0  ;;  %6563 = vmatmul.mubr.msk.f32.gmra.mrb[38].mxu1 %vm251_vm2, %v6911_v6  ;;  %6685 = vmatmul.mubr.msk.f32.gmra.mrb[38].mxu0 %vm251_vm2, %v6910_v50  ;;  %v6151_v58 = vpop.f32.mrb[189].mxu1 }
 0x268   : > { %6565 = vmatprep.mubr.msk.f32.mxu1 %vm7013_vm1, %v7012_v1  ;;  %6687 = vmatprep.mubr.msk.f32.mxu0 %vm7013_vm1, %v7012_v1  ;;  %v6913_v41 = vld [vmem:[%s7110_s7 + $0x30] sm:$0xff] }
 0x269   : > { %v1958_v26 = vsel %vm1442_vm4, %v1955_v62, %v1957_v10  ;;  %v2410_v49 = vsel %vm2349_vm5, %v2407_v3, %v2409_v24  ;;  %4464 = vperm.xlu0 %6844, %v4362_v11   ;;  %v4363_v62 = vld [vmem:[%s9670_s2 + $0x88] sm:$0xff] }
 0x26a   : > { %v2035_v5 = vadd.f32 %v1958_v26, %v8325_v37  ;;  %v8845_v35 = vadd.f32 %v2410_v49, %v2034_v34  ;;  %v1827_v12 = vpop.f32.mrb[190].mxu1  ;;  %v2275_v8 = vpop.f32.mrb[190].mxu0  ;;  %v4364_v37 = vld [vmem:[%s9670_s2 + $0x90] sm:$0xff]  ;;  %4469 = vperm.xlu1 %6845, %v4363_v62  }
 0x26b   : > { %v1959_v21 = vrot.slane %v1827_v12, 2  ;;  %v2411_v17 = vrot.slane %v2275_v8, 3  ;;  %v6276_v39 = vpop.f32.mrb[191].mxu0  ;;  %6566 = vmatmul.mubr.msk.f32.gmra.mrb[40].mxu1 %vm251_vm2, %v6912_v44  ;;  %6688 = vmatmul.mubr.msk.f32.gmra.mrb[40].mxu0 %vm251_vm2, %v6911_v6  ;;  %v6154_v50 = vpop.f32.mrb[191].mxu1 }
 0x26c   : > { %6568 = vmatprep.mubr.msk.f32.mxu1 %vm7013_vm1, %v7012_v1  ;;  %6690 = vmatprep.mubr.msk.f32.mxu0 %vm7013_vm1, %v7012_v1  ;;  %v6914_v39 = vld [vmem:[%s7110_s7 + $0x38] sm:$0xff] }
 0x26d   : > { %v1960_v3 = vsel %vm1442_vm4, %v1957_v10, %v1959_v21  ;;  %v2412_v59 = vsel %vm2349_vm5, %v2409_v24, %v2411_v17  ;;  %4474 = vperm.xlu0 %6844, %v4364_v37   ;;  %v4365_v10 = vld [vmem:[%s9670_s2 + $0x98] sm:$0xff] }
 0x26e   : > { %v2036_v25 = vadd.f32 %v1960_v3, %v8337_v4  ;;  %v8863_v53 = vadd.f32 %v2412_v59, %v2035_v5  ;;  %v1832_v31 = vpop.f32.mrb[192].mxu1  ;;  %v2280_v13 = vpop.f32.mrb[192].mxu0  ;;  %v4366_v4 = vld [vmem:[%s9670_s2 + $0xa0] sm:$0xff]  ;;  %4479 = vperm.xlu1 %6845, %v4365_v10  }
 0x26f   : > { %v1961_v34 = vrot.slane %v1832_v31, 2  ;;  %v2413_v9 = vrot.slane %v2280_v13, 3  ;;  %v6279_v51 = vpop.f32.mrb[193].mxu0  ;;  %6569 = vmatmul.mubr.msk.f32.gmra.mrb[42].mxu1 %vm251_vm2, %v6913_v41  ;;  %6691 = vmatmul.mubr.msk.f32.gmra.mrb[42].mxu0 %vm251_vm2, %v6912_v44  ;;  %v6157_v6 = vpop.f32.mrb[193].mxu1 }
 0x270   : > { %6571 = vmatprep.mubr.msk.f32.mxu1 %vm7013_vm1, %v7012_v1  ;;  %6693 = vmatprep.mubr.msk.f32.mxu0 %vm7013_vm1, %v7012_v1  ;;  %v6915_v51 = vld [vmem:[%s7110_s7 + $0x40] sm:$0xff] }
 0x271   : > { %v1962_v24 = vsel %vm1442_vm4, %v1959_v21, %v1961_v34  ;;  %v2414_v58 = vsel %vm2349_vm5, %v2411_v17, %v2413_v9  ;;  %4484 = vperm.xlu0 %6844, %v4366_v4   ;;  %v4367_v21 = vld [vmem:[%s9670_s2 + $0xa8] sm:$0xff] }
 0x272   : > { %v2037_v57 = vadd.f32 %v1962_v24, %v8349_v28  ;;  %v8881_v11 = vadd.f32 %v2414_v58, %v2036_v25  ;;  %v1837_v26 = vpop.f32.mrb[194].mxu1  ;;  %v2285_v49 = vpop.f32.mrb[194].mxu0  ;;  %v4368_v28 = vld [vmem:[%s9670_s2 + $0xb0] sm:$0xff]  ;;  %4489 = vperm.xlu1 %6845, %v4367_v21  }
 0x273   : > { %v1963_v5 = vrot.slane %v1837_v26, 2  ;;  %v2415_v12 = vrot.slane %v2285_v49, 3  ;;  %v6282_v8 = vpop.f32.mrb[195].mxu0  ;;  %6572 = vmatmul.mubr.msk.f32.gmra.mrb[44].mxu1 %vm251_vm2, %v6914_v39  ;;  %6694 = vmatmul.mubr.msk.f32.gmra.mrb[44].mxu0 %vm251_vm2, %v6913_v41  ;;  %v6160_v44 = vpop.f32.mrb[195].mxu1 }
 0x274   : > { %6574 = vmatprep.mubr.msk.f32.mxu1 %vm7013_vm1, %v7012_v1  ;;  %6696 = vmatprep.mubr.msk.f32.mxu0 %vm7013_vm1, %v7012_v1  ;;  %v6916_v8 = vld [vmem:[%s7110_s7 + $0x48] sm:$0xff] }
 0x275   : > { %v1964_v17 = vsel %vm1442_vm4, %v1961_v34, %v1963_v5  ;;  %v2416_v50 = vsel %vm2349_vm5, %v2413_v9, %v2415_v12  ;;  %4494 = vperm.xlu0 %6844, %v4368_v28   ;;  %v4369_v34 = vld [vmem:[%s9670_s2 + $0xb8] sm:$0xff] }
 0x276   : > { %v2038_v62 = vadd.f32 %v1964_v17, %v8361_v23  ;;  %v8899_v37 = vadd.f32 %v2416_v50, %v2037_v57  ;;  %v1842_v3 = vpop.f32.mrb[196].mxu1  ;;  %v2290_v59 = vpop.f32.mrb[196].mxu0  ;;  %v4370_v23 = vld [vmem:[%s9670_s2 + $0xc0] sm:$0xff]  ;;  %4499 = vperm.xlu1 %6845, %v4369_v34  }
 0x277   : > { %v1965_v25 = vrot.slane %v1842_v3, 2  ;;  %v2417_v31 = vrot.slane %v2290_v59, 3  ;;  %v6285_v13 = vpop.f32.mrb[197].mxu0  ;;  %6575 = vmatmul.mubr.msk.f32.gmra.mrb[46].mxu1 %vm251_vm2, %v6915_v51  ;;  %6697 = vmatmul.mubr.msk.f32.gmra.mrb[46].mxu0 %vm251_vm2, %v6914_v39  ;;  %v6163_v41 = vpop.f32.mrb[197].mxu1  ;;  %v6917_v59 = vld [vmem:[%s7110_s7 + $0x50] sm:$0xff] }
 0x278   : > { %6577 = vmatprep.mubr.msk.f32.mxu1 %vm7013_vm1, %v7012_v1  ;;  %6699 = vmatprep.mubr.msk.f32.mxu0 %vm7013_vm1, %v7012_v1 }
 0x279   : > { %v1966_v9 = vsel %vm1442_vm4, %v1963_v5, %v1965_v25  ;;  %v2418_v6 = vsel %vm2349_vm5, %v2415_v12, %v2417_v31  ;;  %4504 = vperm.xlu0 %6844, %v4370_v23   ;;  %v4371_v12 = vld [vmem:[%s9670_s2 + $0xc8] sm:$0xff] }
 0x27a   : > { %v2039_v10 = vadd.f32 %v1966_v9, %v8373_v33  ;;  %v8917_v4 = vadd.f32 %v2418_v6, %v2038_v62  ;;  %v1847_v24 = vpop.f32.mrb[198].mxu1  ;;  %v2295_v58 = vpop.f32.mrb[198].mxu0  ;;  %v4372_v33 = vld [vmem:[%s9670_s2 + $0xd0] sm:$0xff]  ;;  %4509 = vperm.xlu1 %6845, %v4371_v12   ;;  %v6918_v9 = vld [vmem:[%s7110_s7 + $0x58] sm:$0xff]  ;;  %v4378_v12 = vld [vmem:[%s9670_s2 + $0x100] sm:$0xff] }
 0x27b   : > { %v1967_v57 = vrot.slane %v1847_v24, 2  ;;  %v2419_v26 = vrot.slane %v2295_v58, 3  ;;  %v6288_v49 = vpop.f32.mrb[199].mxu0  ;;  %6578 = vmatmul.mubr.msk.f32.gmra.mrb[48].mxu1 %vm251_vm2, %v6916_v8  ;;  %6700 = vmatmul.mubr.msk.f32.gmra.mrb[48].mxu0 %vm251_vm2, %v6915_v51  ;;  %v6166_v5 = vpop.f32.mrb[199].mxu1  ;;  %v4376_v24 = vld [vmem:[%s9670_s2 + $0xf0] sm:$0xff] }
 0x27c   : > { %6580 = vmatprep.mubr.msk.f32.mxu1 %vm7013_vm1, %v7012_v1  ;;  %6702 = vmatprep.mubr.msk.f32.mxu0 %vm7013_vm1, %v7012_v1  ;;  %v6919_v49 = vld [vmem:[%s7110_s7 + $0x60] sm:$0xff]  ;;  %v4377_v5 = vld [vmem:[%s9670_s2 + $0xf8] sm:$0xff] }
 0x27d   : > { %v1968_v39 = vsel %vm1442_vm4, %v1965_v25, %v1967_v57  ;;  %v2420_v44 = vsel %vm2349_vm5, %v2417_v31, %v2419_v26  ;;  %4514 = vperm.xlu0 %6844, %v4372_v33   ;;  %v4373_v25 = vld [vmem:[%s9670_s2 + $0xd8] sm:$0xff] }
 0x27e   : > { %v2040_v21 = vadd.f32 %v1968_v39, %v8383_v38  ;;  %v8935_v28 = vadd.f32 %v2420_v44, %v2039_v10  ;;  %v2300_v17 = vpop.f32.mrb[200].mxu0  ;;  %v1852_v50 = vpop.f32.mrb[200].mxu1  ;;  %v4374_v38 = vld [vmem:[%s9670_s2 + $0xe0] sm:$0xff]  ;;  %4519 = vperm.xlu1 %6845, %v4373_v25   ;;  %v4375_v10 = vld [vmem:[%s9670_s2 + $0xe8] sm:$0xff]  ;;  %v6921_v25 = vld [vmem:[%s7110_s7 + $0x70] sm:$0xff] }
 0x27f   : > { %v2421_v62 = vrot.slane %v2300_v17, 3  ;;  %v6291_v3 = vpop.f32.mrb[201].mxu0  ;;  %6581 = vmatmul.mubr.msk.f32.gmra.mrb[50].mxu1 %vm251_vm2, %v6917_v59  ;;  %6703 = vmatmul.mubr.msk.f32.gmra.mrb[50].mxu0 %vm251_vm2, %v6916_v8  ;;  %v6169_v13 = vpop.f32.mrb[201].mxu1  ;;  %v4379_v50 = vld [vmem:[%s9670_s2 + $0x108] sm:$0xff] }
 0x280   : > { %6583 = vmatprep.mubr.msk.f32.mxu1 %vm7013_vm1, %v7012_v1  ;;  %6705 = vmatprep.mubr.msk.f32.mxu0 %vm7013_vm1, %v7012_v1 }
 0x281   : > { %v2422_v31 = vsel %vm2349_vm5, %v2419_v26, %v2421_v62  ;;  %4524 = vperm.xlu0 %6844, %v4374_v38   ;;  %v4380_v62 = vld [vmem:[%s9670_s2 + $0x110] sm:$0xff] }
 0x282   : > { %v8951_v51 = vadd.f32 %v2422_v31, %v2040_v21  ;;  %v2305_v41 = vpop.f32.mrb[202].mxu0  ;;  %v1856_v34 = vpop.f32.mrb[202].mxu1  ;;  %4529 = vperm.xlu1 %6845, %v4375_v10   ;;  %v6920_v21 = vld [vmem:[%s7110_s7 + $0x68] sm:$0xff]  ;;  %v4381_v31 = vld [vmem:[%s9670_s2 + $0x118] sm:$0xff] }
 0x283   : > { %v6294_v23 = vpop.f32.mrb[203].mxu0  ;;  %6584 = vmatmul.mubr.msk.f32.gmra.mrb[52].mxu1 %vm251_vm2, %v6918_v9  ;;  %6706 = vmatmul.mubr.msk.f32.gmra.mrb[52].mxu0 %vm251_vm2, %v6917_v59  ;;  %v6172_v6 = vpop.f32.mrb[203].mxu1  ;;  %v6922_v10 = vld [vmem:[%s7110_s7 + $0x78] sm:$0xff] }
 0x284   : > { %6586 = vmatprep.mubr.msk.f32.mxu1 %vm7013_vm1, %v7012_v1  ;;  %6708 = vmatprep.mubr.msk.f32.mxu0 %vm7013_vm1, %v7012_v1 }
 0x285   : > { %4534 = vperm.xlu0 %6844, %v4376_v24  }
 0x286   : > { %v2309_v58 = vpop.f32.mrb[204].mxu0  ;;  %v2566_v57 = vpop.f32.mrb[204].mxu1  ;;  %4539 = vperm.xlu1 %6845, %v4377_v5  }
 0x287   : > { %v6297_v26 = vpop.f32.mrb[205].mxu0  ;;  %6587 = vmatmul.mubr.msk.f32.gmra.mrb[54].mxu1 %vm251_vm2, %v6919_v49  ;;  %6709 = vmatmul.mubr.msk.f32.gmra.mrb[54].mxu0 %vm251_vm2, %v6918_v9  ;;  %v6302_v8 = vpop.f32.mrb[205].mxu1 }
 0x288   : > { %6589 = vmatprep.mubr.msk.f32.mxu1 %vm7013_vm1, %v7012_v1  ;;  %6711 = vmatprep.mubr.msk.f32.mxu0 %vm7013_vm1, %v7012_v1 }
 0x289   : > { %4544 = vperm.xlu0 %6844, %v4378_v12   ;;  %v6923_v12 = vld [vmem:[%s7110_s7 + $0x80] sm:$0xff] }
 0x28a   : > { %v3019_v33 = vpop.f32.mrb[206].mxu0  ;;  %v2570_v39 = vpop.f32.mrb[206].mxu1  ;;  %4549 = vperm.xlu1 %6845, %v4379_v50  }
 0x28b   : > { %v6427_v44 = vpop.f32.mrb[207].mxu0  ;;  %6590 = vmatmul.mubr.msk.f32.gmra.mrb[56].mxu1 %vm251_vm2, %v6920_v21  ;;  %6712 = vmatmul.mubr.msk.f32.gmra.mrb[56].mxu0 %vm251_vm2, %v6919_v49  ;;  %v6305_v17 = vpop.f32.mrb[207].mxu1 }
 0x28c   : > { %6592 = vmatprep.mubr.msk.f32.mxu1 %vm7013_vm1, %v7012_v1  ;;  %6714 = vmatprep.mubr.msk.f32.mxu0 %vm7013_vm1, %v7012_v1 }
 0x28d   : > { %4554 = vperm.xlu0 %6844, %v4380_v62   ;;  %v6924_v62 = vld [vmem:[%s7110_s7 + $0x88] sm:$0xff] }
 0x28e   : > { %v3023_v3 = vpop.f32.mrb[208].mxu0  ;;  %v2574_v59 = vpop.f32.mrb[208].mxu1  ;;  %4559 = vperm.xlu1 %6845, %v4381_v31  }
 0x28f   : > { %v6430_v13 = vpop.f32.mrb[209].mxu0  ;;  %6593 = vmatmul.mubr.msk.f32.gmra.mrb[58].mxu1 %vm251_vm2, %v6921_v25  ;;  %6715 = vmatmul.mubr.msk.f32.gmra.mrb[58].mxu0 %vm251_vm2, %v6920_v21  ;;  %v6308_v38 = vpop.f32.mrb[209].mxu1  ;;  %v2803_v23 = vrot.slane %v2574_v59, 4 }
 0x290   : > { %6595 = vmatprep.mubr.msk.f32.mxu1 %vm7013_vm1, %v7012_v1  ;;  %6717 = vmatprep.mubr.msk.f32.mxu0 %vm7013_vm1, %v7012_v1 }
 0x292   : > { %v2579_v41 = vpop.f32.mrb[210].mxu1  ;;  %v3027_v34 = vpop.f32.mrb[210].mxu0 }
 0x293   : > { %v2804_v9 = vrot.slane %v2579_v41, 4  ;;  %v6433_v6 = vpop.f32.mrb[211].mxu0  ;;  %6596 = vmatmul.mubr.msk.f32.gmra.mrb[60].mxu1 %vm251_vm2, %v6922_v10  ;;  %6718 = vmatmul.mubr.msk.f32.gmra.mrb[60].mxu0 %vm251_vm2, %v6921_v25  ;;  %v6311_v24 = vpop.f32.mrb[211].mxu1 }
 0x294   : > { %6598 = vmatprep.mubr.msk.f32.mxu1 %vm7013_vm1, %v7012_v1  ;;  %6720 = vmatprep.mubr.msk.f32.mxu0 %vm7013_vm1, %v7012_v1 }
 0x295   : > { %v2805_v58 = vsel %vm375_vm0, %v2803_v23, %v2804_v9  ;;  %v6925_v23 = vld [vmem:[%s7110_s7 + $0x90] sm:$0xff] }
 0x296   : > { %v2912_v57 = vadd.f32 %v2805_v58, %v8446_v48  ;;  %v2584_v26 = vpop.f32.mrb[212].mxu1  ;;  %v3031_v49 = vpop.f32.mrb[212].mxu0 }
 0x297   : > { %v2806_v8 = vrot.slane %v2584_v26, 4  ;;  %v6436_v5 = vpop.f32.mrb[213].mxu0  ;;  %6599 = vmatmul.mubr.msk.f32.gmra.mrb[62].mxu1 %vm251_vm2, %v6923_v12  ;;  %6721 = vmatmul.mubr.msk.f32.gmra.mrb[62].mxu0 %vm251_vm2, %v6922_v10  ;;  %v6314_v33 = vpop.f32.mrb[213].mxu1 }
 0x298   : > { %6601 = vmatprep.mubr.msk.f32.mxu1 %vm7013_vm1, %v7012_v1  ;;  %6723 = vmatprep.mubr.msk.f32.mxu0 %vm7013_vm1, %v7012_v1 }
 0x299   : > { %v2807_v39 = vsel %vm375_vm0, %v2804_v9, %v2806_v8 }
 0x29a   : > { %v2913_v48 = vadd.f32 %v2807_v39, %v8458_v52  ;;  %v2589_v44 = vpop.f32.mrb[214].mxu1  ;;  %v3035_v21 = vpop.f32.mrb[214].mxu0 }
 0x29b   : > { %v2808_v17 = vrot.slane %v2589_v44, 4  ;;  %v6439_v50 = vpop.f32.mrb[215].mxu0  ;;  %6602 = vmatmul.mubr.msk.f32.gmra.mrb[64].mxu1 %vm251_vm2, %v6924_v62  ;;  %6724 = vmatmul.mubr.msk.f32.gmra.mrb[64].mxu0 %vm251_vm2, %v6923_v12  ;;  %v6317_v3 = vpop.f32.mrb[215].mxu1  ;;  %v3256_v38 = vrot.slane %v3035_v21, 4  ;;  %v6926_v12 = vld [vmem:[%s7110_s7 + $0x98] sm:$0xff] }
 0x29c   : > { %6604 = vmatprep.mubr.msk.f32.mxu1 %vm7013_vm1, %v7012_v1  ;;  %6726 = vmatprep.mubr.msk.f32.mxu0 %vm7013_vm1, %v7012_v1 }
 0x29d   : > { %v2809_v59 = vsel %vm375_vm0, %v2806_v8, %v2808_v17 }
 0x29e   : > { %v2914_v52 = vadd.f32 %v2809_v59, %v8470_v56  ;;  %v2594_v13 = vpop.f32.mrb[216].mxu1  ;;  %v3040_v25 = vpop.f32.mrb[216].mxu0  ;;  %v6927_v59 = vld [vmem:[%s7110_s7 + $0xa0] sm:$0xff] }
 0x29f   : > { %v2810_v31 = vrot.slane %v2594_v13, 4  ;;  %v3257_v41 = vrot.slane %v3040_v25, 4  ;;  %v6442_v34 = vpop.f32.mrb[217].mxu0  ;;  %6605 = vmatmul.mubr.msk.f32.gmra.mrb[66].mxu1 %vm251_vm2, %v6925_v23  ;;  %6727 = vmatmul.mubr.msk.f32.gmra.mrb[66].mxu0 %vm251_vm2, %v6924_v62  ;;  %v6320_v9 = vpop.f32.mrb[217].mxu1 }
 0x2a0   : > { %6607 = vmatprep.mubr.msk.f32.mxu1 %vm7013_vm1, %v7012_v1  ;;  %6729 = vmatprep.mubr.msk.f32.mxu0 %vm7013_vm1, %v7012_v1 }
 0x2a1   : > { %v2811_v56 = vsel %vm375_vm0, %v2808_v17, %v2810_v31  ;;  %v3258_v6 = vsel %vm375_vm0, %v3256_v38, %v3257_v41 }
 0x2a2   : > { %v2915_v10 = vadd.f32 %v2811_v56, %v8482_v60  ;;  %v9039_v24 = vadd.f32 %v3258_v6, %v2912_v57  ;;  %v2599_v58 = vpop.f32.mrb[218].mxu1  ;;  %v3045_v26 = vpop.f32.mrb[218].mxu0  ;;  %v6928_v56 = vld [vmem:[%s7110_s7 + $0xa8] sm:$0xff] }
 0x2a3   : > { %v2812_v49 = vrot.slane %v2599_v58, 4  ;;  %v3259_v8 = vrot.slane %v3045_v26, 4  ;;  %v6445_v5 = vpop.f32.mrb[219].mxu0  ;;  %6608 = vmatmul.mubr.msk.f32.gmra.mrb[68].mxu1 %vm251_vm2, %v6926_v12  ;;  %6730 = vmatmul.mubr.msk.f32.gmra.mrb[68].mxu0 %vm251_vm2, %v6925_v23  ;;  %v6323_v33 = vpop.f32.mrb[219].mxu1 }
 0x2a4   : > { %6610 = vmatprep.mubr.msk.f32.mxu1 %vm7013_vm1, %v7012_v1  ;;  %6732 = vmatprep.mubr.msk.f32.mxu0 %vm7013_vm1, %v7012_v1 }
 0x2a5   : > { %v2813_v60 = vsel %vm375_vm0, %v2810_v31, %v2812_v49  ;;  %v3260_v57 = vsel %vm375_vm0, %v3257_v41, %v3259_v8 }
 0x2a6   : > { %v2916_v39 = vadd.f32 %v2813_v60, %v8494_v0  ;;  %v9051_v44 = vadd.f32 %v3260_v57, %v2913_v48  ;;  %v2604_v21 = vpop.f32.mrb[220].mxu1  ;;  %v3050_v17 = vpop.f32.mrb[220].mxu0  ;;  %v6929_v60 = vld [vmem:[%s7110_s7 + $0xb0] sm:$0xff] }
 0x2a7   : > { %v2814_v50 = vrot.slane %v2604_v21, 4  ;;  %v3261_v62 = vrot.slane %v3050_v17, 4  ;;  %v6448_v3 = vpop.f32.mrb[221].mxu0  ;;  %6611 = vmatmul.mubr.msk.f32.gmra.mrb[70].mxu1 %vm251_vm2, %v6927_v59  ;;  %6733 = vmatmul.mubr.msk.f32.gmra.mrb[70].mxu0 %vm251_vm2, %v6926_v12  ;;  %v6326_v13 = vpop.f32.mrb[221].mxu1 }
 0x2a8   : > { %6613 = vmatprep.mubr.msk.f32.mxu1 %vm7013_vm1, %v7012_v1  ;;  %6735 = vmatprep.mubr.msk.f32.mxu0 %vm7013_vm1, %v7012_v1 }
 0x2a9   : > { %v2815_v0 = vsel %vm375_vm0, %v2812_v49, %v2814_v50  ;;  %v3262_v48 = vsel %vm375_vm0, %v3259_v8, %v3261_v62 }
 0x2aa   : > { %v2917_v25 = vadd.f32 %v2815_v0, %v8506_v7  ;;  %v9063_v38 = vadd.f32 %v3262_v48, %v2914_v52  ;;  %v2609_v31 = vpop.f32.mrb[222].mxu1  ;;  %v3055_v41 = vpop.f32.mrb[222].mxu0  ;;  %v6930_v0 = vld [vmem:[%s7110_s7 + $0xb8] sm:$0xff] }
 0x2ab   : > { %v2816_v34 = vrot.slane %v2609_v31, 4  ;;  %v3263_v23 = vrot.slane %v3055_v41, 4  ;;  %v6451_v9 = vpop.f32.mrb[223].mxu0  ;;  %6614 = vmatmul.mubr.msk.f32.gmra.mrb[72].mxu1 %vm251_vm2, %v6928_v56  ;;  %6736 = vmatmul.mubr.msk.f32.gmra.mrb[72].mxu0 %vm251_vm2, %v6927_v59  ;;  %v6329_v6 = vpop.f32.mrb[223].mxu1 }
 0x2ac   : > { %6616 = vmatprep.mubr.msk.f32.mxu1 %vm7013_vm1, %v7012_v1  ;;  %6738 = vmatprep.mubr.msk.f32.mxu0 %vm7013_vm1, %v7012_v1 }
 0x2ad   : > { %v2817_v7 = vsel %vm375_vm0, %v2814_v50, %v2816_v34  ;;  %v3264_v52 = vsel %vm375_vm0, %v3261_v62, %v3263_v23 }
 0x2ae   : > { %v2918_v58 = vadd.f32 %v2817_v7, %v8518_v15  ;;  %v9075_v26 = vadd.f32 %v3264_v52, %v2915_v10  ;;  %v2614_v49 = vpop.f32.mrb[224].mxu1  ;;  %v3060_v8 = vpop.f32.mrb[224].mxu0  ;;  %v6931_v7 = vld [vmem:[%s7110_s7 + $0xc0] sm:$0xff] }
 0x2af   : > { %v2818_v5 = vrot.slane %v2614_v49, 4  ;;  %v3265_v12 = vrot.slane %v3060_v8, 4  ;;  %v6454_v33 = vpop.f32.mrb[225].mxu0  ;;  %6617 = vmatmul.mubr.msk.f32.gmra.mrb[74].mxu1 %vm251_vm2, %v6929_v60  ;;  %6739 = vmatmul.mubr.msk.f32.gmra.mrb[74].mxu0 %vm251_vm2, %v6928_v56  ;;  %v6332_v57 = vpop.f32.mrb[225].mxu1 }
 0x2b0   : > { %6619 = vmatprep.mubr.msk.f32.mxu1 %vm7013_vm1, %v7012_v1  ;;  %6741 = vmatprep.mubr.msk.f32.mxu0 %vm7013_vm1, %v7012_v1 }
 0x2b1   : > { %v2819_v15 = vsel %vm375_vm0, %v2816_v34, %v2818_v5  ;;  %v3266_v10 = vsel %vm375_vm0, %v3263_v23, %v3265_v12 }
 0x2b2   : > { %v2919_v21 = vadd.f32 %v2819_v15, %v8530_v30  ;;  %v9087_v17 = vadd.f32 %v3266_v10, %v2916_v39  ;;  %v2619_v50 = vpop.f32.mrb[226].mxu1  ;;  %v3065_v62 = vpop.f32.mrb[226].mxu0  ;;  %v6932_v15 = vld [vmem:[%s7110_s7 + $0xc8] sm:$0xff] }
 0x2b3   : > { %v2820_v3 = vrot.slane %v2619_v50, 4  ;;  %v3267_v59 = vrot.slane %v3065_v62, 4  ;;  %v6457_v13 = vpop.f32.mrb[227].mxu0  ;;  %6620 = vmatmul.mubr.msk.f32.gmra.mrb[76].mxu1 %vm251_vm2, %v6930_v0  ;;  %6742 = vmatmul.mubr.msk.f32.gmra.mrb[76].mxu0 %vm251_vm2, %v6929_v60  ;;  %v6335_v48 = vpop.f32.mrb[227].mxu1 }
 0x2b4   : > { %6622 = vmatprep.mubr.msk.f32.mxu1 %vm7013_vm1, %v7012_v1  ;;  %6744 = vmatprep.mubr.msk.f32.mxu0 %vm7013_vm1, %v7012_v1 }
 0x2b5   : > { %v2821_v30 = vsel %vm375_vm0, %v2818_v5, %v2820_v3  ;;  %v3268_v39 = vsel %vm375_vm0, %v3265_v12, %v3267_v59 }
 0x2b6   : > { %v2920_v31 = vadd.f32 %v2821_v30, %v8542_v61  ;;  %v9099_v41 = vadd.f32 %v3268_v39, %v2917_v25  ;;  %v2624_v34 = vpop.f32.mrb[228].mxu1  ;;  %v3070_v23 = vpop.f32.mrb[228].mxu0  ;;  %v6933_v30 = vld [vmem:[%s7110_s7 + $0xd0] sm:$0xff] }
 0x2b7   : > { %v2822_v9 = vrot.slane %v2624_v34, 4  ;;  %v3269_v56 = vrot.slane %v3070_v23, 4  ;;  %v6460_v6 = vpop.f32.mrb[229].mxu0  ;;  %6623 = vmatmul.mubr.msk.f32.gmra.mrb[78].mxu1 %vm251_vm2, %v6931_v7  ;;  %6745 = vmatmul.mubr.msk.f32.gmra.mrb[78].mxu0 %vm251_vm2, %v6930_v0  ;;  %v6338_v52 = vpop.f32.mrb[229].mxu1 }
 0x2b8   : > { %6625 = vmatprep.mubr.msk.f32.mxu1 %vm7013_vm1, %v7012_v1  ;;  %6747 = vmatprep.mubr.msk.f32.mxu0 %vm7013_vm1, %v7012_v1 }
 0x2b9   : > { %v2823_v61 = vsel %vm375_vm0, %v2820_v3, %v2822_v9  ;;  %v3270_v25 = vsel %vm375_vm0, %v3267_v59, %v3269_v56 }
 0x2ba   : > { %v2921_v49 = vadd.f32 %v2823_v61, %v8554_v27  ;;  %v9111_v8 = vadd.f32 %v3270_v25, %v2918_v58  ;;  %v2629_v5 = vpop.f32.mrb[230].mxu1  ;;  %v3075_v12 = vpop.f32.mrb[230].mxu0  ;;  %v6934_v61 = vld [vmem:[%s7110_s7 + $0xd8] sm:$0xff] }
 0x2bb   : > { %v2824_v33 = vrot.slane %v2629_v5, 4  ;;  %v3271_v60 = vrot.slane %v3075_v12, 4  ;;  %v6463_v57 = vpop.f32.mrb[231].mxu0  ;;  %6626 = vmatmul.mubr.msk.f32.gmra.mrb[80].mxu1 %vm251_vm2, %v6932_v15  ;;  %6748 = vmatmul.mubr.msk.f32.gmra.mrb[80].mxu0 %vm251_vm2, %v6931_v7  ;;  %v6341_v10 = vpop.f32.mrb[231].mxu1 }
 0x2bc   : > { %6628 = vmatprep.mubr.msk.f32.mxu1 %vm7013_vm1, %v7012_v1  ;;  %6750 = vmatprep.mubr.msk.f32.mxu0 %vm7013_vm1, %v7012_v1 }
 0x2bd   : > { %v2825_v27 = vsel %vm375_vm0, %v2822_v9, %v2824_v33  ;;  %v3272_v58 = vsel %vm375_vm0, %v3269_v56, %v3271_v60 }
 0x2be   : > { %v2922_v50 = vadd.f32 %v2825_v27, %v8566_v45  ;;  %v9123_v62 = vadd.f32 %v3272_v58, %v2919_v21  ;;  %v2634_v3 = vpop.f32.mrb[232].mxu1  ;;  %v3080_v59 = vpop.f32.mrb[232].mxu0  ;;  %v6935_v27 = vld [vmem:[%s7110_s7 + $0xe0] sm:$0xff] }
 0x2bf   : > { %v2826_v13 = vrot.slane %v2634_v3, 4  ;;  %v3273_v0 = vrot.slane %v3080_v59, 4  ;;  %v6466_v48 = vpop.f32.mrb[233].mxu0  ;;  %6629 = vmatmul.mubr.msk.f32.gmra.mrb[82].mxu1 %vm251_vm2, %v6933_v30  ;;  %6751 = vmatmul.mubr.msk.f32.gmra.mrb[82].mxu0 %vm251_vm2, %v6932_v15  ;;  %v6344_v39 = vpop.f32.mrb[233].mxu1 }
 0x2c0   : > { %6631 = vmatprep.mubr.msk.f32.mxu1 %vm7013_vm1, %v7012_v1  ;;  %6753 = vmatprep.mubr.msk.f32.mxu0 %vm7013_vm1, %v7012_v1 }
 0x2c1   : > { %v2827_v45 = vsel %vm375_vm0, %v2824_v33, %v2826_v13  ;;  %v3274_v21 = vsel %vm375_vm0, %v3271_v60, %v3273_v0 }
 0x2c2   : > { %v2923_v34 = vadd.f32 %v2827_v45, %v8578_v55  ;;  %v9135_v23 = vadd.f32 %v3274_v21, %v2920_v31  ;;  %v2639_v9 = vpop.f32.mrb[234].mxu1  ;;  %v3085_v56 = vpop.f32.mrb[234].mxu0  ;;  %v6936_v45 = vld [vmem:[%s7110_s7 + $0xe8] sm:$0xff] }
 0x2c3   : > { %v2828_v6 = vrot.slane %v2639_v9, 4  ;;  %v3275_v7 = vrot.slane %v3085_v56, 4  ;;  %v6469_v52 = vpop.f32.mrb[235].mxu0  ;;  %6632 = vmatmul.mubr.msk.f32.gmra.mrb[84].mxu1 %vm251_vm2, %v6934_v61  ;;  %6754 = vmatmul.mubr.msk.f32.gmra.mrb[84].mxu0 %vm251_vm2, %v6933_v30  ;;  %v6347_v25 = vpop.f32.mrb[235].mxu1 }
 0x2c4   : > { %6634 = vmatprep.mubr.msk.f32.mxu1 %vm7013_vm1, %v7012_v1  ;;  %6756 = vmatprep.mubr.msk.f32.mxu0 %vm7013_vm1, %v7012_v1 }
 0x2c5   : > { %v2829_v55 = vsel %vm375_vm0, %v2826_v13, %v2828_v6  ;;  %v3276_v31 = vsel %vm375_vm0, %v3273_v0, %v3275_v7 }
 0x2c6   : > { %v2924_v5 = vadd.f32 %v2829_v55, %v8590_v29  ;;  %v9147_v12 = vadd.f32 %v3276_v31, %v2921_v49  ;;  %v2644_v33 = vpop.f32.mrb[236].mxu1  ;;  %v3090_v60 = vpop.f32.mrb[236].mxu0  ;;  %v6937_v55 = vld [vmem:[%s7110_s7 + $0xf0] sm:$0xff] }
 0x2c7   : > { %v2830_v57 = vrot.slane %v2644_v33, 4  ;;  %v3277_v15 = vrot.slane %v3090_v60, 4  ;;  %v6472_v10 = vpop.f32.mrb[237].mxu0  ;;  %6635 = vmatmul.mubr.msk.f32.gmra.mrb[86].mxu1 %vm251_vm2, %v6935_v27  ;;  %6757 = vmatmul.mubr.msk.f32.gmra.mrb[86].mxu0 %vm251_vm2, %v6934_v61  ;;  %v6350_v58 = vpop.f32.mrb[237].mxu1 }
 0x2c8   : > { %6637 = vmatprep.mubr.msk.f32.mxu1 %vm7013_vm1, %v7012_v1  ;;  %6759 = vmatprep.mubr.msk.f32.mxu0 %vm7013_vm1, %v7012_v1 }
 0x2c9   : > { %v2831_v29 = vsel %vm375_vm0, %v2828_v6, %v2830_v57  ;;  %v3278_v49 = vsel %vm375_vm0, %v3275_v7, %v3277_v15 }
 0x2ca   : > { %v2925_v3 = vadd.f32 %v2831_v29, %v8602_v36  ;;  %v9159_v59 = vadd.f32 %v3278_v49, %v2922_v50  ;;  %v2649_v13 = vpop.f32.mrb[238].mxu1  ;;  %v3095_v0 = vpop.f32.mrb[238].mxu0  ;;  %v6938_v29 = vld [vmem:[%s7110_s7 + $0xf8] sm:$0xff] }
 0x2cb   : > { %v2832_v48 = vrot.slane %v2649_v13, 4  ;;  %v3279_v30 = vrot.slane %v3095_v0, 4  ;;  %v6475_v39 = vpop.f32.mrb[239].mxu0  ;;  %6638 = vmatmul.mubr.msk.f32.gmra.mrb[88].mxu1 %vm251_vm2, %v6936_v45  ;;  %6760 = vmatmul.mubr.msk.f32.gmra.mrb[88].mxu0 %vm251_vm2, %v6935_v27  ;;  %v6353_v21 = vpop.f32.mrb[239].mxu1 }
 0x2cc   : > { %6640 = vmatprep.mubr.msk.f32.mxu1 %vm7013_vm1, %v7012_v1  ;;  %6762 = vmatprep.mubr.msk.f32.mxu0 %vm7013_vm1, %v7012_v1 }
 0x2cd   : > { %v2833_v36 = vsel %vm375_vm0, %v2830_v57, %v2832_v48  ;;  %v3280_v50 = vsel %vm375_vm0, %v3277_v15, %v3279_v30 }
 0x2ce   : > { %v2926_v9 = vadd.f32 %v2833_v36, %v8614_v19  ;;  %v9171_v56 = vadd.f32 %v3280_v50, %v2923_v34  ;;  %v2654_v6 = vpop.f32.mrb[240].mxu1  ;;  %v3100_v7 = vpop.f32.mrb[240].mxu0  ;;  %v6939_v36 = vld [vmem:[%s7110_s7 + $0x100] sm:$0xff] }
 0x2cf   : > { %v2834_v52 = vrot.slane %v2654_v6, 4  ;;  %v3281_v61 = vrot.slane %v3100_v7, 4  ;;  %v6478_v25 = vpop.f32.mrb[241].mxu0  ;;  %6641 = vmatmul.mubr.msk.f32.gmra.mrb[90].mxu1 %vm251_vm2, %v6937_v55  ;;  %6763 = vmatmul.mubr.msk.f32.gmra.mrb[90].mxu0 %vm251_vm2, %v6936_v45  ;;  %v6356_v31 = vpop.f32.mrb[241].mxu1 }
 0x2d0   : > { %6643 = vmatprep.mubr.msk.f32.mxu1 %vm7013_vm1, %v7012_v1  ;;  %6765 = vmatprep.mubr.msk.f32.mxu0 %vm7013_vm1, %v7012_v1 }
 0x2d1   : > { %v2835_v19 = vsel %vm375_vm0, %v2832_v48, %v2834_v52  ;;  %v3282_v34 = vsel %vm375_vm0, %v3279_v30, %v3281_v61 }
 0x2d2   : > { %v2927_v33 = vadd.f32 %v2835_v19, %v8626_v40  ;;  %v9183_v60 = vadd.f32 %v3282_v34, %v2924_v5  ;;  %v2659_v57 = vpop.f32.mrb[242].mxu1  ;;  %v3105_v15 = vpop.f32.mrb[242].mxu0  ;;  %v6940_v19 = vld [vmem:[%s7110_s7 + $0x108] sm:$0xff] }
 0x2d3   : > { %v2836_v10 = vrot.slane %v2659_v57, 4  ;;  %v3283_v27 = vrot.slane %v3105_v15, 4  ;;  %v6481_v58 = vpop.f32.mrb[243].mxu0  ;;  %6644 = vmatmul.mubr.msk.f32.gmra.mrb[92].mxu1 %vm251_vm2, %v6938_v29  ;;  %6766 = vmatmul.mubr.msk.f32.gmra.mrb[92].mxu0 %vm251_vm2, %v6937_v55  ;;  %v6359_v49 = vpop.f32.mrb[243].mxu1 }
 0x2d4   : > { %6646 = vmatprep.mubr.msk.f32.mxu1 %vm7013_vm1, %v7012_v1  ;;  %6768 = vmatprep.mubr.msk.f32.mxu0 %vm7013_vm1, %v7012_v1 }
 0x2d5   : > { %v2837_v40 = vsel %vm375_vm0, %v2834_v52, %v2836_v10  ;;  %v3284_v5 = vsel %vm375_vm0, %v3281_v61, %v3283_v27 }
 0x2d6   : > { %v2928_v13 = vadd.f32 %v2837_v40, %v8638_v63  ;;  %v9195_v0 = vadd.f32 %v3284_v5, %v2925_v3  ;;  %v2664_v48 = vpop.f32.mrb[244].mxu1  ;;  %v3110_v30 = vpop.f32.mrb[244].mxu0  ;;  %v6941_v40 = vld [vmem:[%s7110_s7 + $0x110] sm:$0xff] }
 0x2d7   : > { %v2838_v39 = vrot.slane %v2664_v48, 4  ;;  %v3285_v45 = vrot.slane %v3110_v30, 4  ;;  %v6484_v21 = vpop.f32.mrb[245].mxu0  ;;  %6647 = vmatmul.mubr.msk.f32.gmra.mrb[94].mxu1 %vm251_vm2, %v6939_v36  ;;  %6769 = vmatmul.mubr.msk.f32.gmra.mrb[94].mxu0 %vm251_vm2, %v6938_v29  ;;  %v6362_v50 = vpop.f32.mrb[245].mxu1 }
 0x2d8   : > { %6649 = vmatprep.mubr.msk.f32.mxu1 %vm7013_vm1, %v7012_v1  ;;  %6771 = vmatprep.mubr.msk.f32.mxu0 %vm7013_vm1, %v7012_v1 }
 0x2d9   : > { %v2839_v63 = vsel %vm375_vm0, %v2836_v10, %v2838_v39  ;;  %v3286_v3 = vsel %vm375_vm0, %v3283_v27, %v3285_v45 }
 0x2da   : > { %v2929_v6 = vadd.f32 %v2839_v63, %v8650_v47  ;;  %v9207_v7 = vadd.f32 %v3286_v3, %v2926_v9  ;;  %v2669_v52 = vpop.f32.mrb[246].mxu1  ;;  %v3115_v61 = vpop.f32.mrb[246].mxu0  ;;  %v6942_v63 = vld [vmem:[%s7110_s7 + $0x118] sm:$0xff] }
 0x2db   : > { %v2840_v25 = vrot.slane %v2669_v52, 4  ;;  %v3287_v55 = vrot.slane %v3115_v61, 4  ;;  %v6487_v31 = vpop.f32.mrb[247].mxu0  ;;  %6650 = vmatmul.mubr.msk.f32.gmra.mrb[96].mxu1 %vm251_vm2, %v6940_v19  ;;  %6772 = vmatmul.mubr.msk.f32.gmra.mrb[96].mxu0 %vm251_vm2, %v6939_v36  ;;  %v6365_v34 = vpop.f32.mrb[247].mxu1 }
 0x2dc   : > { %6652 = vmatprep.mubr.msk.f32.mxu1 %vm7013_vm1, %v7012_v1  ;;  %6774 = vmatprep.mubr.msk.f32.mxu0 %vm7013_vm1, %v7012_v1 }
 0x2dd   : > { %v2841_v47 = vsel %vm375_vm0, %v2838_v39, %v2840_v25  ;;  %v3288_v9 = vsel %vm375_vm0, %v3285_v45, %v3287_v55 }
 0x2de   : > { %v2930_v57 = vadd.f32 %v2841_v47, %v8662_v46  ;;  %v9219_v15 = vadd.f32 %v3288_v9, %v2927_v33  ;;  %v2674_v10 = vpop.f32.mrb[248].mxu1  ;;  %v3120_v27 = vpop.f32.mrb[248].mxu0  ;;  %v6943_v47 = vld [vmem:[%s7110_s7 + $0x120] sm:$0xff] }
 0x2df   : > { %v2842_v58 = vrot.slane %v2674_v10, 4  ;;  %v3289_v29 = vrot.slane %v3120_v27, 4  ;;  %v6490_v49 = vpop.f32.mrb[249].mxu0  ;;  %6653 = vmatmul.mubr.msk.f32.gmra.mrb[98].mxu1 %vm251_vm2, %v6941_v40  ;;  %6775 = vmatmul.mubr.msk.f32.gmra.mrb[98].mxu0 %vm251_vm2, %v6940_v19  ;;  %v6368_v5 = vpop.f32.mrb[249].mxu1 }
 0x2e0   : > { %6655 = vmatprep.mubr.msk.f32.mxu1 %vm7013_vm1, %v7012_v1  ;;  %6777 = vmatprep.mubr.msk.f32.mxu0 %vm7013_vm1, %v7012_v1 }
 0x2e1   : > { %v2843_v46 = vsel %vm375_vm0, %v2840_v25, %v2842_v58  ;;  %v3290_v33 = vsel %vm375_vm0, %v3287_v55, %v3289_v29 }
 0x2e2   : > { %v2931_v48 = vadd.f32 %v2843_v46, %v8674_v2  ;;  %v9231_v30 = vadd.f32 %v3290_v33, %v2928_v13  ;;  %v2679_v39 = vpop.f32.mrb[250].mxu1  ;;  %v3125_v45 = vpop.f32.mrb[250].mxu0  ;;  %v6944_v46 = vld [vmem:[%s7110_s7 + $0x128] sm:$0xff] }
 0x2e3   : > { %v2844_v21 = vrot.slane %v2679_v39, 4  ;;  %v3291_v36 = vrot.slane %v3125_v45, 4  ;;  %v6493_v50 = vpop.f32.mrb[251].mxu0  ;;  %6656 = vmatmul.mubr.msk.f32.gmra.mrb[100].mxu1 %vm251_vm2, %v6942_v63  ;;  %6778 = vmatmul.mubr.msk.f32.gmra.mrb[100].mxu0 %vm251_vm2, %v6941_v40  ;;  %v6371_v3 = vpop.f32.mrb[251].mxu1 }
 0x2e4   : > { %6658 = vmatprep.mubr.msk.f32.mxu1 %vm7013_vm1, %v7012_v1  ;;  %6780 = vmatprep.mubr.msk.f32.mxu0 %vm7013_vm1, %v7012_v1 }
 0x2e5   : > { %v2845_v2 = vsel %vm375_vm0, %v2842_v58, %v2844_v21  ;;  %v3292_v13 = vsel %vm375_vm0, %v3289_v29, %v3291_v36 }
 0x2e6   : > { %v2932_v52 = vadd.f32 %v2845_v2, %v8686_v43  ;;  %v9243_v61 = vadd.f32 %v3292_v13, %v2929_v6  ;;  %v2684_v25 = vpop.f32.mrb[252].mxu1  ;;  %v3130_v55 = vpop.f32.mrb[252].mxu0  ;;  %v6945_v2 = vld [vmem:[%s7110_s7 + $0x130] sm:$0xff] }
 0x2e7   : > { %v2846_v31 = vrot.slane %v2684_v25, 4  ;;  %v3293_v19 = vrot.slane %v3130_v55, 4  ;;  %v6496_v34 = vpop.f32.mrb[253].mxu0  ;;  %6659 = vmatmul.mubr.msk.f32.gmra.mrb[102].mxu1 %vm251_vm2, %v6943_v47  ;;  %6781 = vmatmul.mubr.msk.f32.gmra.mrb[102].mxu0 %vm251_vm2, %v6942_v63  ;;  %v6374_v9 = vpop.f32.mrb[253].mxu1 }
 0x2e8   : > { %6661 = vmatprep.mubr.msk.f32.mxu1 %vm7013_vm1, %v7012_v1  ;;  %6783 = vmatprep.mubr.msk.f32.mxu0 %vm7013_vm1, %v7012_v1 }
 0x2e9   : > { %v2847_v43 = vsel %vm375_vm0, %v2844_v21, %v2846_v31  ;;  %v3294_v6 = vsel %vm375_vm0, %v3291_v36, %v3293_v19 }
 0x2ea   : > { %v2933_v10 = vadd.f32 %v2847_v43, %v8701_v54  ;;  %v9255_v27 = vadd.f32 %v3294_v6, %v2930_v57  ;;  %v2689_v58 = vpop.f32.mrb[254].mxu1  ;;  %v3135_v29 = vpop.f32.mrb[254].mxu0  ;;  %v6946_v43 = vld [vmem:[%s7110_s7 + $0x138] sm:$0xff] }
 0x2eb   : > { %v2848_v49 = vrot.slane %v2689_v58, 4  ;;  %v3295_v40 = vrot.slane %v3135_v29, 4  ;;  %v6499_v5 = vpop.f32.mrb[255].mxu0  ;;  %6662 = vmatmul.mubr.msk.f32.gmra.mrb[104].mxu1 %vm251_vm2, %v6944_v46  ;;  %6784 = vmatmul.mubr.msk.f32.gmra.mrb[104].mxu0 %vm251_vm2, %v6943_v47  ;;  %v6377_v33 = vpop.f32.mrb[255].mxu1 }
 0x2ec   : > { %6664 = vmatprep.mubr.msk.f32.mxu1 %vm7013_vm1, %v7012_v1  ;;  %6786 = vmatprep.mubr.msk.f32.mxu0 %vm7013_vm1, %v7012_v1 }
 0x2ed   : > { %v2849_v54 = vsel %vm375_vm0, %v2846_v31, %v2848_v49  ;;  %v3296_v57 = vsel %vm375_vm0, %v3293_v19, %v3295_v40 }
 0x2ee   : > { %v2934_v39 = vadd.f32 %v2849_v54, %v8719_v42  ;;  %v9267_v45 = vadd.f32 %v3296_v57, %v2931_v48  ;;  %v2694_v21 = vpop.f32.mrb[0].mxu1  ;;  %v3140_v36 = vpop.f32.mrb[0].mxu0  ;;  %v6947_v54 = vld [vmem:[%s7110_s7 + $0x140] sm:$0x3f]  ;;  %s6801_s7 = smul.u32 288, %s7098_s29  ;;  %s196_s29 = sand.u32 1, %s7002_s16  }
 0x2ef   : > { %v2850_v50 = vrot.slane %v2694_v21, 4  ;;  %v3297_v63 = vrot.slane %v3140_v36, 4  ;;  %v6502_v3 = vpop.f32.mrb[1].mxu0  ;;  %6665 = vmatmul.mubr.msk.f32.gmra.mrb[106].mxu1 %vm251_vm2, %v6945_v2  ;;  %6787 = vmatmul.mubr.msk.f32.gmra.mrb[106].mxu0 %vm251_vm2, %v6944_v46  ;;  %v6380_v13 = vpop.f32.mrb[1].mxu1  ;;  %s4902_s9 = sshll.u32 %s196_s29, 1  ;;  %s4798_s22 = scalar_lea.sflag [#allocation3], %s196_s29 }
 0x2f0   : > { %6667 = vmatprep.mubr.msk.f32.mxu1 %vm7013_vm1, %v7012_v1  ;;  %6789 = vmatprep.mubr.msk.f32.mxu0 %vm7013_vm1, %v7012_v1  ;;  %s9371_s8 = scalar_lea.vmem %s9671_s3, %s6801_s7  ;;  %s198_s11 = scalar_lea.vmem [#allocation2], %s4902_s9 }
 0x2f1   : > { %v2851_v42 = vsel %vm375_vm0, %v2848_v49, %v2850_v50  ;;  %v3298_v48 = vsel %vm375_vm0, %v3295_v40, %v3297_v63  ;;  %s4814_s12 = sshll.u32 %s198_s11, 4  ;;  %s9628_s12 = int_to_ptr.vmem [resolvable:$true] %s4814_s12 }
 0x2f2   : > { %v2935_v25 = vadd.f32 %v2851_v42, %v8737_v14  ;;  %v9279_v55 = vadd.f32 %v3298_v48, %v2932_v52  ;;  %v2699_v31 = vpop.f32.mrb[2].mxu1  ;;  %v3145_v19 = vpop.f32.mrb[2].mxu0  ;;  %s6948_s19 = scalar_lea.vmem %s9628_s12, 32  ;;  %p6955_p0 = scmp.lt.s32.totalorder %s9628_s12, %s6953_s27 }
 0x2f3   : > { %v2852_v34 = vrot.slane %v2699_v31, 4  ;;  %v3299_v47 = vrot.slane %v3145_v19, 4  ;;  %v6505_v9 = vpop.f32.mrb[3].mxu0  ;;  %6668 = vmatmul.mubr.msk.f32.gmra.mrb[108].mxu1 %vm251_vm2, %v6946_v43  ;;  %6790 = vmatmul.mubr.msk.f32.gmra.mrb[108].mxu0 %vm251_vm2, %v6945_v2  ;;  %v6383_v6 = vpop.f32.mrb[3].mxu1  ;;  %p6949_p11 = scmp.ne.s32.totalorder %s9628_s12, %s6948_s19  ;;  %p6956_p1 = scmp.lt.s32.totalorder %s6954_s28, %s6948_s19 }
 0x2f4   : > { %6670 = vmatprep.mubr.msk.f32.mxu1 %vm7013_vm1, %v7012_v1  ;;  %6792 = vmatprep.mubr.msk.f32.mxu0 %vm7013_vm1, %v7012_v1 }
 0x2f5   : > { %v2853_v14 = vsel %vm375_vm0, %v2850_v50, %v2852_v34  ;;  %v3300_v52 = vsel %vm375_vm0, %v3297_v63, %v3299_v47  ;;  %p6950_p12 = pnand %p6949_p11, %p7079_p5  ;;  %p6957_p2 = por %p6956_p1, %p6955_p0 }
 0x2f6   : > { %v2936_v58 = vadd.f32 %v2853_v14, %v8755_v16  ;;  %v9291_v29 = vadd.f32 %v3300_v52, %v2933_v10  ;;  %v2704_v49 = vpop.f32.mrb[4].mxu1  ;;  %v3150_v40 = vpop.f32.mrb[4].mxu0 }
 0x2f7   : > { %v2854_v5 = vrot.slane %v2704_v49, 4  ;;  %v3301_v46 = vrot.slane %v3150_v40, 4  ;;  %v6508_v33 = vpop.f32.mrb[5].mxu0  ;;  %6671 = vmatmul.mubr.msk.f32.gmra.mrb[110].mxu1 %vm251_vm2, %v6947_v54  ;;  %6793 = vmatmul.mubr.msk.f32.gmra.mrb[110].mxu0 %vm251_vm2, %v6946_v43  ;;  %v6386_v57 = vpop.f32.mrb[5].mxu1  ;;  %p6951_p13 = pneg %p6950_p12 }
 0x2f8   : > { %6795 = vmatprep.mubr.msk.f32.mxu0 %vm7013_vm1, %v7012_v1 }
 0x2f9   : > { %v2855_v21 = vsel %vm375_vm0, %v2852_v34, %v2854_v5  ;;  %v3302_v16 = vsel %vm375_vm0, %v3299_v47, %v3301_v46  ;;  %p6958_p3 = pnand %p6957_p2, %p6951_p13 }
 0x2fa   : > { %v2937_v10 = vadd.f32 %v2855_v21, %v8773_v18  ;;  %v9301_v36 = vadd.f32 %v3302_v16, %v2934_v39  ;;  %v2709_v50 = vpop.f32.mrb[6].mxu1  ;;  %v3155_v63 = vpop.f32.mrb[6].mxu0 }
 0x2fb   : > { %v2856_v3 = vrot.slane %v2709_v50, 4  ;;  %v3303_v2 = vrot.slane %v3155_v63, 4  ;;  %v6511_v13 = vpop.f32.mrb[7].mxu0  ;;  %6796 = vmatmul.mubr.msk.f32.gmra.mrb[112].mxu0 %vm251_vm2, %v6947_v54  ;;  %v6389_v42 = vpop.f32.mrb[7].mxu1 }
 0x2fd   : > { %v2857_v48 = vsel %vm375_vm0, %v2854_v5, %v2856_v3  ;;  %v3304_v1 = vsel %vm375_vm0, %v3301_v46, %v3303_v2 }
 0x2fe   : > { %v2938_v31 = vadd.f32 %v2857_v48, %v8791_v20  ;;  %v9307_v19 = vadd.f32 %v3304_v1, %v2935_v25  ;;  %v2714_v34 = vpop.f32.mrb[8].mxu1  ;;  %v3160_v18 = vpop.f32.mrb[8].mxu0 }
 0x2ff   : > { %v2858_v39 = vrot.slane %v2714_v34, 4  ;;  %v3305_v47 = vrot.slane %v3160_v18, 4  ;;  %v6514_v9 = vpop.f32.mrb[9].mxu0  ;;  %v6392_v43 = vpop.f32.mrb[9].mxu1 }
 0x301   : > { %v2859_v6 = vsel %vm375_vm0, %v2856_v3, %v2858_v39  ;;  %v3306_v14 = vsel %vm375_vm0, %v3303_v2, %v3305_v47 }
 0x302   : > { %v2939_v52 = vadd.f32 %v2859_v6, %v8809_v22  ;;  %v9312_v49 = vadd.f32 %v3306_v14, %v2936_v58  ;;  %v2719_v40 = vpop.f32.mrb[10].mxu1  ;;  %v3165_v5 = vpop.f32.mrb[10].mxu0 }
 0x303   : > { %v2860_v46 = vrot.slane %v2719_v40, 4  ;;  %v3307_v20 = vrot.slane %v3165_v5, 4  ;;  %v6517_v25 = vpop.f32.mrb[11].mxu0  ;;  %v6395_v33 = vpop.f32.mrb[11].mxu1 }
 0x305   : > { %v2861_v54 = vsel %vm375_vm0, %v2858_v39, %v2860_v46  ;;  %v3308_v57 = vsel %vm375_vm0, %v3305_v47, %v3307_v20 }
 0x306   : > { %v2940_v21 = vadd.f32 %v2861_v54, %v8827_v32  ;;  %v9317_v16 = vadd.f32 %v3308_v57, %v2937_v10  ;;  %v2724_v50 = vpop.f32.mrb[12].mxu1  ;;  %v3170_v63 = vpop.f32.mrb[12].mxu0 }
 0x307   : > { %v2862_v3 = vrot.slane %v2724_v50, 4  ;;  %v3309_v22 = vrot.slane %v3170_v63, 4  ;;  %v6520_v58 = vpop.f32.mrb[13].mxu0  ;;  %v6398_v2 = vpop.f32.mrb[13].mxu1 }
 0x309   : > { %v2863_v13 = vsel %vm375_vm0, %v2860_v46, %v2862_v3  ;;  %v3310_v42 = vsel %vm375_vm0, %v3307_v20, %v3309_v22 }
 0x30a   : > { %v2941_v48 = vadd.f32 %v2863_v13, %v8845_v35  ;;  %v9322_v1 = vadd.f32 %v3310_v42, %v2938_v31  ;;  %v2729_v34 = vpop.f32.mrb[14].mxu1  ;;  %v3175_v18 = vpop.f32.mrb[14].mxu0 }
 0x30b   : > { %v2864_v39 = vrot.slane %v2729_v34, 4  ;;  %v3311_v32 = vrot.slane %v3175_v18, 4  ;;  %v6523_v10 = vpop.f32.mrb[15].mxu0  ;;  %v6401_v47 = vpop.f32.mrb[15].mxu1 }
 0x30d   : > { %v2865_v9 = vsel %vm375_vm0, %v2862_v3, %v2864_v39  ;;  %v3312_v43 = vsel %vm375_vm0, %v3309_v22, %v3311_v32 }
 0x30e   : > { %v2942_v6 = vadd.f32 %v2865_v9, %v8863_v53  ;;  %v9327_v14 = vadd.f32 %v3312_v43, %v2939_v52  ;;  %v2734_v40 = vpop.f32.mrb[16].mxu1  ;;  %v3180_v5 = vpop.f32.mrb[16].mxu0 }
 0x30f   : > { %v2866_v46 = vrot.slane %v2734_v40, 4  ;;  %v3313_v35 = vrot.slane %v3180_v5, 4  ;;  %v6526_v31 = vpop.f32.mrb[17].mxu0  ;;  %v6404_v20 = vpop.f32.mrb[17].mxu1 }
 0x311   : > { %v2867_v25 = vsel %vm375_vm0, %v2864_v39, %v2866_v46  ;;  %v3314_v33 = vsel %vm375_vm0, %v3311_v32, %v3313_v35 }
 0x312   : > { %v2943_v54 = vadd.f32 %v2867_v25, %v8881_v11  ;;  %v9332_v57 = vadd.f32 %v3314_v33, %v2940_v21  ;;  %v2739_v50 = vpop.f32.mrb[18].mxu1  ;;  %v3185_v63 = vpop.f32.mrb[18].mxu0 }
 0x313   : > { %v2868_v3 = vrot.slane %v2739_v50, 4  ;;  %v3315_v53 = vrot.slane %v3185_v63, 4  ;;  %v6529_v52 = vpop.f32.mrb[19].mxu0  ;;  %v6407_v22 = vpop.f32.mrb[19].mxu1 }
 0x315   : > { %v2869_v58 = vsel %vm375_vm0, %v2866_v46, %v2868_v3  ;;  %v3316_v2 = vsel %vm375_vm0, %v3313_v35, %v3315_v53 }
 0x316   : > { %v2944_v13 = vadd.f32 %v2869_v58, %v8899_v37  ;;  %v9337_v42 = vadd.f32 %v3316_v2, %v2941_v48  ;;  %v2744_v34 = vpop.f32.mrb[20].mxu1  ;;  %v3190_v18 = vpop.f32.mrb[20].mxu0 }
 0x317   : > { %v2870_v39 = vrot.slane %v2744_v34, 4  ;;  %v3317_v11 = vrot.slane %v3190_v18, 4  ;;  %v6532_v21 = vpop.f32.mrb[21].mxu0  ;;  %v6410_v32 = vpop.f32.mrb[21].mxu1 }
 0x319   : > { %v2871_v10 = vsel %vm375_vm0, %v2868_v3, %v2870_v39  ;;  %v3318_v47 = vsel %vm375_vm0, %v3315_v53, %v3317_v11 }
 0x31a   : > { %v2945_v9 = vadd.f32 %v2871_v10, %v8917_v4  ;;  %v9342_v43 = vadd.f32 %v3318_v47, %v2942_v6  ;;  %v2749_v40 = vpop.f32.mrb[22].mxu1  ;;  %v3195_v5 = vpop.f32.mrb[22].mxu0 }
 0x31b   : > { %v2872_v46 = vrot.slane %v2749_v40, 4  ;;  %v3319_v37 = vrot.slane %v3195_v5, 4  ;;  %v6535_v48 = vpop.f32.mrb[23].mxu0  ;;  %v6413_v35 = vpop.f32.mrb[23].mxu1 }
 0x31d   : > { %v2873_v31 = vsel %vm375_vm0, %v2870_v39, %v2872_v46  ;;  %v3320_v20 = vsel %vm375_vm0, %v3317_v11, %v3319_v37 }
 0x31e   : > { %v2946_v25 = vadd.f32 %v2873_v31, %v8935_v28  ;;  %v9347_v33 = vadd.f32 %v3320_v20, %v2943_v54  ;;  %v2754_v50 = vpop.f32.mrb[24].mxu1  ;;  %v3200_v63 = vpop.f32.mrb[24].mxu0 }
 0x31f   : > { %v2874_v3 = vrot.slane %v2754_v50, 4  ;;  %v3321_v4 = vrot.slane %v3200_v63, 4  ;;  %v6538_v6 = vpop.f32.mrb[25].mxu0  ;;  %v6416_v53 = vpop.f32.mrb[25].mxu1 }
 0x321   : > { %v2875_v52 = vsel %vm375_vm0, %v2872_v46, %v2874_v3  ;;  %v3322_v22 = vsel %vm375_vm0, %v3319_v37, %v3321_v4 }
 0x322   : > { %v2947_v58 = vadd.f32 %v2875_v52, %v8951_v51  ;;  %v9352_v2 = vadd.f32 %v3322_v22, %v2944_v13  ;;  %v3205_v34 = vpop.f32.mrb[26].mxu0  ;;  %v2759_v18 = vpop.f32.mrb[26].mxu1 }
 0x323   : > { %v3323_v39 = vrot.slane %v3205_v34, 4  ;;  %v6541_v28 = vpop.f32.mrb[27].mxu0  ;;  %v6419_v54 = vpop.f32.mrb[27].mxu1 }
 0x325   : > { %v3324_v11 = vsel %vm375_vm0, %v3321_v4, %v3323_v39 }
 0x326   : > { %v9355_v21 = vadd.f32 %v3324_v11, %v2945_v9  ;;  %v3210_v32 = vpop.f32.mrb[28].mxu0  ;;  %v2763_v10 = vpop.f32.mrb[28].mxu1 }
 0x327   : > { %v3325_v47 = vrot.slane %v3210_v32, 4  ;;  %v6544_v40 = vpop.f32.mrb[29].mxu0  ;;  %v6422_v5 = vpop.f32.mrb[29].mxu1 }
 0x329   : > { %v3326_v46 = vsel %vm375_vm0, %v3323_v39, %v3325_v47 }
 0x32a   : > { %v9358_v37 = vadd.f32 %v3326_v46, %v2946_v25  ;;  %v3215_v51 = vpop.f32.mrb[30].mxu0  ;;  %v3472_v13 = vpop.f32.mrb[30].mxu1 }
 0x32b   : > { %v3327_v48 = vrot.slane %v3215_v51, 4  ;;  %v6547_v35 = vpop.f32.mrb[31].mxu0  ;;  %v6552_v31 = vpop.f32.mrb[31].mxu1 }
 0x32c   : > { %v4385_v13 = vpop.permute.xlu0 %4384 }
 0x32d   : > { %v3328_v20 = vsel %vm375_vm0, %v3325_v47, %v3327_v48 }
 0x32e   : > { %v9361_v50 = vadd.f32 %v3328_v20, %v2947_v58  ;;  %v3926_v9 = vpop.f32.mrb[32].mxu0  ;;  %v3476_v63 = vpop.f32.mrb[32].mxu1 }
 0x32f   : > { %v6677_v3 = vpop.f32.mrb[33].mxu0  ;;  %v6555_v4 = vpop.f32.mrb[33].mxu1 }
 0x332   : > { %v3930_v6 = vpop.f32.mrb[34].mxu0  ;;  %v3480_v53 = vpop.f32.mrb[34].mxu1 }
 0x333   : > { %v6680_v52 = vpop.f32.mrb[35].mxu0  ;;  %v6558_v22 = vpop.f32.mrb[35].mxu1 }
 0x336   : > { %v3934_v34 = vpop.f32.mrb[36].mxu0  ;;  %v3484_v25 = vpop.f32.mrb[36].mxu1 }
 0x337   : > { %v6683_v18 = vpop.f32.mrb[37].mxu0  ;;  %v6561_v39 = vpop.f32.mrb[37].mxu1 }
 0x33a   : > { %v3938_v28 = vpop.f32.mrb[38].mxu0  ;;  %v3488_v54 = vpop.f32.mrb[38].mxu1 }
 0x33b   : > { %v6686_v11 = vpop.f32.mrb[39].mxu0  ;;  %v6564_v32 = vpop.f32.mrb[39].mxu1  ;;  %v3710_v47 = vrot.slane %v3488_v54, 5 }
 0x33e   : > { %v3493_v10 = vpop.f32.mrb[40].mxu1  ;;  %v3942_v58 = vpop.f32.mrb[40].mxu0 }
 0x33f   : > { %v3711_v40 = vrot.slane %v3493_v10, 5  ;;  %v6689_v5 = vpop.f32.mrb[41].mxu0  ;;  %v6567_v46 = vpop.f32.mrb[41].mxu1  ;;  %v4164_v20 = vrot.slane %v3942_v58, 6 }
 0x340   : > { %v4395_v10 = vpop.permute.xlu1 %4394  ;;  %v4390_v58 = vpop.permute.xlu0 %4389 }
 0x341   : > { %v3712_v51 = vsel %vm3709_vm6, %v3710_v47, %v3711_v40 }
 0x342   : > { %v3819_v48 = vadd.f32 %v3712_v51, %v9039_v24  ;;  %v3498_v35 = vpop.f32.mrb[42].mxu1  ;;  %v3947_v31 = vpop.f32.mrb[42].mxu0 }
 0x343   : > { %v3713_v9 = vrot.slane %v3498_v35, 5  ;;  %v4165_v63 = vrot.slane %v3947_v31, 6  ;;  %v6692_v3 = vpop.f32.mrb[43].mxu0  ;;  %v6570_v4 = vpop.f32.mrb[43].mxu1 }
 0x345   : > { %v3714_v6 = vsel %vm3709_vm6, %v3711_v40, %v3713_v9  ;;  %v4166_v53 = vsel %vm4163_vm7, %v4164_v20, %v4165_v63 }
 0x346   : > { %v3820_v24 = vadd.f32 %v3714_v6, %v9051_v44  ;;  %v3503_v52 = vpop.f32.mrb[44].mxu1  ;;  %v3952_v22 = vpop.f32.mrb[44].mxu0  ;;  %v4273_v34 = vadd.f32 %v4166_v53, %v3819_v48 }
 0x347   : > { %v3715_v25 = vrot.slane %v3503_v52, 5  ;;  %v4167_v18 = vrot.slane %v3952_v22, 6  ;;  %v6695_v39 = vpop.f32.mrb[45].mxu0  ;;  %v6573_v28 = vpop.f32.mrb[45].mxu1 }
 0x348   : > { %4310 = vst.msk [vmem:[%s9371_s8] sm:$0xff] %vm4309_vm8, %v4273_v34  ;;  %v4562_v54 = vmul.f32 %v4385_v13, %v4273_v34 }
 0x349   : > { %v3716_v11 = vsel %vm3709_vm6, %v3713_v9, %v3715_v25  ;;  %v4168_v32 = vsel %vm4163_vm7, %v4165_v63, %v4167_v18 }
 0x34a   : > { %v3821_v47 = vadd.f32 %v3716_v11, %v9063_v38  ;;  %v3508_v44 = vpop.f32.mrb[46].mxu1  ;;  %v3957_v40 = vpop.f32.mrb[46].mxu0  ;;  %v4274_v5 = vadd.f32 %v4168_v32, %v3820_v24  ;;  %v4675_v31 = vmul.f32 %v4562_v54, %v4273_v34  ;;  %v4598_v13 = vsel %vm4309_vm8, %v4562_v54, 0.0 }
 0x34b   : > { %v3717_v46 = vrot.slane %v3508_v44, 5  ;;  %v4169_v51 = vrot.slane %v3957_v40, 6  ;;  %v6698_v48 = vpop.f32.mrb[47].mxu0  ;;  %v6576_v35 = vpop.f32.mrb[47].mxu1 }
 0x34c   : > { %4311 = vst.msk [vmem:[%s9371_s8 + $0x8] sm:$0xff] %vm4309_vm8, %v4274_v5  ;;  %v4563_v20 = vmul.f32 %v4390_v58, %v4274_v5  ;;  %v4711_v11 = vsel %vm4309_vm8, %v4675_v31, 0.0  ;;  %v4400_v58 = vpop.permute.xlu1 %4399 }
 0x34d   : > { %v3718_v9 = vsel %vm3709_vm6, %v3715_v25, %v3717_v46  ;;  %v4170_v63 = vsel %vm4163_vm7, %v4167_v18, %v4169_v51 }
 0x34e   : > { %v3822_v38 = vadd.f32 %v3718_v9, %v9075_v26  ;;  %v4275_v3 = vadd.f32 %v4170_v63, %v3821_v47  ;;  %v4599_v4 = vsel %vm4309_vm8, %v4563_v20, 0.0  ;;  %v4676_v6 = vmul.f32 %v4563_v20, %v4274_v5  ;;  %v3513_v53 = vpop.f32.mrb[48].mxu1  ;;  %v3962_v24 = vpop.f32.mrb[48].mxu0 }
 0x34f   : > { %v4600_v52 = vadd.f32 %v4599_v4, %v4598_v13  ;;  %v3719_v22 = vrot.slane %v3513_v53, 5  ;;  %v4171_v34 = vrot.slane %v3962_v24, 6  ;;  %v6701_v39 = vpop.f32.mrb[49].mxu0  ;;  %v6579_v28 = vpop.f32.mrb[49].mxu1 }
 0x350   : > { %4312 = vst.msk [vmem:[%s9371_s8 + $0x10] sm:$0xff] %vm4309_vm8, %v4275_v3  ;;  %v4564_v25 = vmul.f32 %v4395_v10, %v4275_v3  ;;  %v4712_v18 = vsel %vm4309_vm8, %v4676_v6, 0.0  ;;  %v4405_v4 = vpop.permute.xlu0 %4404 }
 0x351   : > { %v4713_v54 = vadd.f32 %v4712_v18, %v4711_v11  ;;  %v3720_v26 = vsel %vm3709_vm6, %v3717_v46, %v3719_v22  ;;  %v4172_v32 = vsel %vm4163_vm7, %v4169_v51, %v4171_v34 }
 0x352   : > { %v4601_v47 = vsel %vm4309_vm8, %v4564_v25, 0.0  ;;  %v4677_v44 = vmul.f32 %v4564_v25, %v4275_v3  ;;  %v3823_v40 = vadd.f32 %v3720_v26, %v9087_v17  ;;  %v4276_v5 = vadd.f32 %v4172_v32, %v3822_v38  ;;  %v3518_v48 = vpop.f32.mrb[50].mxu1  ;;  %v3967_v35 = vpop.f32.mrb[50].mxu0 }
 0x353   : > { %v4602_v31 = vadd.f32 %v4601_v47, %v4600_v52  ;;  %v3721_v20 = vrot.slane %v3518_v48, 5  ;;  %v4173_v10 = vrot.slane %v3967_v35, 6  ;;  %v6704_v13 = vpop.f32.mrb[51].mxu0  ;;  %v6582_v9 = vpop.f32.mrb[51].mxu1 }
 0x354   : > { %v4714_v63 = vsel %vm4309_vm8, %v4677_v44, 0.0  ;;  %4313 = vst.msk [vmem:[%s9371_s8 + $0x18] sm:$0xff] %vm4309_vm8, %v4276_v5  ;;  %v4565_v46 = vmul.f32 %v4400_v58, %v4276_v5 }
 0x355   : > { %v4715_v51 = vadd.f32 %v4714_v63, %v4713_v54  ;;  %v3722_v3 = vsel %vm3709_vm6, %v3719_v22, %v3721_v20  ;;  %v4174_v17 = vsel %vm4163_vm7, %v4171_v34, %v4173_v10  ;;  %v4410_v34 = vpop.permute.xlu1 %4409 }
 0x356   : > { %v4603_v38 = vsel %vm4309_vm8, %v4565_v46, 0.0  ;;  %v4678_v6 = vmul.f32 %v4565_v46, %v4276_v5  ;;  %v3824_v53 = vadd.f32 %v3722_v3, %v9099_v41  ;;  %v4277_v24 = vadd.f32 %v4174_v17, %v3823_v40  ;;  %v3523_v52 = vpop.f32.mrb[52].mxu1  ;;  %v3972_v39 = vpop.f32.mrb[52].mxu0 }
 0x357   : > { %v4604_v28 = vadd.f32 %v4603_v38, %v4602_v31  ;;  %v3723_v11 = vrot.slane %v3523_v52, 5  ;;  %v4175_v25 = vrot.slane %v3972_v39, 6  ;;  %v6707_v18 = vpop.f32.mrb[53].mxu0  ;;  %v6585_v26 = vpop.f32.mrb[53].mxu1 }
 0x358   : > { %v4716_v54 = vsel %vm4309_vm8, %v4678_v6, 0.0  ;;  %4314 = vst.msk [vmem:[%s9371_s8 + $0x20] sm:$0xff] %vm4309_vm8, %v4277_v24  ;;  %v4566_v22 = vmul.f32 %v4405_v4, %v4277_v24 }
 0x359   : > { %v4717_v32 = vadd.f32 %v4716_v54, %v4715_v51  ;;  %v3724_v58 = vsel %vm3709_vm6, %v3721_v20, %v3723_v11  ;;  %v4176_v41 = vsel %vm4163_vm7, %v4173_v10, %v4175_v25  ;;  %v4415_v10 = vpop.permute.xlu0 %4414 }
 0x35a   : > { %v4605_v47 = vsel %vm4309_vm8, %v4566_v22, 0.0  ;;  %v4679_v44 = vmul.f32 %v4566_v22, %v4277_v24  ;;  %v3825_v40 = vadd.f32 %v3724_v58, %v9111_v8  ;;  %v4278_v5 = vadd.f32 %v4176_v41, %v3824_v53  ;;  %v3528_v48 = vpop.f32.mrb[54].mxu1  ;;  %v3977_v35 = vpop.f32.mrb[54].mxu0 }
 0x35b   : > { %v4606_v31 = vadd.f32 %v4605_v47, %v4604_v28  ;;  %v3725_v13 = vrot.slane %v3528_v48, 5  ;;  %v4177_v9 = vrot.slane %v3977_v35, 6  ;;  %v6710_v63 = vpop.f32.mrb[55].mxu0  ;;  %v6588_v46 = vpop.f32.mrb[55].mxu1 }
 0x35c   : > { %v4718_v51 = vsel %vm4309_vm8, %v4679_v44, 0.0  ;;  %4315 = vst.msk [vmem:[%s9371_s8 + $0x28] sm:$0xff] %vm4309_vm8, %v4278_v5  ;;  %v4567_v20 = vmul.f32 %v4410_v34, %v4278_v5 }
 0x35d   : > { %v4719_v4 = vadd.f32 %v4718_v51, %v4717_v32  ;;  %v3726_v3 = vsel %vm3709_vm6, %v3723_v11, %v3725_v13  ;;  %v4178_v8 = vsel %vm4163_vm7, %v4175_v25, %v4177_v9  ;;  %v4420_v25 = vpop.permute.xlu1 %4419 }
 0x35e   : > { %v4607_v17 = vsel %vm4309_vm8, %v4567_v20, 0.0  ;;  %v4680_v38 = vmul.f32 %v4567_v20, %v4278_v5  ;;  %v3826_v6 = vadd.f32 %v3726_v3, %v9123_v62  ;;  %v4279_v53 = vadd.f32 %v4178_v8, %v3825_v40  ;;  %v3533_v24 = vpop.f32.mrb[56].mxu1  ;;  %v3982_v52 = vpop.f32.mrb[56].mxu0 }
 0x35f   : > { %v4608_v39 = vadd.f32 %v4607_v17, %v4606_v31  ;;  %v3727_v28 = vrot.slane %v3533_v24, 5  ;;  %v4179_v18 = vrot.slane %v3982_v52, 6  ;;  %v6713_v26 = vpop.f32.mrb[57].mxu0  ;;  %v6591_v54 = vpop.f32.mrb[57].mxu1 }
 0x360   : > { %v4720_v22 = vsel %vm4309_vm8, %v4680_v38, 0.0  ;;  %4316 = vst.msk [vmem:[%s9371_s8 + $0x30] sm:$0xff] %vm4309_vm8, %v4279_v53  ;;  %v4568_v11 = vmul.f32 %v4415_v10, %v4279_v53  ;;  %v4425_v20 = vpop.permute.xlu0 %4424 }
 0x361   : > { %v4721_v32 = vadd.f32 %v4720_v22, %v4719_v4  ;;  %v3728_v34 = vsel %vm3709_vm6, %v3725_v13, %v3727_v28  ;;  %v4180_v62 = vsel %vm4163_vm7, %v4177_v9, %v4179_v18  ;;  %v4430_v22 = vpop.permute.xlu1 %4429 }
 0x362   : > { %v4609_v58 = vsel %vm4309_vm8, %v4568_v11, 0.0  ;;  %v4681_v41 = vmul.f32 %v4568_v11, %v4279_v53  ;;  %v3827_v47 = vadd.f32 %v3728_v34, %v9135_v23  ;;  %v4280_v44 = vadd.f32 %v4180_v62, %v3826_v6  ;;  %v3538_v40 = vpop.f32.mrb[58].mxu1  ;;  %v3987_v5 = vpop.f32.mrb[58].mxu0 }
 0x363   : > { %v4610_v48 = vadd.f32 %v4609_v58, %v4608_v39  ;;  %v3729_v35 = vrot.slane %v3538_v40, 5  ;;  %v4181_v31 = vrot.slane %v3987_v5, 6  ;;  %v6716_v63 = vpop.f32.mrb[59].mxu0  ;;  %v6594_v46 = vpop.f32.mrb[59].mxu1 }
 0x364   : > { %v4722_v51 = vsel %vm4309_vm8, %v4681_v41, 0.0  ;;  %4317 = vst.msk [vmem:[%s9371_s8 + $0x38] sm:$0xff] %vm4309_vm8, %v4280_v44  ;;  %v4569_v13 = vmul.f32 %v4420_v25, %v4280_v44  ;;  %v4435_v46 = vpop.permute.xlu0 %4434 }
 0x365   : > { %v4723_v9 = vadd.f32 %v4722_v51, %v4721_v32  ;;  %v3730_v4 = vsel %vm3709_vm6, %v3727_v28, %v3729_v35  ;;  %v4182_v23 = vsel %vm4163_vm7, %v4179_v18, %v4181_v31 }
 0x366   : > { %v4611_v10 = vsel %vm4309_vm8, %v4569_v13, 0.0  ;;  %v4682_v3 = vmul.f32 %v4569_v13, %v4280_v44  ;;  %v3828_v8 = vadd.f32 %v3730_v4, %v9147_v12  ;;  %v4281_v17 = vadd.f32 %v4182_v23, %v3827_v47  ;;  %v3543_v38 = vpop.f32.mrb[60].mxu1  ;;  %v3992_v6 = vpop.f32.mrb[60].mxu0 }
 0x367   : > { %v4612_v53 = vadd.f32 %v4611_v10, %v4610_v48  ;;  %v3731_v24 = vrot.slane %v3543_v38, 5  ;;  %v4183_v52 = vrot.slane %v3992_v6, 6  ;;  %v6719_v39 = vpop.f32.mrb[61].mxu0  ;;  %v6597_v26 = vpop.f32.mrb[61].mxu1 }
 0x368   : > { %v4724_v54 = vsel %vm4309_vm8, %v4682_v3, 0.0  ;;  %4318 = vst.msk [vmem:[%s9371_s8 + $0x40] sm:$0xff] %vm4309_vm8, %v4281_v17  ;;  %v4570_v28 = vmul.f32 %v4425_v20, %v4281_v17  ;;  %v4440_v39 = vpop.permute.xlu1 %4439 }
 0x369   : > { %v4725_v18 = vadd.f32 %v4724_v54, %v4723_v9  ;;  %v3732_v11 = vsel %vm3709_vm6, %v3729_v35, %v3731_v24  ;;  %v4184_v12 = vsel %vm4163_vm7, %v4181_v31, %v4183_v52 }
 0x36a   : > { %v4613_v32 = vsel %vm4309_vm8, %v4570_v28, 0.0  ;;  %v4683_v25 = vmul.f32 %v4570_v28, %v4281_v17  ;;  %v3829_v34 = vadd.f32 %v3732_v11, %v9159_v59  ;;  %v4282_v62 = vadd.f32 %v4184_v12, %v3828_v8  ;;  %v3548_v58 = vpop.f32.mrb[62].mxu1  ;;  %v3997_v41 = vpop.f32.mrb[62].mxu0 }
 0x36b   : > { %v4614_v47 = vadd.f32 %v4613_v32, %v4612_v53  ;;  %v3733_v44 = vrot.slane %v3548_v58, 5  ;;  %v4185_v40 = vrot.slane %v3997_v41, 6  ;;  %v6722_v5 = vpop.f32.mrb[63].mxu0  ;;  %v6600_v48 = vpop.f32.mrb[63].mxu1 }
 0x36c   : > { %v4726_v63 = vsel %vm4309_vm8, %v4683_v25, 0.0  ;;  %4319 = vst.msk [vmem:[%s9371_s8 + $0x48] sm:$0xff] %vm4309_vm8, %v4282_v62  ;;  %v4571_v35 = vmul.f32 %v4430_v22, %v4282_v62 }
 0x36d   : > { %v4727_v31 = vadd.f32 %v4726_v63, %v4725_v18  ;;  %v3734_v51 = vsel %vm3709_vm6, %v3731_v24, %v3733_v44  ;;  %v4186_v59 = vsel %vm4163_vm7, %v4183_v52, %v4185_v40 }
 0x36e   : > { %v4615_v13 = vsel %vm4309_vm8, %v4571_v35, 0.0  ;;  %v4684_v20 = vmul.f32 %v4571_v35, %v4282_v62  ;;  %v3830_v9 = vadd.f32 %v3734_v51, %v9171_v56  ;;  %v4283_v4 = vadd.f32 %v4186_v59, %v3829_v34  ;;  %v3553_v23 = vpop.f32.mrb[64].mxu1  ;;  %v4002_v10 = vpop.f32.mrb[64].mxu0 }
 0x36f   : > { %v4616_v3 = vadd.f32 %v4615_v13, %v4614_v47  ;;  %v3735_v8 = vrot.slane %v3553_v23, 5  ;;  %v4187_v17 = vrot.slane %v4002_v10, 6  ;;  %v6725_v38 = vpop.f32.mrb[65].mxu0  ;;  %v6603_v6 = vpop.f32.mrb[65].mxu1 }
 0x370   : > { %v4728_v53 = vsel %vm4309_vm8, %v4684_v20, 0.0  ;;  %4320 = vst.msk [vmem:[%s9371_s8 + $0x50] sm:$0xff] %vm4309_vm8, %v4283_v4  ;;  %v4572_v24 = vmul.f32 %v4435_v46, %v4283_v4 }
 0x371   : > { %v4729_v52 = vadd.f32 %v4728_v53, %v4727_v31  ;;  %v3736_v26 = vsel %vm3709_vm6, %v3733_v44, %v3735_v8  ;;  %v4188_v56 = vsel %vm4163_vm7, %v4185_v40, %v4187_v17  ;;  %v4445_v44 = vpop.permute.xlu0 %4444 }
 0x372   : > { %v4617_v54 = vsel %vm4309_vm8, %v4572_v24, 0.0  ;;  %v4685_v28 = vmul.f32 %v4572_v24, %v4283_v4  ;;  %v3831_v22 = vadd.f32 %v3736_v26, %v9183_v60  ;;  %v4284_v18 = vadd.f32 %v4188_v56, %v3830_v9  ;;  %v3558_v11 = vpop.f32.mrb[66].mxu1  ;;  %v4007_v12 = vpop.f32.mrb[66].mxu0 }
 0x373   : > { %v4618_v32 = vadd.f32 %v4617_v54, %v4616_v3  ;;  %v3737_v25 = vrot.slane %v3558_v11, 5  ;;  %v4189_v34 = vrot.slane %v4007_v12, 6  ;;  %v6728_v62 = vpop.f32.mrb[67].mxu0  ;;  %v6606_v58 = vpop.f32.mrb[67].mxu1 }
 0x374   : > { %v4730_v41 = vsel %vm4309_vm8, %v4685_v28, 0.0  ;;  %4321 = vst.msk [vmem:[%s9371_s8 + $0x58] sm:$0xff] %vm4309_vm8, %v4284_v18  ;;  %v4573_v47 = vmul.f32 %v4440_v39, %v4284_v18  ;;  %v4450_v3 = vpop.permute.xlu1 %4449 }
 0x375   : > { %v4731_v40 = vadd.f32 %v4730_v41, %v4729_v52  ;;  %v3738_v5 = vsel %vm3709_vm6, %v3735_v8, %v3737_v25  ;;  %v4190_v60 = vsel %vm4163_vm7, %v4187_v17, %v4189_v34  ;;  %v4455_v12 = vpop.permute.xlu0 %4454 }
 0x376   : > { %v4619_v48 = vsel %vm4309_vm8, %v4573_v47, 0.0  ;;  %v4686_v63 = vmul.f32 %v4573_v47, %v4284_v18  ;;  %v3832_v35 = vadd.f32 %v3738_v5, %v9195_v0  ;;  %v4285_v46 = vadd.f32 %v4190_v60, %v3831_v22  ;;  %v3563_v31 = vpop.f32.mrb[68].mxu1  ;;  %v4012_v51 = vpop.f32.mrb[68].mxu0 }
 0x377   : > { %v4620_v59 = vadd.f32 %v4619_v48, %v4618_v32  ;;  %v3739_v13 = vrot.slane %v3563_v31, 5  ;;  %v4191_v20 = vrot.slane %v4012_v51, 6  ;;  %v6731_v9 = vpop.f32.mrb[69].mxu0  ;;  %v6609_v4 = vpop.f32.mrb[69].mxu1 }
 0x378   : > { %v4732_v23 = vsel %vm4309_vm8, %v4686_v63, 0.0  ;;  %4322 = vst.msk [vmem:[%s9371_s8 + $0x60] sm:$0xff] %vm4309_vm8, %v4285_v46  ;;  %v4574_v10 = vmul.f32 %v4445_v44, %v4285_v46  ;;  %v4460_v31 = vpop.permute.xlu1 %4459 }
 0x379   : > { %v4733_v8 = vadd.f32 %v4732_v23, %v4731_v40  ;;  %v3740_v17 = vsel %vm3709_vm6, %v3737_v25, %v3739_v13  ;;  %v4192_v0 = vsel %vm4163_vm7, %v4189_v34, %v4191_v20 }
 0x37a   : > { %v4621_v38 = vsel %vm4309_vm8, %v4574_v10, 0.0  ;;  %v4687_v6 = vmul.f32 %v4574_v10, %v4285_v46  ;;  %v3833_v53 = vadd.f32 %v3740_v17, %v9207_v7  ;;  %v4286_v24 = vadd.f32 %v4192_v0, %v3832_v35  ;;  %v3568_v39 = vpop.f32.mrb[70].mxu1  ;;  %v4017_v52 = vpop.f32.mrb[70].mxu0 }
 0x37b   : > { %v4622_v26 = vadd.f32 %v4621_v38, %v4620_v59  ;;  %v3741_v56 = vrot.slane %v3568_v39, 5  ;;  %v4193_v54 = vrot.slane %v4017_v52, 6  ;;  %v6734_v28 = vpop.f32.mrb[71].mxu0  ;;  %v6612_v22 = vpop.f32.mrb[71].mxu1 }
 0x37c   : > { %v4734_v18 = vsel %vm4309_vm8, %v4687_v6, 0.0  ;;  %4323 = vst.msk [vmem:[%s9371_s8 + $0x68] sm:$0xff] %vm4309_vm8, %v4286_v24  ;;  %v4575_v11 = vmul.f32 %v4450_v3, %v4286_v24 }
 0x37d   : > { %v4735_v32 = vadd.f32 %v4734_v18, %v4733_v8  ;;  %v3742_v25 = vsel %vm3709_vm6, %v3739_v13, %v3741_v56  ;;  %v4194_v7 = vsel %vm4163_vm7, %v4191_v20, %v4193_v54 }
 0x37e   : > { %v4623_v34 = vsel %vm4309_vm8, %v4575_v11, 0.0  ;;  %v4688_v62 = vmul.f32 %v4575_v11, %v4286_v24  ;;  %v3834_v58 = vadd.f32 %v3742_v25, %v9219_v15  ;;  %v4287_v41 = vadd.f32 %v4194_v7, %v3833_v53  ;;  %v3573_v47 = vpop.f32.mrb[72].mxu1  ;;  %v4022_v44 = vpop.f32.mrb[72].mxu0 }
 0x37f   : > { %v4624_v40 = vadd.f32 %v4623_v34, %v4622_v26  ;;  %v3743_v5 = vrot.slane %v3573_v47, 5  ;;  %v4195_v60 = vrot.slane %v4022_v44, 6  ;;  %v6737_v48 = vpop.f32.mrb[73].mxu0  ;;  %v6615_v63 = vpop.f32.mrb[73].mxu1 }
 0x380   : > { %v4736_v35 = vsel %vm4309_vm8, %v4688_v62, 0.0  ;;  %4324 = vst.msk [vmem:[%s9371_s8 + $0x70] sm:$0xff] %vm4309_vm8, %v4287_v41  ;;  %v4576_v46 = vmul.f32 %v4455_v12, %v4287_v41  ;;  %v4465_v24 = vpop.permute.xlu0 %4464 }
 0x381   : > { %v4737_v51 = vadd.f32 %v4736_v35, %v4735_v32  ;;  %v3744_v59 = vsel %vm3709_vm6, %v3741_v56, %v3743_v5  ;;  %v4196_v15 = vsel %vm4163_vm7, %v4193_v54, %v4195_v60 }
 0x382   : > { %v4625_v13 = vsel %vm4309_vm8, %v4576_v46, 0.0  ;;  %v4689_v20 = vmul.f32 %v4576_v46, %v4287_v41  ;;  %v3835_v9 = vadd.f32 %v3744_v59, %v9231_v30  ;;  %v4288_v4 = vadd.f32 %v4196_v15, %v3834_v58  ;;  %v3578_v23 = vpop.f32.mrb[74].mxu1  ;;  %v4027_v10 = vpop.f32.mrb[74].mxu0 }
 0x383   : > { %v4626_v3 = vadd.f32 %v4625_v13, %v4624_v40  ;;  %v3745_v8 = vrot.slane %v3578_v23, 5  ;;  %v4197_v17 = vrot.slane %v4027_v10, 6  ;;  %v6740_v0 = vpop.f32.mrb[75].mxu0  ;;  %v6618_v38 = vpop.f32.mrb[75].mxu1 }
 0x384   : > { %v4738_v6 = vsel %vm4309_vm8, %v4689_v20, 0.0  ;;  %4325 = vst.msk [vmem:[%s9371_s8 + $0x78] sm:$0xff] %vm4309_vm8, %v4288_v4  ;;  %v4577_v53 = vmul.f32 %v4460_v31, %v4288_v4  ;;  %v4470_v58 = vpop.permute.xlu1 %4469  ;;  %v4475_v20 = vpop.permute.xlu0 %4474 }
 0x385   : > { %v4739_v39 = vadd.f32 %v4738_v6, %v4737_v51  ;;  %v3746_v52 = vsel %vm3709_vm6, %v3743_v5, %v3745_v8  ;;  %v4198_v30 = vsel %vm4163_vm7, %v4195_v60, %v4197_v17 }
 0x386   : > { %v4627_v26 = vsel %vm4309_vm8, %v4577_v53, 0.0  ;;  %v4690_v56 = vmul.f32 %v4577_v53, %v4288_v4  ;;  %v3836_v54 = vadd.f32 %v3746_v52, %v9243_v61  ;;  %v4289_v28 = vadd.f32 %v4198_v30, %v3835_v9  ;;  %v3583_v22 = vpop.f32.mrb[76].mxu1  ;;  %v4032_v18 = vpop.f32.mrb[76].mxu0 }
 0x387   : > { %v4628_v11 = vadd.f32 %v4627_v26, %v4626_v3  ;;  %v3747_v12 = vrot.slane %v3583_v22, 5  ;;  %v4199_v32 = vrot.slane %v4032_v18, 6  ;;  %v6743_v25 = vpop.f32.mrb[77].mxu0  ;;  %v6621_v7 = vpop.f32.mrb[77].mxu1 }
 0x388   : > { %v4740_v34 = vsel %vm4309_vm8, %v4690_v56, 0.0  ;;  %4326 = vst.msk [vmem:[%s9371_s8 + $0x80] sm:$0xff] %vm4309_vm8, %v4289_v28  ;;  %v4578_v62 = vmul.f32 %v4465_v24, %v4289_v28  ;;  %v4480_v26 = vpop.permute.xlu1 %4479 }
 0x389   : > { %v4741_v41 = vadd.f32 %v4740_v34, %v4739_v39  ;;  %v3748_v47 = vsel %vm3709_vm6, %v3745_v8, %v3747_v12  ;;  %v4200_v61 = vsel %vm4163_vm7, %v4197_v17, %v4199_v32 }
 0x38a   : > { %v4629_v44 = vsel %vm4309_vm8, %v4578_v62, 0.0  ;;  %v4691_v40 = vmul.f32 %v4578_v62, %v4289_v28  ;;  %v3837_v5 = vadd.f32 %v3748_v47, %v9255_v27  ;;  %v4290_v60 = vadd.f32 %v4200_v61, %v3836_v54  ;;  %v3588_v48 = vpop.f32.mrb[78].mxu1  ;;  %v4037_v63 = vpop.f32.mrb[78].mxu0 }
 0x38b   : > { %v4630_v35 = vadd.f32 %v4629_v44, %v4628_v11  ;;  %v3749_v46 = vrot.slane %v3588_v48, 5  ;;  %v4201_v31 = vrot.slane %v4037_v63, 6  ;;  %v6746_v51 = vpop.f32.mrb[79].mxu0  ;;  %v6624_v59 = vpop.f32.mrb[79].mxu1 }
 0x38c   : > { %v4742_v15 = vsel %vm4309_vm8, %v4691_v40, 0.0  ;;  %4327 = vst.msk [vmem:[%s9371_s8 + $0x88] sm:$0xff] %vm4309_vm8, %v4290_v60  ;;  %v4579_v13 = vmul.f32 %v4470_v58, %v4290_v60  ;;  %v4485_v61 = vpop.permute.xlu0 %4484 }
 0x38d   : > { %v4743_v9 = vadd.f32 %v4742_v15, %v4741_v41  ;;  %v3750_v4 = vsel %vm3709_vm6, %v3747_v12, %v3749_v46  ;;  %v4202_v27 = vsel %vm4163_vm7, %v4199_v32, %v4201_v31 }
 0x38e   : > { %v4631_v23 = vsel %vm4309_vm8, %v4579_v13, 0.0  ;;  %v4692_v10 = vmul.f32 %v4579_v13, %v4290_v60  ;;  %v3838_v3 = vadd.f32 %v3750_v4, %v9267_v45  ;;  %v4291_v8 = vadd.f32 %v4202_v27, %v3837_v5  ;;  %v3593_v17 = vpop.f32.mrb[80].mxu1  ;;  %v4042_v0 = vpop.f32.mrb[80].mxu0 }
 0x38f   : > { %v4632_v38 = vadd.f32 %v4631_v23, %v4630_v35  ;;  %v3751_v6 = vrot.slane %v3593_v17, 5  ;;  %v4203_v53 = vrot.slane %v4042_v0, 6  ;;  %v6749_v24 = vpop.f32.mrb[81].mxu0  ;;  %v6627_v39 = vpop.f32.mrb[81].mxu1 }
 0x390   : > { %v4744_v52 = vsel %vm4309_vm8, %v4692_v10, 0.0  ;;  %4328 = vst.msk [vmem:[%s9371_s8 + $0x90] sm:$0xff] %vm4309_vm8, %v4291_v8  ;;  %v4580_v30 = vmul.f32 %v4475_v20, %v4291_v8  ;;  %v4490_v4 = vpop.permute.xlu1 %4489 }
 0x391   : > { %v4745_v56 = vadd.f32 %v4744_v52, %v4743_v9  ;;  %v3752_v54 = vsel %vm3709_vm6, %v3749_v46, %v3751_v6  ;;  %v4204_v45 = vsel %vm4163_vm7, %v4201_v31, %v4203_v53 }
 0x392   : > { %v4633_v28 = vsel %vm4309_vm8, %v4580_v30, 0.0  ;;  %v4693_v22 = vmul.f32 %v4580_v30, %v4291_v8  ;;  %v3839_v18 = vadd.f32 %v3752_v54, %v9279_v55  ;;  %v4292_v11 = vadd.f32 %v4204_v45, %v3838_v3  ;;  %v3598_v12 = vpop.f32.mrb[82].mxu1  ;;  %v4047_v32 = vpop.f32.mrb[82].mxu0 }
 0x393   : > { %v4634_v25 = vadd.f32 %v4633_v28, %v4632_v38  ;;  %v3753_v7 = vrot.slane %v3598_v12, 5  ;;  %v4205_v34 = vrot.slane %v4047_v32, 6  ;;  %v6752_v62 = vpop.f32.mrb[83].mxu0  ;;  %v6630_v58 = vpop.f32.mrb[83].mxu1 }
 0x394   : > { %v4746_v41 = vsel %vm4309_vm8, %v4693_v22, 0.0  ;;  %4329 = vst.msk [vmem:[%s9371_s8 + $0x98] sm:$0xff] %vm4309_vm8, %v4292_v11  ;;  %v4581_v47 = vmul.f32 %v4480_v26, %v4292_v11 }
 0x395   : > { %v4747_v44 = vadd.f32 %v4746_v41, %v4745_v56  ;;  %v3754_v40 = vsel %vm3709_vm6, %v3751_v6, %v3753_v7  ;;  %v4206_v55 = vsel %vm4163_vm7, %v4203_v53, %v4205_v34  ;;  %v4495_v56 = vpop.permute.xlu0 %4494 }
 0x396   : > { %v4635_v5 = vsel %vm4309_vm8, %v4581_v47, 0.0  ;;  %v4694_v60 = vmul.f32 %v4581_v47, %v4292_v11  ;;  %v3840_v48 = vadd.f32 %v3754_v40, %v9291_v29  ;;  %v4293_v63 = vadd.f32 %v4206_v55, %v3839_v18  ;;  %v3603_v35 = vpop.f32.mrb[84].mxu1  ;;  %v4052_v46 = vpop.f32.mrb[84].mxu0 }
 0x397   : > { %v4636_v31 = vadd.f32 %v4635_v5, %v4634_v25  ;;  %v3755_v51 = vrot.slane %v3603_v35, 5  ;;  %v4207_v59 = vrot.slane %v4052_v46, 6  ;;  %v6755_v15 = vpop.f32.mrb[85].mxu0  ;;  %v6633_v13 = vpop.f32.mrb[85].mxu1 }
 0x398   : > { %v4748_v20 = vsel %vm4309_vm8, %v4694_v60, 0.0  ;;  %4330 = vst.msk [vmem:[%s9371_s8 + $0xa0] sm:$0xff] %vm4309_vm8, %v4293_v63  ;;  %v4582_v9 = vmul.f32 %v4485_v61, %v4293_v63  ;;  %v4500_v61 = vpop.permute.xlu1 %4499 }
 0x399   : > { %v4749_v27 = vadd.f32 %v4748_v20, %v4747_v44  ;;  %v3756_v23 = vsel %vm3709_vm6, %v3753_v7, %v3755_v51  ;;  %v4208_v29 = vsel %vm4163_vm7, %v4205_v34, %v4207_v59 }
 0x39a   : > { %v4637_v10 = vsel %vm4309_vm8, %v4582_v9, 0.0  ;;  %v4695_v3 = vmul.f32 %v4582_v9, %v4293_v63  ;;  %v3841_v8 = vadd.f32 %v3756_v23, %v9301_v36  ;;  %v4294_v17 = vadd.f32 %v4208_v29, %v3840_v48  ;;  %v3608_v0 = vpop.f32.mrb[86].mxu1  ;;  %v4057_v38 = vpop.f32.mrb[86].mxu0 }
 0x39b   : > { %v4638_v6 = vadd.f32 %v4637_v10, %v4636_v31  ;;  %v3757_v53 = vrot.slane %v3608_v0, 5  ;;  %v4209_v24 = vrot.slane %v4057_v38, 6  ;;  %v6758_v39 = vpop.f32.mrb[87].mxu0  ;;  %v6636_v52 = vpop.f32.mrb[87].mxu1 }
 0x39c   : > { %v4750_v30 = vsel %vm4309_vm8, %v4695_v3, 0.0  ;;  %4331 = vst.msk [vmem:[%s9371_s8 + $0xa8] sm:$0xff] %vm4309_vm8, %v4294_v17  ;;  %v4583_v26 = vmul.f32 %v4490_v4, %v4294_v17  ;;  %v4505_v9 = vpop.permute.xlu0 %4504 }
 0x39d   : > { %v4751_v54 = vadd.f32 %v4750_v30, %v4749_v27  ;;  %v3758_v45 = vsel %vm3709_vm6, %v3755_v51, %v3757_v53  ;;  %v4210_v36 = vsel %vm4163_vm7, %v4207_v59, %v4209_v24  ;;  %v4510_v30 = vpop.permute.xlu1 %4509 }
 0x39e   : > { %v4639_v28 = vsel %vm4309_vm8, %v4583_v26, 0.0  ;;  %v4696_v22 = vmul.f32 %v4583_v26, %v4294_v17  ;;  %v3842_v18 = vadd.f32 %v3758_v45, %v9307_v19  ;;  %v4295_v11 = vadd.f32 %v4210_v36, %v3841_v8  ;;  %v3613_v12 = vpop.f32.mrb[88].mxu1  ;;  %v4062_v32 = vpop.f32.mrb[88].mxu0 }
 0x39f   : > { %v4640_v25 = vadd.f32 %v4639_v28, %v4638_v6  ;;  %v3759_v7 = vrot.slane %v3613_v12, 5  ;;  %v4211_v34 = vrot.slane %v4062_v32, 6  ;;  %v6761_v62 = vpop.f32.mrb[89].mxu0  ;;  %v6639_v58 = vpop.f32.mrb[89].mxu1 }
 0x3a0   : > { %v4752_v41 = vsel %vm4309_vm8, %v4696_v22, 0.0  ;;  %4332 = vst.msk [vmem:[%s9371_s8 + $0xb0] sm:$0xff] %vm4309_vm8, %v4295_v11  ;;  %v4584_v47 = vmul.f32 %v4495_v56, %v4295_v11  ;;  %v4515_v58 = vpop.permute.xlu0 %4514 }
 0x3a1   : > { %v4753_v44 = vadd.f32 %v4752_v41, %v4751_v54  ;;  %v3760_v40 = vsel %vm3709_vm6, %v3757_v53, %v3759_v7  ;;  %v4212_v19 = vsel %vm4163_vm7, %v4209_v24, %v4211_v34 }
 0x3a2   : > { %v4641_v55 = vsel %vm4309_vm8, %v4584_v47, 0.0  ;;  %v4697_v5 = vmul.f32 %v4584_v47, %v4295_v11  ;;  %v3843_v60 = vadd.f32 %v3760_v40, %v9312_v49  ;;  %v4296_v48 = vadd.f32 %v4212_v19, %v3842_v18  ;;  %v3618_v63 = vpop.f32.mrb[90].mxu1  ;;  %v4067_v35 = vpop.f32.mrb[90].mxu0 }
 0x3a3   : > { %v4642_v46 = vadd.f32 %v4641_v55, %v4640_v25  ;;  %v3761_v31 = vrot.slane %v3618_v63, 5  ;;  %v4213_v51 = vrot.slane %v4067_v35, 6  ;;  %v6764_v59 = vpop.f32.mrb[91].mxu0  ;;  %v6642_v15 = vpop.f32.mrb[91].mxu1 }
 0x3a4   : > { %v4754_v13 = vsel %vm4309_vm8, %v4697_v5, 0.0  ;;  %4333 = vst.msk [vmem:[%s9371_s8 + $0xb8] sm:$0xff] %vm4309_vm8, %v4296_v48  ;;  %v4585_v20 = vmul.f32 %v4500_v61, %v4296_v48  ;;  %v4520_v59 = vpop.permute.xlu1 %4519 }
 0x3a5   : > { %v4755_v4 = vadd.f32 %v4754_v13, %v4753_v44  ;;  %v3762_v27 = vsel %vm3709_vm6, %v3759_v7, %v3761_v31  ;;  %v4214_v49 = vsel %vm4163_vm7, %v4211_v34, %v4213_v51 }
 0x3a6   : > { %v4643_v23 = vsel %vm4309_vm8, %v4585_v20, 0.0  ;;  %v4698_v29 = vmul.f32 %v4585_v20, %v4296_v48  ;;  %v3844_v10 = vadd.f32 %v3762_v27, %v9317_v16  ;;  %v4297_v3 = vadd.f32 %v4214_v49, %v3843_v60  ;;  %v3623_v8 = vpop.f32.mrb[92].mxu1  ;;  %v4072_v17 = vpop.f32.mrb[92].mxu0 }
 0x3a7   : > { %v4644_v0 = vadd.f32 %v4643_v23, %v4642_v46  ;;  %v3763_v38 = vrot.slane %v3623_v8, 5  ;;  %v4215_v6 = vrot.slane %v4072_v17, 6  ;;  %v6767_v53 = vpop.f32.mrb[93].mxu0  ;;  %v6645_v24 = vpop.f32.mrb[93].mxu1 }
 0x3a8   : > { %v4756_v39 = vsel %vm4309_vm8, %v4698_v29, 0.0  ;;  %4334 = vst.msk [vmem:[%s9371_s8 + $0xc0] sm:$0xff] %vm4309_vm8, %v4297_v3  ;;  %v4586_v52 = vmul.f32 %v4505_v9, %v4297_v3 }
 0x3a9   : > { %v4757_v26 = vadd.f32 %v4756_v39, %v4755_v4  ;;  %v3764_v56 = vsel %vm3709_vm6, %v3761_v31, %v3763_v38  ;;  %v4216_v16 = vsel %vm4163_vm7, %v4213_v51, %v4215_v6 }
 0x3aa   : > { %v4645_v54 = vsel %vm4309_vm8, %v4586_v52, 0.0  ;;  %v4699_v45 = vmul.f32 %v4586_v52, %v4297_v3  ;;  %v3845_v36 = vadd.f32 %v3764_v56, %v9322_v1  ;;  %v4298_v28 = vadd.f32 %v4216_v16, %v3844_v10  ;;  %v3628_v22 = vpop.f32.mrb[94].mxu1  ;;  %v4077_v18 = vpop.f32.mrb[94].mxu0 }
 0x3ab   : > { %v4646_v11 = vadd.f32 %v4645_v54, %v4644_v0  ;;  %v3765_v12 = vrot.slane %v3628_v22, 5  ;;  %v4217_v32 = vrot.slane %v4077_v18, 6  ;;  %v6770_v25 = vpop.f32.mrb[95].mxu0  ;;  %v6648_v7 = vpop.f32.mrb[95].mxu1 }
 0x3ac   : > { %v4758_v34 = vsel %vm4309_vm8, %v4699_v45, 0.0  ;;  %4335 = vst.msk [vmem:[%s9371_s8 + $0xc8] sm:$0xff] %vm4309_vm8, %v4298_v28  ;;  %v4587_v62 = vmul.f32 %v4510_v30, %v4298_v28 }
 0x3ad   : > { %v4759_v41 = vadd.f32 %v4758_v34, %v4757_v26  ;;  %v3766_v47 = vsel %vm3709_vm6, %v3763_v38, %v3765_v12  ;;  %v4218_v1 = vsel %vm4163_vm7, %v4215_v6, %v4217_v32  ;;  %v4525_v6 = vpop.permute.xlu0 %4524 }
 0x3ae   : > { %v4647_v61 = vsel %vm4309_vm8, %v4587_v62, 0.0  ;;  %v4700_v44 = vmul.f32 %v4587_v62, %v4298_v28  ;;  %v3846_v40 = vadd.f32 %v3766_v47, %v9327_v14  ;;  %v4299_v19 = vadd.f32 %v4218_v1, %v3845_v36  ;;  %v3633_v55 = vpop.f32.mrb[96].mxu1  ;;  %v4082_v5 = vpop.f32.mrb[96].mxu0 }
 0x3af   : > { %v4648_v60 = vadd.f32 %v4647_v61, %v4646_v11  ;;  %v3767_v48 = vrot.slane %v3633_v55, 5  ;;  %v4219_v63 = vrot.slane %v4082_v5, 6  ;;  %v6773_v35 = vpop.f32.mrb[97].mxu0  ;;  %v6651_v46 = vpop.f32.mrb[97].mxu1 }
 0x3b0   : > { %v4760_v31 = vsel %vm4309_vm8, %v4700_v44, 0.0  ;;  %4336 = vst.msk [vmem:[%s9371_s8 + $0xd0] sm:$0xff] %vm4309_vm8, %v4299_v19  ;;  %v4588_v51 = vmul.f32 %v4515_v58, %v4299_v19 }
 0x3b1   : > { %v4761_v15 = vadd.f32 %v4760_v31, %v4759_v41  ;;  %v3768_v13 = vsel %vm3709_vm6, %v3765_v12, %v3767_v48  ;;  %v4220_v14 = vsel %vm4163_vm7, %v4217_v32, %v4219_v63  ;;  %v4530_v12 = vpop.permute.xlu1 %4529 }
 0x3b2   : > { %v4649_v20 = vsel %vm4309_vm8, %v4588_v51, 0.0  ;;  %v4701_v9 = vmul.f32 %v4588_v51, %v4299_v19  ;;  %v3847_v4 = vadd.f32 %v3768_v13, %v9332_v57  ;;  %v4300_v27 = vadd.f32 %v4220_v14, %v3846_v40  ;;  %v3638_v49 = vpop.f32.mrb[98].mxu1  ;;  %v4087_v23 = vpop.f32.mrb[98].mxu0 }
 0x3b3   : > { %v4650_v29 = vadd.f32 %v4649_v20, %v4648_v60  ;;  %v3769_v10 = vrot.slane %v3638_v49, 5  ;;  %v4221_v3 = vrot.slane %v4087_v23, 6  ;;  %v6776_v8 = vpop.f32.mrb[99].mxu0  ;;  %v6654_v17 = vpop.f32.mrb[99].mxu1 }
 0x3b4   : > { %v4762_v0 = vsel %vm4309_vm8, %v4701_v9, 0.0  ;;  %4337 = vst.msk [vmem:[%s9371_s8 + $0xd8] sm:$0xff] %vm4309_vm8, %v4300_v27  ;;  %v4589_v38 = vmul.f32 %v4520_v59, %v4300_v27  ;;  %v4535_v60 = vpop.permute.xlu0 %4534 }
 0x3b5   : > { %v4763_v53 = vadd.f32 %v4762_v0, %v4761_v15  ;;  %v3770_v24 = vsel %vm3709_vm6, %v3767_v48, %v3769_v10  ;;  %v4222_v57 = vsel %vm4163_vm7, %v4219_v63, %v4221_v3  ;;  %v4540_v23 = vpop.permute.xlu1 %4539 }
 0x3b6   : > { %v4651_v39 = vsel %vm4309_vm8, %v4589_v38, 0.0  ;;  %v4702_v52 = vmul.f32 %v4589_v38, %v4300_v27  ;;  %v3848_v30 = vadd.f32 %v3770_v24, %v9337_v42  ;;  %v4301_v26 = vadd.f32 %v4222_v57, %v3847_v4  ;;  %v3643_v56 = vpop.f32.mrb[100].mxu1  ;;  %v4092_v16 = vpop.f32.mrb[100].mxu0 }
 0x3b7   : > { %v4652_v54 = vadd.f32 %v4651_v39, %v4650_v29  ;;  %v3771_v45 = vrot.slane %v3643_v56, 5  ;;  %v4223_v36 = vrot.slane %v4092_v16, 6  ;;  %v6779_v28 = vpop.f32.mrb[101].mxu0  ;;  %v6657_v22 = vpop.f32.mrb[101].mxu1 }
 0x3b8   : > { %v4764_v18 = vsel %vm4309_vm8, %v4702_v52, 0.0  ;;  %4338 = vst.msk [vmem:[%s9371_s8 + $0xe0] sm:$0xff] %vm4309_vm8, %v4301_v26  ;;  %v4590_v11 = vmul.f32 %v4525_v6, %v4301_v26  ;;  %v4545_v56 = vpop.permute.xlu0 %4544 }
 0x3b9   : > { %v4765_v32 = vadd.f32 %v4764_v18, %v4763_v53  ;;  %v3772_v25 = vsel %vm3709_vm6, %v3769_v10, %v3771_v45  ;;  %v4224_v42 = vsel %vm4163_vm7, %v4221_v3, %v4223_v36 }
 0x3ba   : > { %v4653_v7 = vsel %vm4309_vm8, %v4590_v11, 0.0  ;;  %v4703_v34 = vmul.f32 %v4590_v11, %v4301_v26  ;;  %v3849_v62 = vadd.f32 %v3772_v25, %v9342_v43  ;;  %v4302_v58 = vadd.f32 %v4224_v42, %v3848_v30  ;;  %v3648_v41 = vpop.f32.mrb[102].mxu1  ;;  %v4097_v47 = vpop.f32.mrb[102].mxu0 }
 0x3bb   : > { %v4654_v1 = vadd.f32 %v4653_v7, %v4652_v54  ;;  %v3773_v61 = vrot.slane %v3648_v41, 5  ;;  %v4225_v44 = vrot.slane %v4097_v47, 6  ;;  %v6782_v40 = vpop.f32.mrb[103].mxu0  ;;  %v6660_v19 = vpop.f32.mrb[103].mxu1 }
 0x3bc   : > { %v4766_v55 = vsel %vm4309_vm8, %v4703_v34, 0.0  ;;  %4339 = vst.msk [vmem:[%s9371_s8 + $0xe8] sm:$0xff] %vm4309_vm8, %v4302_v58  ;;  %v4591_v5 = vmul.f32 %v4530_v12, %v4302_v58 }
 0x3bd   : > { %v4767_v48 = vadd.f32 %v4766_v55, %v4765_v32  ;;  %v3774_v63 = vsel %vm3709_vm6, %v3771_v45, %v3773_v61  ;;  %v4226_v43 = vsel %vm4163_vm7, %v4223_v36, %v4225_v44 }
 0x3be   : > { %v4655_v35 = vsel %vm4309_vm8, %v4591_v5, 0.0  ;;  %v4704_v46 = vmul.f32 %v4591_v5, %v4302_v58  ;;  %v3850_v31 = vadd.f32 %v3774_v63, %v9347_v33  ;;  %v4303_v51 = vadd.f32 %v4226_v43, %v3849_v62  ;;  %v3653_v59 = vpop.f32.mrb[104].mxu1  ;;  %v4102_v15 = vpop.f32.mrb[104].mxu0 }
 0x3bf   : > { %v4656_v13 = vadd.f32 %v4655_v35, %v4654_v1  ;;  %v3775_v14 = vrot.slane %v3653_v59, 5  ;;  %v4227_v20 = vrot.slane %v4102_v15, 6  ;;  %v6785_v9 = vpop.f32.mrb[105].mxu0  ;;  %v6663_v4 = vpop.f32.mrb[105].mxu1 }
 0x3c0   : > { %v4768_v27 = vsel %vm4309_vm8, %v4704_v46, 0.0  ;;  %4340 = vst.msk [vmem:[%s9371_s8 + $0xf0] sm:$0xff] %vm4309_vm8, %v4303_v51  ;;  %v4592_v49 = vmul.f32 %v4535_v60, %v4303_v51  ;;  %v4550_v58 = vpop.permute.xlu1 %4549  ;;  %v4555_v9 = vpop.permute.xlu0 %4554 }
 0x3c1   : > { %v4769_v29 = vadd.f32 %v4768_v27, %v4767_v48  ;;  %v3776_v10 = vsel %vm3709_vm6, %v3773_v61, %v3775_v14  ;;  %v4228_v33 = vsel %vm4163_vm7, %v4225_v44, %v4227_v20 }
 0x3c2   : > { %v4657_v3 = vsel %vm4309_vm8, %v4592_v49, 0.0  ;;  %v4705_v8 = vmul.f32 %v4592_v49, %v4303_v51  ;;  %v3851_v17 = vadd.f32 %v3776_v10, %v9352_v2  ;;  %v4304_v0 = vadd.f32 %v4228_v33, %v3850_v31  ;;  %v3658_v38 = vpop.f32.mrb[106].mxu1  ;;  %v4107_v6 = vpop.f32.mrb[106].mxu0 }
 0x3c3   : > { %v4658_v53 = vadd.f32 %v4657_v3, %v4656_v13  ;;  %v3777_v24 = vrot.slane %v3658_v38, 5  ;;  %v4229_v57 = vrot.slane %v4107_v6, 6  ;;  %v6788_v39 = vpop.f32.mrb[107].mxu0  ;;  %v6666_v52 = vpop.f32.mrb[107].mxu1 }
 0x3c4   : > { %v4770_v30 = vsel %vm4309_vm8, %v4705_v8, 0.0  ;;  %4341 = vst.msk [vmem:[%s9371_s8 + $0xf8] sm:$0xff] %vm4309_vm8, %v4304_v0  ;;  %v4593_v26 = vmul.f32 %v4540_v23, %v4304_v0 }
 0x3c5   : > { %v4771_v16 = vadd.f32 %v4770_v30, %v4769_v29  ;;  %v3778_v54 = vsel %vm3709_vm6, %v3775_v14, %v3777_v24  ;;  %v4230_v2 = vsel %vm4163_vm7, %v4227_v20, %v4229_v57 }
 0x3c6   : > { %v4659_v45 = vsel %vm4309_vm8, %v4593_v26, 0.0  ;;  %v4706_v36 = vmul.f32 %v4593_v26, %v4304_v0  ;;  %v3852_v28 = vadd.f32 %v3778_v54, %v9355_v21  ;;  %v4305_v22 = vadd.f32 %v4230_v2, %v3851_v17  ;;  %v3663_v18 = vpop.f32.mrb[108].mxu1  ;;  %v4112_v11 = vpop.f32.mrb[108].mxu0 }
 0x3c7   : > { %v4660_v12 = vadd.f32 %v4659_v45, %v4658_v53  ;;  %v3779_v32 = vrot.slane %v3663_v18, 5  ;;  %v4231_v25 = vrot.slane %v4112_v11, 6  ;;  %v6791_v42 = vpop.f32.mrb[109].mxu0  ;;  %v6669_v7 = vpop.f32.mrb[109].mxu1 }
 0x3c8   : > { %v4772_v34 = vsel %vm4309_vm8, %v4706_v36, 0.0  ;;  %4342 = vst.msk [vmem:[%s9371_s8 + $0x100] sm:$0xff] %vm4309_vm8, %v4305_v22  ;;  %v4594_v62 = vmul.f32 %v4545_v56, %v4305_v22  ;;  %v4560_v17 = vpop.permute.xlu1 %4559 }
 0x3c9   : > { %v4773_v41 = vadd.f32 %v4772_v34, %v4771_v16  ;;  %v3780_v47 = vsel %vm3709_vm6, %v3777_v24, %v3779_v32  ;;  %v4232_v21 = vsel %vm4163_vm7, %v4229_v57, %v4231_v25 }
 0x3ca   : > { %v4661_v1 = vsel %vm4309_vm8, %v4594_v62, 0.0  ;;  %v4707_v61 = vmul.f32 %v4594_v62, %v4305_v22  ;;  %v3853_v44 = vadd.f32 %v3780_v47, %v9358_v37  ;;  %v4306_v40 = vadd.f32 %v4232_v21, %v3852_v28  ;;  %v3668_v19 = vpop.f32.mrb[110].mxu1  ;;  %v4117_v55 = vpop.f32.mrb[110].mxu0 }
 0x3cb   : > { %v4662_v5 = vadd.f32 %v4661_v1, %v4660_v12  ;;  %v3781_v60 = vrot.slane %v3668_v19, 5  ;;  %v4233_v48 = vrot.slane %v4117_v55, 6  ;;  %v6794_v63 = vpop.f32.mrb[111].mxu0  ;;  %v6672_v43 = vpop.f32.mrb[111].mxu1 }
 0x3cc   : > { %v4774_v35 = vsel %vm4309_vm8, %v4707_v61, 0.0  ;;  %4343 = vst.msk [vmem:[%s9371_s8 + $0x108] sm:$0xff] %vm4309_vm8, %v4306_v40  ;;  %v4595_v46 = vmul.f32 %v4550_v58, %v4306_v40 }
 0x3cd   : > { %v4775_v31 = vadd.f32 %v4774_v35, %v4773_v41  ;;  %v3782_v51 = vsel %vm3709_vm6, %v3779_v32, %v3781_v60  ;;  %v4234_v59 = vsel %vm4163_vm7, %v4231_v25, %v4233_v48 }
 0x3ce   : > { %v4663_v37 = vsel %vm4309_vm8, %v4595_v46, 0.0  ;;  %v4708_v15 = vmul.f32 %v4595_v46, %v4306_v40  ;;  %v3854_v13 = vadd.f32 %v3782_v51, %v9361_v50  ;;  %v4307_v14 = vadd.f32 %v4234_v59, %v3853_v44  ;;  %v4122_v20 = vpop.f32.mrb[112].mxu0 }
 0x3cf   : > { %v4664_v4 = vadd.f32 %v4663_v37, %v4662_v5  ;;  %v4235_v27 = vrot.slane %v4122_v20, 6  ;;  %v6797_v49 = vpop.f32.mrb[113].mxu0 }
 0x3d0   : > { %v4776_v23 = vsel %vm4309_vm8, %v4708_v15, 0.0  ;;  %4344 = vst.msk [vmem:[%s9371_s8 + $0x110] sm:$0xff] %vm4309_vm8, %v4307_v14  ;;  %v4596_v29 = vmul.f32 %v4555_v9, %v4307_v14 }
 0x3d1   : > { %v4777_v10 = vadd.f32 %v4776_v23, %v4775_v31  ;;  %v4236_v33 = vsel %vm4163_vm7, %v4233_v48, %v4235_v27 }
 0x3d2   : > { %v4665_v3 = vsel %vm4309_vm8, %v4596_v29, 0.0  ;;  %v4709_v8 = vmul.f32 %v4596_v29, %v4307_v14  ;;  %v4308_v50 = vadd.f32 %v4236_v33, %v3854_v13 }
 0x3d3   : > { %v4666_v0 = vadd.f32 %v4665_v3, %v4664_v4 }
 0x3d4   : > { %v4778_v38 = vsel %vm4309_vm8, %v4709_v8, 0.0  ;;  %4345 = vst.msk [vmem:[%s9371_s8 + $0x118] sm:$0xff] %vm4309_vm8, %v4308_v50  ;;  %v4597_v6 = vmul.f32 %v4560_v17, %v4308_v50 }
 0x3d5   : > { %v4779_v53 = vadd.f32 %v4778_v38, %v4777_v10 }
 0x3d6   : > { %v4667_v24 = vsel %vm4309_vm8, %v4597_v6, 0.0  ;;  %v4710_v57 = vmul.f32 %v4597_v6, %v4308_v50 }
 0x3d7   : > { %v4668_v39 = vadd.f32 %v4667_v24, %v4666_v0 }
 0x3d8   : > { %v4780_v52 = vsel %vm4309_vm8, %v4710_v57, 0.0 }
 0x3d9   : > { %v4669_v30 = vrot.slane %v4668_v39, 4  ;;  %v4781_v26 = vadd.f32 %v4780_v52, %v4779_v53 }
 0x3db   : > { %v4782_v56 = vrot.slane %v4781_v26, 4  ;;  %v4670_v16 = vadd.f32 %v4669_v30, %v4668_v39 }
 0x3dd   : > { %v4671_v54 = vrot.slane %v4670_v16, 2  ;;  %v4783_v2 = vadd.f32 %v4782_v56, %v4781_v26 }
 0x3df   : > { %v4672_v45 = vadd.f32 %v4671_v54, %v4670_v16  ;;  %v4784_v36 = vrot.slane %v4783_v2, 2 }
 0x3e1   : > { %v4673_v28 = vrot.slane %v4672_v45, 1  ;;  %v4785_v22 = vadd.f32 %v4784_v36, %v4783_v2 }
 0x3e3   : > { %v4786_v18 = vrot.slane %v4785_v22, 1  ;;  %v4674_v11 = vadd.f32 %v4673_v28, %v4672_v45 }
 0x3e5   : > { %v4787_v12 = vadd.f32 %v4786_v18, %v4785_v22 }
 0x3e7   : > { %v4789_v32 = vsel %vm4788_vm9, %v4674_v11, %v4787_v12 }
 0x3e8   : > { %4791 = vst.msk [vmem:[%s198_s11] sm:$0x3] %vm4790_vm10, %v4789_v32 }
 0x3e9   : > { %6961 = shalt.err (!%p6958_p3)
}
 0x3ea   : > { %s6962_s30 = scalar_lea.hbm %s9626_s20, 32  ;;  %s6966_s6 = scalar_lea.hbm %s9672_s4, 64 }
 0x3eb   : > { %p6963_p4 = scmp.ne.s32.totalorder %s9626_s20, %s6962_s30  ;;  %p6967_p9 = scmp.lt.u32.totalorder %s9626_s20, %s9672_s4 }
 0x3ec   : > { %p6968_p10 = scmp.lt.u32.totalorder %s6966_s6, %s6962_s30  ;;  %p6970_p12 = scmp.lt.u32.totalorder %s6962_s30, %s9626_s20 }
 0x3ed   : > { %p6964_p7 = pnand %p6963_p4, %p7079_p5 }
 0x3ee   : > { %p6969_p11 = por %p6968_p10, %p6967_p9 }
 0x3ef   : > { %p6965_p8 = pneg %p6964_p7 }
 0x3f0   : > { %p6971_p13 = por %p6970_p12, %p6969_p11 }
 0x3f2   : > { %p6972_p0 = pnand %p6971_p13, %p6965_p8 }
 0x3f4   : > { %6975 = shalt.err (!%p6972_p0)
}
 0x3f5   : > { %6802 = dma.vmem_to_hbm [thread:$0]  (%p7079_p5), %s9628_s12, 32, %s9626_s20, %s4798_s22  }
 0x3f6 PF: > { %p6808_p1 = scmp.ge.s32.totalorder %s7010_s18, 2  ;;  %s4834_s9 = sand.u32 1, %s6998_s15  }
 0x3f7   : > { %s4835_s10 = scalar_lea.sflag [#allocation3], %s4834_s9 }
 0x3f8   : > { %p6805_p2 = pnand %p6808_p1, %p7083_p6 }
 0x3fa   : > { %6993 = dma.done.wait (!%p6805_p2), %s4835_s10, 32  }
 0x3fb   : > { %6995 = vsyncadd (!%p6805_p2), %s4835_s10, 4294967264  ;;  %p15_p3 = scmp.ge.s32.totalorder %s7066_s21, 4   ;;  %s9675_s15 = smov %s7002_s16 }
 0x3fc   : > { %s9676_s16 = smov %s7006_s17  ;;  %s9677_s17 = smov %s7077_s24 }
 0x3fd   : > { %s9678_s18 = smov %s7066_s21  ;;  %17 = sbr.rel (!%p15_p3) target bundleno = 3 (0x3), region = 87 }
 0x404   :  { %4840 = vsyncpa [#allocation3], 1 }
 0x405   :  { %4842 = vsyncpa [#allocation3 + $0x1], 1 }

</bundles_post_ra>
